<compile_context>
chip_gen: v6e
topology: v6e:2x2x1
jax: 0.10.0
libtpu: 0.0.40
codegen_flags: <defaults>
</compile_context>

<pallas_src>
import math
import functools

import jax
import jax.numpy as jnp
from jax.experimental import pallas as pl
from jax.experimental.pallas import tpu as pltpu


# -----------------------------------------------------------------------------
# Kernel
# -----------------------------------------------------------------------------
def _tca_kernel(
    q_ref, k_ref, v_ref,                              # (L, Bn, E) / (S, Bn, E)
    wq_ref, bq_ref, wk_ref, bk_ref, wv_ref, bv_ref,   # in-proj
    wo_ref, bo_ref,                                   # attention out-proj
    w1_ref, b1_ref, w2_ref, b2_ref,                   # FFN
    g1_ref, be1_ref, g2_ref, be2_ref,                 # LayerNorms
    out_ref,
    *, num_heads: int, head_dim: int,
):
    f32 = jnp.float32
    eps = 1e-5
    L, Bn, E = q_ref.shape
    S = k_ref.shape[0]
    R = L * Bn            # query rows in this block, (l, b)-ordered
    Rk = S * Bn

    # ---- load activation blocks, flatten to row slabs (row r -> l=r//Bn, b=r%Bn)
    xq = q_ref[...].reshape(R, E)
    xk = k_ref[...].reshape(Rk, E)
    xv = v_ref[...].reshape(Rk, E)

    # ---- fused Q/K/V projections over ALL rows: one big MXU matmul each ----
    # TODO(synk): at production E/F sizes cast matmul operands to bfloat16
    # (keep preferred_element_type=f32 accumulation) for 2-4x MXU throughput.
    q = jnp.dot(xq, wq_ref[...], preferred_element_type=f32) + bq_ref[...]
    k = jnp.dot(xk, wk_ref[...], preferred_element_type=f32) + bk_ref[...]
    v = jnp.dot(xv, wv_ref[...], preferred_element_type=f32) + bv_ref[...]

    # ---- scaled dot-product attention: all heads batched in one dot_general
    # per batch element (small static loop over Bn; no per-head matmuls, no
    # lane-axis concatenate of head outputs).
    # TODO(synk): for large S, switch to an online-softmax (flash) loop over S
    # tiles instead of materializing full (H, L, S) scores per batch element.
    scale = 1.0 / math.sqrt(head_dim)
    q3 = q.reshape(L, Bn, E)
    k3 = k.reshape(S, Bn, E)
    v3 = v.reshape(S, Bn, E)

    attn_cols = []
    for b in range(Bn):
        qh = pltpu.einshape("lhd->hld", q3[:, b, :].reshape(L, num_heads, head_dim))
        kh = pltpu.einshape("lhd->hld", k3[:, b, :].reshape(S, num_heads, head_dim))
        vh = pltpu.einshape("lhd->hld", v3[:, b, :].reshape(S, num_heads, head_dim))
        s = jnp.einsum("hld,hsd->hls", qh, kh, preferred_element_type=f32) * scale
        s = s - jnp.max(s, axis=-1, keepdims=True)
        p = jnp.exp(s)
        p = p * pl.reciprocal(jnp.sum(p, axis=-1, keepdims=True), approx=True)
        ob = jnp.einsum("hls,hsd->hld", p, vh, preferred_element_type=f32)  # (H,L,hd)
        attn_cols.append(pltpu.einshape("hld->lhd", ob).reshape(L, E))
    attn = jnp.stack(attn_cols, axis=1).reshape(R, E)   # back to (l, b) row order

    # ---- attention out-projection + residual + LayerNorm1 ------------------
    attn = jnp.dot(attn, wo_ref[...], preferred_element_type=f32) + bo_ref[...]
    x = xq + attn                                   # dropout1 = identity (eval)
    mu = jnp.mean(x, axis=-1, keepdims=True)
    var = jnp.mean((x - mu) ** 2, axis=-1, keepdims=True)
    x = (x - mu) * jax.lax.rsqrt(var + eps) * g1_ref[...] + be1_ref[...]

    # ---- feed-forward + residual + LayerNorm2 -------------------------------
    h1 = jnp.dot(x, w1_ref[...], preferred_element_type=f32) + b1_ref[...]
    h1 = jnp.maximum(h1, 0.0)                       # ReLU; dropout = identity
    ff = jnp.dot(h1, w2_ref[...], preferred_element_type=f32) + b2_ref[...]
    y = x + ff                                      # dropout2 = identity
    mu2 = jnp.mean(y, axis=-1, keepdims=True)
    var2 = jnp.mean((y - mu2) ** 2, axis=-1, keepdims=True)
    y = (y - mu2) * jax.lax.rsqrt(var2 + eps) * g2_ref[...] + be2_ref[...]

    # NOTE: last-dim E < 128 at toy sizes -> masked stores; at production E the
    # output block is already lane-dense.
    out_ref[...] = y.reshape(L, Bn, E).astype(out_ref.dtype)


# -----------------------------------------------------------------------------
# Wrapper
# -----------------------------------------------------------------------------
def _pick_batch_block(n, cap=32):
    """Batch elements per grid step.

    The block's second-minor dim must be a multiple of 8 or equal the full
    batch, so: use the whole batch when small, else the largest multiple-of-8
    divisor <= cap, else fall back to the full batch.
    """
    if n <= cap:
        return n
    best = None
    for bn in range(8, cap + 1, 8):
        if n % bn == 0:
            best = bn
    return best if best is not None else n


def transformer_ca_layer(src, src_2, src_3, params, *, num_heads):
    """src (L,N,E), src_2/src_3 (S,N,E) in PyTorch MultiheadAttention layout.

    No layout transposes in the wrapper; output is returned in (L, N, E).
    """
    L, N, E = src.shape
    S = src_2.shape[0]
    head_dim = E // num_heads
    F = params["w1"].shape[1]
    bn = _pick_batch_block(N)
    assert N % bn == 0

    def full2d(shape):
        return pl.BlockSpec(shape, lambda b: (0, 0))

    in_specs = [
        pl.BlockSpec((L, bn, E), lambda b: (0, b, 0)),   # q block (bn batch elems)
        pl.BlockSpec((S, bn, E), lambda b: (0, b, 0)),   # k
        pl.BlockSpec((S, bn, E), lambda b: (0, b, 0)),   # v
        full2d((E, E)), full2d((1, E)),                  # wq, bq
        full2d((E, E)), full2d((1, E)),                  # wk, bk
        full2d((E, E)), full2d((1, E)),                  # wv, bv
        full2d((E, E)), full2d((1, E)),                  # wo, bo
        full2d((E, F)), full2d((1, F)),                  # w1, b1
        full2d((F, E)), full2d((1, E)),                  # w2, b2
        full2d((1, E)), full2d((1, E)),                  # gamma1, beta1
        full2d((1, E)), full2d((1, E)),                  # gamma2, beta2
    ]

    kernel = functools.partial(_tca_kernel, num_heads=num_heads, head_dim=head_dim)

    out = pl.pallas_call(
        kernel,
        out_shape=jax.ShapeDtypeStruct((L, N, E), src.dtype),
        grid_spec=pltpu.PrefetchScalarGridSpec(
            num_scalar_prefetch=0,
            grid=(N // bn,),
            in_specs=in_specs,
            out_specs=pl.BlockSpec((L, bn, E), lambda b: (0, b, 0)),
        ),
        compiler_params=pltpu.CompilerParams(dimension_semantics=("parallel",)),
    )(
        src, src_2, src_3,
        params["wq"], params["bq"], params["wk"], params["bk"],
        params["wv"], params["bv"], params["wo"], params["bo"],
        params["w1"], params["b1"], params["w2"], params["b2"],
        params["g1"], params["be1"], params["g2"], params["be2"],
    )
    return out   # already (L, N, E) seq-first


# -----------------------------------------------------------------------------
# Pure-JAX reference (same math) for a correctness check
# -----------------------------------------------------------------------------
def reference(src, src_2, src_3, params, *, num_heads):
    L, N, E = src.shape
    hd = E // num_heads
    eps = 1e-5
    q = jnp.transpose(src, (1, 0, 2))
    k = jnp.transpose(src_2, (1, 0, 2))
    v = jnp.transpose(src_3, (1, 0, 2))

    def ln(x, g, b):
        mu = jnp.mean(x, -1, keepdims=True)
        var = jnp.mean((x - mu) ** 2, -1, keepdims=True)
        return (x - mu) / jnp.sqrt(var + eps) * g + b

    qp = q @ params["wq"] + params["bq"]
    kp = k @ params["wk"] + params["bk"]
    vp = v @ params["wv"] + params["bv"]
    qh = qp.reshape(N, L, num_heads, hd).transpose(0, 2, 1, 3)
    kh = kp.reshape(N, -1, num_heads, hd).transpose(0, 2, 1, 3)
    vh = vp.reshape(N, -1, num_heads, hd).transpose(0, 2, 1, 3)
    s = jnp.einsum("nhld,nhsd->nhls", qh, kh) / math.sqrt(hd)
    p = jax.nn.softmax(s, axis=-1)
    o = jnp.einsum("nhls,nhsd->nhld", p, vh).transpose(0, 2, 1, 3).reshape(N, L, E)
    o = o @ params["wo"] + params["bo"]
    x = ln(q + o, params["g1"], params["be1"])
    ff = jnp.maximum(x @ params["w1"] + params["b1"], 0.0) @ params["w2"] + params["b2"]
    x = ln(x + ff, params["g2"], params["be2"])
    return jnp.transpose(x, (1, 0, 2))


# -----------------------------------------------------------------------------
# Main
# -----------------------------------------------------------------------------
if __name__ == "__main__":
    # Small shapes consistent with the module's forward.
    L, S, N = 8, 8, 2          # query len, key/value len, batch
    E, H, F = 32, 4, 64        # embed_dim, num_heads, dim_feedforward

    key = jax.random.PRNGKey(0)
    ks = jax.random.split(key, 16)

    def w(k, shape, scale=0.05):
        return (scale * jax.random.normal(k, shape)).astype(jnp.float32)

    # Weights stored (in, out) so the kernel computes x @ W + b (== PyTorch x @ W.T + b).
    params = dict(
        wq=w(ks[0], (E, E)), bq=w(ks[1], (1, E)),
        wk=w(ks[2], (E, E)), bk=w(ks[3], (1, E)),
        wv=w(ks[4], (E, E)), bv=w(ks[5], (1, E)),
        wo=w(ks[6], (E, E)), bo=w(ks[7], (1, E)),
        w1=w(ks[8], (E, F)), b1=w(ks[9], (1, F)),
        w2=w(ks[10], (F, E)), b2=w(ks[11], (1, E)),
        g1=jnp.ones((1, E), jnp.float32), be1=jnp.zeros((1, E), jnp.float32),
        g2=jnp.ones((1, E), jnp.float32), be2=jnp.zeros((1, E), jnp.float32),
    )

    src = jax.random.normal(ks[12], (L, N, E), jnp.float32)
    src_2 = jax.random.normal(ks[13], (S, N, E), jnp.float32)
    src_3 = jax.random.normal(ks[14], (S, N, E), jnp.float32)

    # TODO(synk): dropout layers (p=0.1) are treated as identity (eval-mode semantics).
    out = transformer_ca_layer(src, src_2, src_3, params, num_heads=H)
    out = jax.block_until_ready(out)

    ref = reference(src, src_2, src_3, params, num_heads=H)
    assert out.shape == (L, N, E)
    # Tolerance loosened slightly vs 1e-4 because of approx=True softmax reciprocal.
    assert jnp.allclose(out, ref, atol=5e-3, rtol=5e-3), "mismatch vs JAX reference"

    print("KERNEL_OK")
</pallas_src>

<mosaic_0001>
module attributes {stable_mosaic.version = 11 : i64} {
  func.func @_tca_kernel(%arg0: i32, %arg1: memref<8x2x32xf32, #tpu.memory_space<vmem>>, %arg2: memref<8x2x32xf32, #tpu.memory_space<vmem>>, %arg3: memref<8x2x32xf32, #tpu.memory_space<vmem>>, %arg4: memref<32x32xf32, #tpu.memory_space<vmem>>, %arg5: memref<1x32xf32, #tpu.memory_space<vmem>>, %arg6: memref<32x32xf32, #tpu.memory_space<vmem>>, %arg7: memref<1x32xf32, #tpu.memory_space<vmem>>, %arg8: memref<32x32xf32, #tpu.memory_space<vmem>>, %arg9: memref<1x32xf32, #tpu.memory_space<vmem>>, %arg10: memref<32x32xf32, #tpu.memory_space<vmem>>, %arg11: memref<1x32xf32, #tpu.memory_space<vmem>>, %arg12: memref<32x64xf32, #tpu.memory_space<vmem>>, %arg13: memref<1x64xf32, #tpu.memory_space<vmem>>, %arg14: memref<64x32xf32, #tpu.memory_space<vmem>>, %arg15: memref<1x32xf32, #tpu.memory_space<vmem>>, %arg16: memref<1x32xf32, #tpu.memory_space<vmem>>, %arg17: memref<1x32xf32, #tpu.memory_space<vmem>>, %arg18: memref<1x32xf32, #tpu.memory_space<vmem>>, %arg19: memref<1x32xf32, #tpu.memory_space<vmem>>, %arg20: memref<8x2x32xf32, #tpu.memory_space<vmem>>) attributes {dimension_semantics = [#tpu.dimension_semantics<parallel>], iteration_bounds = array<i64: 1>, scalar_prefetch = 0 : i64, scratch_operands = 0 : i64, tpu.core_type = #tpu.core_type<tc>, window_params = [{transform_indices = @transform_0, window_bounds = array<i64: 8, 2, 32>}, {transform_indices = @transform_1, window_bounds = array<i64: 8, 2, 32>}, {transform_indices = @transform_2, window_bounds = array<i64: 8, 2, 32>}, {pipeline_mode = #tpu.pipeline_mode<synchronous>, transform_indices = @transform_3, window_bounds = array<i64: 32, 32>}, {pipeline_mode = #tpu.pipeline_mode<synchronous>, transform_indices = @transform_4, window_bounds = array<i64: 1, 32>}, {pipeline_mode = #tpu.pipeline_mode<synchronous>, transform_indices = @transform_5, window_bounds = array<i64: 32, 32>}, {pipeline_mode = #tpu.pipeline_mode<synchronous>, transform_indices = @transform_6, window_bounds = array<i64: 1, 32>}, {pipeline_mode = #tpu.pipeline_mode<synchronous>, transform_indices = @transform_7, window_bounds = array<i64: 32, 32>}, {pipeline_mode = #tpu.pipeline_mode<synchronous>, transform_indices = @transform_8, window_bounds = array<i64: 1, 32>}, {pipeline_mode = #tpu.pipeline_mode<synchronous>, transform_indices = @transform_9, window_bounds = array<i64: 32, 32>}, {pipeline_mode = #tpu.pipeline_mode<synchronous>, transform_indices = @transform_10, window_bounds = array<i64: 1, 32>}, {pipeline_mode = #tpu.pipeline_mode<synchronous>, transform_indices = @transform_11, window_bounds = array<i64: 32, 64>}, {pipeline_mode = #tpu.pipeline_mode<synchronous>, transform_indices = @transform_12, window_bounds = array<i64: 1, 64>}, {pipeline_mode = #tpu.pipeline_mode<synchronous>, transform_indices = @transform_13, window_bounds = array<i64: 64, 32>}, {pipeline_mode = #tpu.pipeline_mode<synchronous>, transform_indices = @transform_14, window_bounds = array<i64: 1, 32>}, {pipeline_mode = #tpu.pipeline_mode<synchronous>, transform_indices = @transform_15, window_bounds = array<i64: 1, 32>}, {pipeline_mode = #tpu.pipeline_mode<synchronous>, transform_indices = @transform_16, window_bounds = array<i64: 1, 32>}, {pipeline_mode = #tpu.pipeline_mode<synchronous>, transform_indices = @transform_17, window_bounds = array<i64: 1, 32>}, {pipeline_mode = #tpu.pipeline_mode<synchronous>, transform_indices = @transform_18, window_bounds = array<i64: 1, 32>}, {transform_indices = @transform_19, window_bounds = array<i64: 8, 2, 32>}]} {
    %c0 = arith.constant 0 : index
    %c0_0 = arith.constant 0 : index
    %c0_1 = arith.constant 0 : index
    %0 = vector.load %arg1[%c0, %c0_0, %c0_1] : memref<8x2x32xf32, #tpu.memory_space<vmem>>, vector<8x2x32xf32>
    %1 = vector.shape_cast %0 : vector<8x2x32xf32> to vector<16x32xf32>
    %c0_2 = arith.constant 0 : index
    %c0_3 = arith.constant 0 : index
    %c0_4 = arith.constant 0 : index
    %2 = vector.load %arg2[%c0_2, %c0_3, %c0_4] : memref<8x2x32xf32, #tpu.memory_space<vmem>>, vector<8x2x32xf32>
    %3 = vector.shape_cast %2 : vector<8x2x32xf32> to vector<16x32xf32>
    %c0_5 = arith.constant 0 : index
    %c0_6 = arith.constant 0 : index
    %c0_7 = arith.constant 0 : index
    %4 = vector.load %arg3[%c0_5, %c0_6, %c0_7] : memref<8x2x32xf32, #tpu.memory_space<vmem>>, vector<8x2x32xf32>
    %5 = vector.shape_cast %4 : vector<8x2x32xf32> to vector<16x32xf32>
    %c0_8 = arith.constant 0 : index
    %c0_9 = arith.constant 0 : index
    %6 = vector.load %arg4[%c0_8, %c0_9] : memref<32x32xf32, #tpu.memory_space<vmem>>, vector<32x32xf32>
    %cst = arith.constant dense<0.000000e+00> : vector<16x32xf32>
    %7 = tpu.matmul %1, %6, %cst {dimension_numbers = #tpu.dot_dimension_numbers<[1], [0], [0], [1], [0, 0, 1, 1], [], []>} : vector<16x32xf32>, vector<32x32xf32>, vector<16x32xf32> -> vector<16x32xf32>
    %c0_10 = arith.constant 0 : index
    %c0_11 = arith.constant 0 : index
    %8 = vector.load %arg5[%c0_10, %c0_11] : memref<1x32xf32, #tpu.memory_space<vmem>>, vector<1x32xf32>
    %9 = vector.broadcast %8 : vector<1x32xf32> to vector<16x32xf32>
    %10 = arith.addf %7, %9 : vector<16x32xf32>
    %c0_12 = arith.constant 0 : index
    %c0_13 = arith.constant 0 : index
    %11 = vector.load %arg6[%c0_12, %c0_13] : memref<32x32xf32, #tpu.memory_space<vmem>>, vector<32x32xf32>
    %cst_14 = arith.constant dense<0.000000e+00> : vector<16x32xf32>
    %12 = tpu.matmul %3, %11, %cst_14 {dimension_numbers = #tpu.dot_dimension_numbers<[1], [0], [0], [1], [0, 0, 1, 1], [], []>} : vector<16x32xf32>, vector<32x32xf32>, vector<16x32xf32> -> vector<16x32xf32>
    %c0_15 = arith.constant 0 : index
    %c0_16 = arith.constant 0 : index
    %13 = vector.load %arg7[%c0_15, %c0_16] : memref<1x32xf32, #tpu.memory_space<vmem>>, vector<1x32xf32>
    %14 = vector.broadcast %13 : vector<1x32xf32> to vector<16x32xf32>
    %15 = arith.addf %12, %14 : vector<16x32xf32>
    %c0_17 = arith.constant 0 : index
    %c0_18 = arith.constant 0 : index
    %16 = vector.load %arg8[%c0_17, %c0_18] : memref<32x32xf32, #tpu.memory_space<vmem>>, vector<32x32xf32>
    %cst_19 = arith.constant dense<0.000000e+00> : vector<16x32xf32>
    %17 = tpu.matmul %5, %16, %cst_19 {dimension_numbers = #tpu.dot_dimension_numbers<[1], [0], [0], [1], [0, 0, 1, 1], [], []>} : vector<16x32xf32>, vector<32x32xf32>, vector<16x32xf32> -> vector<16x32xf32>
    %c0_20 = arith.constant 0 : index
    %c0_21 = arith.constant 0 : index
    %18 = vector.load %arg9[%c0_20, %c0_21] : memref<1x32xf32, #tpu.memory_space<vmem>>, vector<1x32xf32>
    %19 = vector.broadcast %18 : vector<1x32xf32> to vector<16x32xf32>
    %20 = arith.addf %17, %19 : vector<16x32xf32>
    %21 = vector.shape_cast %10 : vector<16x32xf32> to vector<8x2x32xf32>
    %22 = vector.shape_cast %15 : vector<16x32xf32> to vector<8x2x32xf32>
    %23 = vector.shape_cast %20 : vector<16x32xf32> to vector<8x2x32xf32>
    %24 = vector.extract_strided_slice %21 {offsets = [0, 0, 0], sizes = [8, 1, 32], strides = [1, 1, 1]} : vector<8x2x32xf32> to vector<8x1x32xf32>
    %25 = vector.shape_cast %24 : vector<8x1x32xf32> to vector<8x32xf32>
    %26 = vector.shape_cast %25 : vector<8x32xf32> to vector<8x4x8xf32>
    %27 = tpu.transpose %26, [1, 0, 2] : vector<8x4x8xf32> -> vector<4x8x8xf32>
    %28 = vector.extract_strided_slice %22 {offsets = [0, 0, 0], sizes = [8, 1, 32], strides = [1, 1, 1]} : vector<8x2x32xf32> to vector<8x1x32xf32>
    %29 = vector.shape_cast %28 : vector<8x1x32xf32> to vector<8x32xf32>
    %30 = vector.shape_cast %29 : vector<8x32xf32> to vector<8x4x8xf32>
    %31 = tpu.transpose %30, [1, 0, 2] : vector<8x4x8xf32> -> vector<4x8x8xf32>
    %32 = vector.extract_strided_slice %23 {offsets = [0, 0, 0], sizes = [8, 1, 32], strides = [1, 1, 1]} : vector<8x2x32xf32> to vector<8x1x32xf32>
    %33 = vector.shape_cast %32 : vector<8x1x32xf32> to vector<8x32xf32>
    %34 = vector.shape_cast %33 : vector<8x32xf32> to vector<8x4x8xf32>
    %35 = tpu.transpose %34, [1, 0, 2] : vector<8x4x8xf32> -> vector<4x8x8xf32>
    "tpu.trace_start"() <{level = 10 : i32, message = "hld,hsd->hls"}> : () -> ()
    %cst_22 = arith.constant dense<0.000000e+00> : vector<4x8x8xf32>
    %36 = tpu.matmul %27, %31, %cst_22 {dimension_numbers = #tpu.dot_dimension_numbers<[2], [2], [1], [1], [0, 0, 0, 1, 1, 1], [0], [0]>} : vector<4x8x8xf32>, vector<4x8x8xf32>, vector<4x8x8xf32> -> vector<4x8x8xf32>
    "tpu.trace_stop"() : () -> ()
    %cst_23 = arith.constant 0.353553385 : f32
    %37 = vector.broadcast %cst_23 : f32 to vector<4x8x8xf32>
    %38 = arith.mulf %36, %37 : vector<4x8x8xf32>
    %cst_24 = arith.constant dense<0xFF800000> : vector<4x8xf32>
    %39 = vector.multi_reduction <maximumf>, %38, %cst_24 [2] : vector<4x8x8xf32> to vector<4x8xf32>
    %40 = vector.shape_cast %39 : vector<4x8xf32> to vector<4x8x1xf32>
    %41 = vector.broadcast %40 : vector<4x8x1xf32> to vector<4x8x8xf32>
    %42 = arith.subf %38, %41 : vector<4x8x8xf32>
    %43 = math.exp %42 : vector<4x8x8xf32>
    %cst_25 = arith.constant dense<0.000000e+00> : vector<4x8xf32>
    %44 = vector.multi_reduction <add>, %43, %cst_25 [2] : vector<4x8x8xf32> to vector<4x8xf32>
    %45 = vector.shape_cast %44 : vector<4x8xf32> to vector<4x8x1xf32>
    %46 = tpu.reciprocal %45 {approx = true} : vector<4x8x1xf32> -> vector<4x8x1xf32>
    %47 = vector.broadcast %46 : vector<4x8x1xf32> to vector<4x8x8xf32>
    %48 = arith.mulf %43, %47 : vector<4x8x8xf32>
    "tpu.trace_start"() <{level = 10 : i32, message = "hls,hsd->hld"}> : () -> ()
    %cst_26 = arith.constant dense<0.000000e+00> : vector<4x8x8xf32>
    %49 = tpu.matmul %48, %35, %cst_26 {dimension_numbers = #tpu.dot_dimension_numbers<[2], [1], [1], [2], [0, 0, 0, 1, 1, 2], [0], [0]>} : vector<4x8x8xf32>, vector<4x8x8xf32>, vector<4x8x8xf32> -> vector<4x8x8xf32>
    "tpu.trace_stop"() : () -> ()
    %50 = tpu.transpose %49, [1, 0, 2] : vector<4x8x8xf32> -> vector<8x4x8xf32>
    %51 = vector.shape_cast %50 : vector<8x4x8xf32> to vector<8x32xf32>
    %52 = vector.extract_strided_slice %21 {offsets = [0, 1, 0], sizes = [8, 1, 32], strides = [1, 1, 1]} : vector<8x2x32xf32> to vector<8x1x32xf32>
    %53 = vector.shape_cast %52 : vector<8x1x32xf32> to vector<8x32xf32>
    %54 = vector.shape_cast %53 : vector<8x32xf32> to vector<8x4x8xf32>
    %55 = tpu.transpose %54, [1, 0, 2] : vector<8x4x8xf32> -> vector<4x8x8xf32>
    %56 = vector.extract_strided_slice %22 {offsets = [0, 1, 0], sizes = [8, 1, 32], strides = [1, 1, 1]} : vector<8x2x32xf32> to vector<8x1x32xf32>
    %57 = vector.shape_cast %56 : vector<8x1x32xf32> to vector<8x32xf32>
    %58 = vector.shape_cast %57 : vector<8x32xf32> to vector<8x4x8xf32>
    %59 = tpu.transpose %58, [1, 0, 2] : vector<8x4x8xf32> -> vector<4x8x8xf32>
    %60 = vector.extract_strided_slice %23 {offsets = [0, 1, 0], sizes = [8, 1, 32], strides = [1, 1, 1]} : vector<8x2x32xf32> to vector<8x1x32xf32>
    %61 = vector.shape_cast %60 : vector<8x1x32xf32> to vector<8x32xf32>
    %62 = vector.shape_cast %61 : vector<8x32xf32> to vector<8x4x8xf32>
    %63 = tpu.transpose %62, [1, 0, 2] : vector<8x4x8xf32> -> vector<4x8x8xf32>
    "tpu.trace_start"() <{level = 10 : i32, message = "hld,hsd->hls"}> : () -> ()
    %cst_27 = arith.constant dense<0.000000e+00> : vector<4x8x8xf32>
    %64 = tpu.matmul %55, %59, %cst_27 {dimension_numbers = #tpu.dot_dimension_numbers<[2], [2], [1], [1], [0, 0, 0, 1, 1, 1], [0], [0]>} : vector<4x8x8xf32>, vector<4x8x8xf32>, vector<4x8x8xf32> -> vector<4x8x8xf32>
    "tpu.trace_stop"() : () -> ()
    %cst_28 = arith.constant 0.353553385 : f32
    %65 = vector.broadcast %cst_28 : f32 to vector<4x8x8xf32>
    %66 = arith.mulf %64, %65 : vector<4x8x8xf32>
    %cst_29 = arith.constant dense<0xFF800000> : vector<4x8xf32>
    %67 = vector.multi_reduction <maximumf>, %66, %cst_29 [2] : vector<4x8x8xf32> to vector<4x8xf32>
    %68 = vector.shape_cast %67 : vector<4x8xf32> to vector<4x8x1xf32>
    %69 = vector.broadcast %68 : vector<4x8x1xf32> to vector<4x8x8xf32>
    %70 = arith.subf %66, %69 : vector<4x8x8xf32>
    %71 = math.exp %70 : vector<4x8x8xf32>
    %cst_30 = arith.constant dense<0.000000e+00> : vector<4x8xf32>
    %72 = vector.multi_reduction <add>, %71, %cst_30 [2] : vector<4x8x8xf32> to vector<4x8xf32>
    %73 = vector.shape_cast %72 : vector<4x8xf32> to vector<4x8x1xf32>
    %74 = tpu.reciprocal %73 {approx = true} : vector<4x8x1xf32> -> vector<4x8x1xf32>
    %75 = vector.broadcast %74 : vector<4x8x1xf32> to vector<4x8x8xf32>
    %76 = arith.mulf %71, %75 : vector<4x8x8xf32>
    "tpu.trace_start"() <{level = 10 : i32, message = "hls,hsd->hld"}> : () -> ()
    %cst_31 = arith.constant dense<0.000000e+00> : vector<4x8x8xf32>
    %77 = tpu.matmul %76, %63, %cst_31 {dimension_numbers = #tpu.dot_dimension_numbers<[2], [1], [1], [2], [0, 0, 0, 1, 1, 2], [0], [0]>} : vector<4x8x8xf32>, vector<4x8x8xf32>, vector<4x8x8xf32> -> vector<4x8x8xf32>
    "tpu.trace_stop"() : () -> ()
    %78 = tpu.transpose %77, [1, 0, 2] : vector<4x8x8xf32> -> vector<8x4x8xf32>
    %79 = vector.shape_cast %78 : vector<8x4x8xf32> to vector<8x32xf32>
    %80 = vector.shape_cast %51 : vector<8x32xf32> to vector<8x1x32xf32>
    %81 = vector.shape_cast %79 : vector<8x32xf32> to vector<8x1x32xf32>
    %82 = tpu.concatenate %80, %81 in 1 : vector<8x1x32xf32>, vector<8x1x32xf32> -> vector<8x2x32xf32>
    %83 = vector.shape_cast %82 : vector<8x2x32xf32> to vector<16x32xf32>
    %c0_32 = arith.constant 0 : index
    %c0_33 = arith.constant 0 : index
    %84 = vector.load %arg10[%c0_32, %c0_33] : memref<32x32xf32, #tpu.memory_space<vmem>>, vector<32x32xf32>
    %cst_34 = arith.constant dense<0.000000e+00> : vector<16x32xf32>
    %85 = tpu.matmul %83, %84, %cst_34 {dimension_numbers = #tpu.dot_dimension_numbers<[1], [0], [0], [1], [0, 0, 1, 1], [], []>} : vector<16x32xf32>, vector<32x32xf32>, vector<16x32xf32> -> vector<16x32xf32>
    %c0_35 = arith.constant 0 : index
    %c0_36 = arith.constant 0 : index
    %86 = vector.load %arg11[%c0_35, %c0_36] : memref<1x32xf32, #tpu.memory_space<vmem>>, vector<1x32xf32>
    %87 = vector.broadcast %86 : vector<1x32xf32> to vector<16x32xf32>
    %88 = arith.addf %85, %87 : vector<16x32xf32>
    %89 = arith.addf %1, %88 : vector<16x32xf32>
    %cst_37 = arith.constant dense<0.000000e+00> : vector<16xf32>
    %90 = vector.multi_reduction <add>, %89, %cst_37 [1] : vector<16x32xf32> to vector<16xf32>
    %91 = vector.shape_cast %90 : vector<16xf32> to vector<16x1xf32>
    %cst_38 = arith.constant 3.200000e+01 : f32
    %92 = vector.broadcast %cst_38 : f32 to vector<16x1xf32>
    %93 = arith.divf %91, %92 : vector<16x1xf32>
    %94 = vector.broadcast %93 : vector<16x1xf32> to vector<16x32xf32>
    %95 = arith.subf %89, %94 : vector<16x32xf32>
    %96 = arith.mulf %95, %95 : vector<16x32xf32>
    %cst_39 = arith.constant dense<0.000000e+00> : vector<16xf32>
    %97 = vector.multi_reduction <add>, %96, %cst_39 [1] : vector<16x32xf32> to vector<16xf32>
    %98 = vector.shape_cast %97 : vector<16xf32> to vector<16x1xf32>
    %cst_40 = arith.constant 3.200000e+01 : f32
    %99 = vector.broadcast %cst_40 : f32 to vector<16x1xf32>
    %100 = arith.divf %98, %99 : vector<16x1xf32>
    %101 = vector.broadcast %93 : vector<16x1xf32> to vector<16x32xf32>
    %102 = arith.subf %89, %101 : vector<16x32xf32>
    %cst_41 = arith.constant 9.99999974E-6 : f32
    %103 = vector.broadcast %cst_41 : f32 to vector<16x1xf32>
    %104 = arith.addf %100, %103 : vector<16x1xf32>
    %105 = math.rsqrt %104 : vector<16x1xf32>
    %106 = vector.broadcast %105 : vector<16x1xf32> to vector<16x32xf32>
    %107 = arith.mulf %102, %106 : vector<16x32xf32>
    %c0_42 = arith.constant 0 : index
    %c0_43 = arith.constant 0 : index
    %108 = vector.load %arg16[%c0_42, %c0_43] : memref<1x32xf32, #tpu.memory_space<vmem>>, vector<1x32xf32>
    %109 = vector.broadcast %108 : vector<1x32xf32> to vector<16x32xf32>
    %110 = arith.mulf %107, %109 : vector<16x32xf32>
    %c0_44 = arith.constant 0 : index
    %c0_45 = arith.constant 0 : index
    %111 = vector.load %arg17[%c0_44, %c0_45] : memref<1x32xf32, #tpu.memory_space<vmem>>, vector<1x32xf32>
    %112 = vector.broadcast %111 : vector<1x32xf32> to vector<16x32xf32>
    %113 = arith.addf %110, %112 : vector<16x32xf32>
    %c0_46 = arith.constant 0 : index
    %c0_47 = arith.constant 0 : index
    %114 = vector.load %arg12[%c0_46, %c0_47] : memref<32x64xf32, #tpu.memory_space<vmem>>, vector<32x64xf32>
    %cst_48 = arith.constant dense<0.000000e+00> : vector<16x64xf32>
    %115 = tpu.matmul %113, %114, %cst_48 {dimension_numbers = #tpu.dot_dimension_numbers<[1], [0], [0], [1], [0, 0, 1, 1], [], []>} : vector<16x32xf32>, vector<32x64xf32>, vector<16x64xf32> -> vector<16x64xf32>
    %c0_49 = arith.constant 0 : index
    %c0_50 = arith.constant 0 : index
    %116 = vector.load %arg13[%c0_49, %c0_50] : memref<1x64xf32, #tpu.memory_space<vmem>>, vector<1x64xf32>
    %117 = vector.broadcast %116 : vector<1x64xf32> to vector<16x64xf32>
    %118 = arith.addf %115, %117 : vector<16x64xf32>
    %cst_51 = arith.constant 0.000000e+00 : f32
    %119 = vector.broadcast %cst_51 : f32 to vector<16x64xf32>
    %120 = arith.maximumf %118, %119 : vector<16x64xf32>
    %c0_52 = arith.constant 0 : index
    %c0_53 = arith.constant 0 : index
    %121 = vector.load %arg14[%c0_52, %c0_53] : memref<64x32xf32, #tpu.memory_space<vmem>>, vector<64x32xf32>
    %cst_54 = arith.constant dense<0.000000e+00> : vector<16x32xf32>
    %122 = tpu.matmul %120, %121, %cst_54 {dimension_numbers = #tpu.dot_dimension_numbers<[1], [0], [0], [1], [0, 0, 1, 1], [], []>} : vector<16x64xf32>, vector<64x32xf32>, vector<16x32xf32> -> vector<16x32xf32>
    %c0_55 = arith.constant 0 : index
    %c0_56 = arith.constant 0 : index
    %123 = vector.load %arg15[%c0_55, %c0_56] : memref<1x32xf32, #tpu.memory_space<vmem>>, vector<1x32xf32>
    %124 = vector.broadcast %123 : vector<1x32xf32> to vector<16x32xf32>
    %125 = arith.addf %122, %124 : vector<16x32xf32>
    %126 = arith.addf %113, %125 : vector<16x32xf32>
    %cst_57 = arith.constant dense<0.000000e+00> : vector<16xf32>
    %127 = vector.multi_reduction <add>, %126, %cst_57 [1] : vector<16x32xf32> to vector<16xf32>
    %128 = vector.shape_cast %127 : vector<16xf32> to vector<16x1xf32>
    %cst_58 = arith.constant 3.200000e+01 : f32
    %129 = vector.broadcast %cst_58 : f32 to vector<16x1xf32>
    %130 = arith.divf %128, %129 : vector<16x1xf32>
    %131 = vector.broadcast %130 : vector<16x1xf32> to vector<16x32xf32>
    %132 = arith.subf %126, %131 : vector<16x32xf32>
    %133 = arith.mulf %132, %132 : vector<16x32xf32>
    %cst_59 = arith.constant dense<0.000000e+00> : vector<16xf32>
    %134 = vector.multi_reduction <add>, %133, %cst_59 [1] : vector<16x32xf32> to vector<16xf32>
    %135 = vector.shape_cast %134 : vector<16xf32> to vector<16x1xf32>
    %cst_60 = arith.constant 3.200000e+01 : f32
    %136 = vector.broadcast %cst_60 : f32 to vector<16x1xf32>
    %137 = arith.divf %135, %136 : vector<16x1xf32>
    %138 = vector.broadcast %130 : vector<16x1xf32> to vector<16x32xf32>
    %139 = arith.subf %126, %138 : vector<16x32xf32>
    %cst_61 = arith.constant 9.99999974E-6 : f32
    %140 = vector.broadcast %cst_61 : f32 to vector<16x1xf32>
    %141 = arith.addf %137, %140 : vector<16x1xf32>
    %142 = math.rsqrt %141 : vector<16x1xf32>
    %143 = vector.broadcast %142 : vector<16x1xf32> to vector<16x32xf32>
    %144 = arith.mulf %139, %143 : vector<16x32xf32>
    %c0_62 = arith.constant 0 : index
    %c0_63 = arith.constant 0 : index
    %145 = vector.load %arg18[%c0_62, %c0_63] : memref<1x32xf32, #tpu.memory_space<vmem>>, vector<1x32xf32>
    %146 = vector.broadcast %145 : vector<1x32xf32> to vector<16x32xf32>
    %147 = arith.mulf %144, %146 : vector<16x32xf32>
    %c0_64 = arith.constant 0 : index
    %c0_65 = arith.constant 0 : index
    %148 = vector.load %arg19[%c0_64, %c0_65] : memref<1x32xf32, #tpu.memory_space<vmem>>, vector<1x32xf32>
    %149 = vector.broadcast %148 : vector<1x32xf32> to vector<16x32xf32>
    %150 = arith.addf %147, %149 : vector<16x32xf32>
    %151 = vector.shape_cast %150 : vector<16x32xf32> to vector<8x2x32xf32>
    %c0_66 = arith.constant 0 : index
    %c0_67 = arith.constant 0 : index
    %c0_68 = arith.constant 0 : index
    %152 = vector.load %arg20[%c0_66, %c0_67, %c0_68] : memref<8x2x32xf32, #tpu.memory_space<vmem>>, vector<8x2x32xf32>
    tpu.vector_store %arg20[%c0_66, %c0_67, %c0_68], %151 {strides = array<i32>} : memref<8x2x32xf32, #tpu.memory_space<vmem>>, vector<8x2x32xf32>,
    return
  }
  func.func @transform_0(%arg0: i32) -> (i32, i32, i32) {
    %c0_i32 = arith.constant 0 : i32
    %c0_i32_0 = arith.constant 0 : i32
    %c0_i32_1 = arith.constant 0 : i32
    return %c0_i32, %arg0, %c0_i32_0 : i32, i32, i32
  }
  func.func @transform_1(%arg0: i32) -> (i32, i32, i32) {
    %c0_i32 = arith.constant 0 : i32
    %c0_i32_0 = arith.constant 0 : i32
    %c0_i32_1 = arith.constant 0 : i32
    return %c0_i32, %arg0, %c0_i32_0 : i32, i32, i32
  }
  func.func @transform_2(%arg0: i32) -> (i32, i32, i32) {
    %c0_i32 = arith.constant 0 : i32
    %c0_i32_0 = arith.constant 0 : i32
    %c0_i32_1 = arith.constant 0 : i32
    return %c0_i32, %arg0, %c0_i32_0 : i32, i32, i32
  }
  func.func @transform_3(%arg0: i32) -> (i32, i32) {
    %c0_i32 = arith.constant 0 : i32
    %c0_i32_0 = arith.constant 0 : i32
    %c0_i32_1 = arith.constant 0 : i32
    return %c0_i32, %c0_i32_0 : i32, i32
  }
  func.func @transform_4(%arg0: i32) -> (i32, i32) {
    %c0_i32 = arith.constant 0 : i32
    %c0_i32_0 = arith.constant 0 : i32
    %c0_i32_1 = arith.constant 0 : i32
    return %c0_i32, %c0_i32_0 : i32, i32
  }
  func.func @transform_5(%arg0: i32) -> (i32, i32) {
    %c0_i32 = arith.constant 0 : i32
    %c0_i32_0 = arith.constant 0 : i32
    %c0_i32_1 = arith.constant 0 : i32
    return %c0_i32, %c0_i32_0 : i32, i32
  }
  func.func @transform_6(%arg0: i32) -> (i32, i32) {
    %c0_i32 = arith.constant 0 : i32
    %c0_i32_0 = arith.constant 0 : i32
    %c0_i32_1 = arith.constant 0 : i32
    return %c0_i32, %c0_i32_0 : i32, i32
  }
  func.func @transform_7(%arg0: i32) -> (i32, i32) {
    %c0_i32 = arith.constant 0 : i32
    %c0_i32_0 = arith.constant 0 : i32
    %c0_i32_1 = arith.constant 0 : i32
    return %c0_i32, %c0_i32_0 : i32, i32
  }
  func.func @transform_8(%arg0: i32) -> (i32, i32) {
    %c0_i32 = arith.constant 0 : i32
    %c0_i32_0 = arith.constant 0 : i32
    %c0_i32_1 = arith.constant 0 : i32
    return %c0_i32, %c0_i32_0 : i32, i32
  }
  func.func @transform_9(%arg0: i32) -> (i32, i32) {
    %c0_i32 = arith.constant 0 : i32
    %c0_i32_0 = arith.constant 0 : i32
    %c0_i32_1 = arith.constant 0 : i32
    return %c0_i32, %c0_i32_0 : i32, i32
  }
  func.func @transform_10(%arg0: i32) -> (i32, i32) {
    %c0_i32 = arith.constant 0 : i32
    %c0_i32_0 = arith.constant 0 : i32
    %c0_i32_1 = arith.constant 0 : i32
    return %c0_i32, %c0_i32_0 : i32, i32
  }
  func.func @transform_11(%arg0: i32) -> (i32, i32) {
    %c0_i32 = arith.constant 0 : i32
    %c0_i32_0 = arith.constant 0 : i32
    %c0_i32_1 = arith.constant 0 : i32
    return %c0_i32, %c0_i32_0 : i32, i32
  }
  func.func @transform_12(%arg0: i32) -> (i32, i32) {
    %c0_i32 = arith.constant 0 : i32
    %c0_i32_0 = arith.constant 0 : i32
    %c0_i32_1 = arith.constant 0 : i32
    return %c0_i32, %c0_i32_0 : i32, i32
  }
  func.func @transform_13(%arg0: i32) -> (i32, i32) {
    %c0_i32 = arith.constant 0 : i32
    %c0_i32_0 = arith.constant 0 : i32
    %c0_i32_1 = arith.constant 0 : i32
    return %c0_i32, %c0_i32_0 : i32, i32
  }
  func.func @transform_14(%arg0: i32) -> (i32, i32) {
    %c0_i32 = arith.constant 0 : i32
    %c0_i32_0 = arith.constant 0 : i32
    %c0_i32_1 = arith.constant 0 : i32
    return %c0_i32, %c0_i32_0 : i32, i32
  }
  func.func @transform_15(%arg0: i32) -> (i32, i32) {
    %c0_i32 = arith.constant 0 : i32
    %c0_i32_0 = arith.constant 0 : i32
    %c0_i32_1 = arith.constant 0 : i32
    return %c0_i32, %c0_i32_0 : i32, i32
  }
  func.func @transform_16(%arg0: i32) -> (i32, i32) {
    %c0_i32 = arith.constant 0 : i32
    %c0_i32_0 = arith.constant 0 : i32
    %c0_i32_1 = arith.constant 0 : i32
    return %c0_i32, %c0_i32_0 : i32, i32
  }
  func.func @transform_17(%arg0: i32) -> (i32, i32) {
    %c0_i32 = arith.constant 0 : i32
    %c0_i32_0 = arith.constant 0 : i32
    %c0_i32_1 = arith.constant 0 : i32
    return %c0_i32, %c0_i32_0 : i32, i32
  }
  func.func @transform_18(%arg0: i32) -> (i32, i32) {
    %c0_i32 = arith.constant 0 : i32
    %c0_i32_0 = arith.constant 0 : i32
    %c0_i32_1 = arith.constant 0 : i32
    return %c0_i32, %c0_i32_0 : i32, i32
  }
  func.func @transform_19(%arg0: i32) -> (i32, i32, i32) {
    %c0_i32 = arith.constant 0 : i32
    %c0_i32_0 = arith.constant 0 : i32
    %c0_i32_1 = arith.constant 0 : i32
    return %c0_i32, %arg0, %c0_i32_0 : i32, i32, i32
  }
}

</mosaic_0001>

<bundles_post_ra>
// kernel: tpu_custom_call.1
= control target key start
LH: loop header
LB: loop body
LE: loop exit
PB: predicated region body
PF: predicated region fallthrough
CT: control target
= control target key end

     0   :  { %s8476_s0 = inlined_call_operand.hbm [shape: f32[8,2,32], index: 0, kind: input, shape index: {}]   ;;  %s8477_s1 = inlined_call_operand.hbm [shape: f32[8,2,32], index: 1, kind: input, shape index: {}]   ;;  %s8478_s2 = inlined_call_operand.hbm [shape: f32[8,2,32], index: 2, kind: input, shape index: {}]   ;;  %s8479_s3 = inlined_call_operand.vmem [shape: f32[32,32], index: 3, kind: input, shape index: {}]   ;;  %s8480_s4 = inlined_call_operand.vmem [shape: f32[1,32], index: 4, kind: input, shape index: {}]   ;;  %s8481_s5 = inlined_call_operand.vmem [shape: f32[32,32], index: 5, kind: input, shape index: {}]   ;;  %s8482_s6 = inlined_call_operand.vmem [shape: f32[1,32], index: 6, kind: input, shape index: {}]   ;;  %s8483_s7 = inlined_call_operand.vmem [shape: f32[32,32], index: 7, kind: input, shape index: {}]   ;;  %s8484_s8 = inlined_call_operand.vmem [shape: f32[1,32], index: 8, kind: input, shape index: {}]   ;;  %s8485_s9 = inlined_call_operand.hbm [shape: f32[32,32], index: 9, kind: input, shape index: {}]   ;;  %s8486_s10 = inlined_call_operand.vmem [shape: f32[1,32], index: 10, kind: input, shape index: {}]   ;;  %s8487_s11 = inlined_call_operand.hbm [shape: f32[32,64], index: 11, kind: input, shape index: {}]   ;;  %s8488_s12 = inlined_call_operand.vmem [shape: f32[1,64], index: 12, kind: input, shape index: {}]   ;;  %s8489_s13 = inlined_call_operand.vmem [shape: f32[64,32], index: 13, kind: input, shape index: {}]   ;;  %s8490_s14 = inlined_call_operand.vmem [shape: f32[1,32], index: 14, kind: input, shape index: {}]   ;;  %s8491_s15 = inlined_call_operand.vmem [shape: f32[1,32], index: 15, kind: input, shape index: {}]   ;;  %s8492_s16 = inlined_call_operand.vmem [shape: f32[1,32], index: 16, kind: input, shape index: {}]   ;;  %s8493_s17 = inlined_call_operand.vmem [shape: f32[1,32], index: 17, kind: input, shape index: {}]   ;;  %s8494_s18 = inlined_call_operand.vmem [shape: f32[1,32], index: 18, kind: input, shape index: {}]   ;;  %s8495_s19 = inlined_call_operand.hbm [shape: f32[8,2,32], index: 19, kind: output, shape index: {}]  }
   0x1   :  { %8559 = sst [smem:[#allocation69_spill]] %s8476_s0 }
   0x2   :  { %8560 = sst [smem:[#allocation70_spill]] %s8477_s1 }
   0x3   :  { %8561 = sst [smem:[#allocation71_spill]] %s8478_s2 }
   0x4   :  { %8562 = sst [smem:[#allocation72_spill]] %s8479_s3 }
   0x5   :  { %24 = vsyncpa [#allocation3], 0 }
   0x6   :  { %25 = vsyncpa [#allocation6], 0 }
   0x7   :  { %26 = vsyncpa [#allocation9], 0 }
   0x8   :  { %27 = vsyncpa [#allocation4], 0  ;;  %s6723_s0 = smov [#allocation5]   ;;  %s6724_s20 = smov [#allocation8]  }
   0x9   :  { %s45_s30 = sshll.u32 %s6723_s0, 4  ;;  %s81_s21 = sshll.u32 %s6724_s20, 4  ;;  %s46_s30 = int_to_ptr.vmem [resolvable:$true] %s45_s30  ;;  %s82_s21 = int_to_ptr.vmem [resolvable:$true] %s81_s21 }
   0xa   :  { %s6603_s1 = scalar_lea.vmem %s46_s30, 256  ;;  %p6608_p1 = scmp.lt.s32.totalorder %s46_s30, %s46_s30 }
   0xb   :  { %p6604_p0 = scmp.ne.s32.totalorder %s46_s30, %s6603_s1  ;;  %p6609_p2 = scmp.lt.s32.totalorder %s6603_s1, %s6603_s1 }
   0xd   :  { %p6610_p3 = por %p6609_p2, %p6608_p1 }
   0xf   :  { %p6611_p4 = pnand %p6610_p3, %p6604_p0 }
  0x11   :  { %6614 = shalt.err (!%p6611_p4)
}
  0x12   :  { %s6725_s22 = smov 32   ;;  %s6726_s2 = smov 2  }
  0x13   :  { %s8563_s25 = sld [smem:[#allocation70_spill]]  ;;  %s6623_s3 = scalar_lea.vmem %s82_s21, 512 }
  0x14   :  { %p6624_p5 = scmp.ne.s32.totalorder %s82_s21, %s6623_s3  ;;  %p6628_p6 = scmp.lt.s32.totalorder %s82_s21, %s82_s21 }
  0x15   :  { %p6629_p7 = scmp.lt.s32.totalorder %s6623_s3, %s6623_s3 }
  0x17   :  { %p6630_p8 = por %p6629_p7, %p6628_p6 }
  0x19   :  { %51 = dma.hbm_to_vmem [thread:$0]  %s8563_s25, 256, %s46_s30, [#allocation6], %s6725_s22, %s6725_s22, %s6726_s2  }
  0x1a   :  { %p6631_p9 = pnand %p6630_p8, %p6624_p5 }
  0x1c   :  { %6634 = shalt.err (!%p6631_p9)
}
  0x1d   :  { %s6727_s26 = smov 128   ;;  %s6728_s27 = smov 8  }
  0x1e   :  { %87 = dma.hbm_to_vmem [thread:$0]  %s8485_s9, 512, %s82_s21, [#allocation9], %s6727_s26, %s6727_s26, %s6728_s27  }
  0x1f   :  { %s6729_s0 = smov [#allocation2]   ;;  %s6730_s1 = smov [#allocation7]  }
  0x20   :  { %s33_s20 = sshll.u32 %s6729_s0, 4  ;;  %s57_s30 = sshll.u32 %s6730_s1, 4  ;;  %s34_s20 = int_to_ptr.vmem [resolvable:$true] %s33_s20  ;;  %s58_s30 = int_to_ptr.vmem [resolvable:$true] %s57_s30 }
  0x21   :  { %s6643_s23 = scalar_lea.vmem %s34_s20, 256  ;;  %p6648_p11 = scmp.lt.s32.totalorder %s34_s20, %s34_s20 }
  0x22   :  { %p6644_p10 = scmp.ne.s32.totalorder %s34_s20, %s6643_s23  ;;  %p6649_p12 = scmp.lt.s32.totalorder %s6643_s23, %s6643_s23 }
  0x24   :  { %p6650_p13 = por %p6649_p12, %p6648_p11 }
  0x26   :  { %p6651_p0 = pnand %p6650_p13, %p6644_p10 }
  0x28   :  { %6654 = shalt.err (!%p6651_p0)
}
  0x29   :  { %s8564_s3 = sld [smem:[#allocation69_spill]]  ;;  %s6663_s9 = scalar_lea.vmem %s58_s30, 256 }
  0x2a   :  { %p6664_p1 = scmp.ne.s32.totalorder %s58_s30, %s6663_s9  ;;  %p6668_p2 = scmp.lt.s32.totalorder %s58_s30, %s58_s30 }
  0x2b   :  { %p6669_p3 = scmp.lt.s32.totalorder %s6663_s9, %s6663_s9 }
  0x2d   :  { %p6670_p4 = por %p6669_p3, %p6668_p2 }
  0x2f   :  { %39 = dma.hbm_to_vmem [thread:$0]  %s8564_s3, 256, %s34_s20, [#allocation3], %s6725_s22, %s6725_s22, %s6726_s2  }
  0x30   :  { %p6671_p5 = pnand %p6670_p4, %p6664_p1 }
  0x32   :  { %6674 = shalt.err (!%p6671_p5)
}
  0x33   :  { %s8565_s29 = sld [smem:[#allocation71_spill]]  ;;  %s6731_s0 = smov [#allocation10]  }
  0x34   :  { %s95_s1 = sshll.u32 %s6731_s0, 4  ;;  %s96_s1 = int_to_ptr.vmem [resolvable:$true] %s95_s1 }
  0x35   :  { %s6683_s23 = scalar_lea.vmem %s96_s1, 512  ;;  %p6688_p7 = scmp.lt.s32.totalorder %s96_s1, %s96_s1 }
  0x36   :  { %p6684_p6 = scmp.ne.s32.totalorder %s96_s1, %s6683_s23  ;;  %p6689_p8 = scmp.lt.s32.totalorder %s6683_s23, %s6683_s23 }
  0x38   :  { %p6690_p9 = por %p6689_p8, %p6688_p7 }
  0x39   :  { %63 = dma.hbm_to_vmem [thread:$0]  %s8565_s29, 256, %s58_s30, [#allocation6], %s6725_s22, %s6725_s22, %s6726_s2  }
  0x3a   :  { %p6691_p10 = pnand %p6690_p9, %p6684_p6 }
  0x3c   :  { %6694 = shalt.err (!%p6691_p10)
}
  0x3d   :  { %101 = dma.hbm_to_vmem [thread:$0]  %s8487_s11, 512, %s96_s1, [#allocation9], %s6727_s26, %s6727_s26, %s6728_s27  }
  0x3e   :  { %6715 = dma.done.wait [#allocation3], 256  }
  0x3f   :  { %6716 = vsyncadd [#allocation3], 4294967040 }
  0x40   :  { %6717 = dma.done.wait [#allocation6], 512  }
  0x41   :  { %6718 = vsyncadd [#allocation6], 4294966784 }
  0x42   :  { %6719 = dma.done.wait [#allocation9], 1024  }
  0x43   :  { %6720 = vsyncadd [#allocation9], 4294966272  ;;  %v179_v0 = vlaneseq  ;;  %v6732_v1 = vmov 1983009808   ;;  %s8567_s3 = sld [smem:[#allocation72_spill]]  ;;  %vm208_vm0 = vcmask 261120  }
  0x44   :  { %v177_v2 = vunpack.c.l.s4 %v6732_v1  ;;  %v131_v9 = vld [vmem:[#allocation2] sm:$0x3]  ;;  %v132_v10 = vld [vmem:[#allocation2 + $0x2] sm:$0x3]  ;;  %v133_v11 = vld [vmem:[#allocation2 + $0x4] sm:$0x3] }
  0x45   :  { %v6876_v4 = vshrl.u32 %v179_v0, 7  ;;  %v134_v12 = vld [vmem:[#allocation2 + $0x6] sm:$0x3]  ;;  %v174_v13 = vcombine.low %v131_v9, %v132_v10  ;;  %v135_v14 = vld [vmem:[#allocation2 + $0x8] sm:$0x3]  ;;  %v291_v24 = vld [vmem:[%s8481_s5 + $0x18] sm:$0xff] }
  0x46   :  { %v178_v3 = vunpack.c.0.s8 %v177_v2  ;;  %v175_v15 = vcombine.low %v133_v11, %v134_v12  ;;  %v136_v16 = vld [vmem:[#allocation2 + $0xa] sm:$0x3]  ;;  %v137_v17 = vld [vmem:[#allocation2 + $0xc] sm:$0x3]  ;;  %v138_v18 = vld [vmem:[#allocation2 + $0xe] sm:$0x3] }
  0x47   :  { %8566 = vst [vmem:[#allocation16_spill] sm:$0xff] %v6876_v4  ;;  %v191_v21 = vcombine.low %v135_v14, %v136_v16  ;;  %v192_v22 = vcombine.low %v137_v17, %v138_v18  ;;  %v139_v25 = vld [vmem:[#allocation5] sm:$0x3]  ;;  %v140_v26 = vld [vmem:[#allocation5 + $0x2] sm:$0x3]  ;;  %v289_v46 = vld [vmem:[%s8481_s5 + $0x8] sm:$0xff] }
  0x48   :  { %v6885_v7 = vsub.s32 %v178_v3, %v6876_v4  ;;  %v141_v29 = vld [vmem:[#allocation5 + $0x4] sm:$0x3]  ;;  %v142_v30 = vld [vmem:[#allocation5 + $0x6] sm:$0x3]  ;;  %v307_v31 = vcombine.low %v139_v25, %v140_v26  ;;  %v143_v32 = vld [vmem:[#allocation5 + $0x8] sm:$0x3] }
  0x49   :  { %v158_v5 = vld [vmem:[%s8567_s3 + $0x18] sm:$0xff]  ;;  %v157_v6 = vld [vmem:[%s8567_s3 + $0x10] sm:$0xff]  ;;  %v156_v8 = vld [vmem:[%s8567_s3 + $0x8] sm:$0xff]  ;;  %v308_v34 = vcombine.low %v141_v29, %v142_v30  ;;  %s6734_s20 = smov 112   ;;  %vm6737_vm1 = vmmov 0   ;;  %vm1542_vm2 = vcmask 64512  }
  0x4a   :  { %6370 = vmatprep.subr.mxu1 %v158_v5  ;;  %v155_v19 = vld [vmem:[%s8567_s3] sm:$0xff]  ;;  %v182_v20 = vrot.slane %v174_v13, %v6885_v7  ;;  %v189_v23 = vrot.slane %v175_v15, %v6885_v7  ;;  %v199_v27 = vrot.slane %v191_v21, %v6885_v7  ;;  %v206_v28 = vrot.slane %v192_v22, %v6885_v7  ;;  %v144_v35 = vld [vmem:[#allocation5 + $0xa] sm:$0x3]  ;;  %v145_v36 = vld [vmem:[#allocation5 + $0xc] sm:$0x3]  ;;  %s6740_s3 = smov 24  }
  0x4b   :  { %6371 = vmatpush3.msra.mxu1 %v158_v5  ;;  %v146_v37 = vld [vmem:[#allocation5 + $0xe] sm:$0x3]  ;;  %v315_v39 = vrot.slane %v307_v31, %v6885_v7  ;;  %v324_v40 = vcombine.low %v143_v32, %v144_v35  ;;  %v290_v42 = vld [vmem:[%s8481_s5 + $0x10] sm:$0xff]  ;;  %v322_v43 = vrot.slane %v308_v34, %v6885_v7  ;;  %v288_v48 = vld [vmem:[%s8481_s5] sm:$0xff]  ;;  %vm4601_vm3 = vcmask 130048  }
  0x4c   :  { %6372 = vmatprep.subr.mxu1 %v157_v6  ;;  %v190_v33 = vcombine.low %v182_v20, %v189_v23  ;;  %v207_v38 = vcombine.low %v199_v27, %v206_v28  ;;  %v325_v41 = vcombine.low %v145_v36, %v146_v37  ;;  %v423_v50 = vld [vmem:[%s8483_s7 + $0x18] sm:$0xff]  ;;  %v147_v51 = vld [vmem:[#allocation7] sm:$0x3]  ;;  %v148_v52 = vld [vmem:[#allocation7 + $0x2] sm:$0x3]  ;;  %vm4610_vm4 = vcmask 195584  }
  0x4d   :  { %6373 = vmatpush3.msra.mxu1 %v157_v6  ;;  %v332_v44 = vrot.slane %v324_v40, %v6885_v7  ;;  %v323_v47 = vcombine.low %v315_v39, %v322_v43  ;;  %6392 = vmatprep.subr.mxu0 %v423_v50  ;;  %v149_v53 = vld [vmem:[#allocation7 + $0x4] sm:$0x3]  ;;  %v422_v54 = vld [vmem:[%s8483_s7 + $0x10] sm:$0xff]  ;;  %v150_v55 = vld [vmem:[#allocation7 + $0x6] sm:$0x3]  ;;  %v439_v56 = vcombine.low %v147_v51, %v148_v52  ;;  %v8497_v40 = vmov 0.0  }
  0x4e   :  { %6374 = vmatprep.subr.mxu1 %v156_v8  ;;  %6378 = vmatprep.mubr.msk.f32.mxu1 %vm208_vm0, %v190_v33  ;;  %v339_v45 = vrot.slane %v325_v41, %v6885_v7  ;;  %v151_v57 = vld [vmem:[#allocation7 + $0x8] sm:$0x3]  ;;  %v440_v58 = vcombine.low %v149_v53, %v150_v55  ;;  %v152_v59 = vld [vmem:[#allocation7 + $0xa] sm:$0x3]  ;;  %v153_v60 = vld [vmem:[#allocation7 + $0xc] sm:$0x3] }
  0x4f   :  { %6375 = vmatpush3.msra.mxu1 %v156_v8  ;;  %6393 = vmatpush3.msra.mxu0 %v423_v50  ;;  %v154_v61 = vld [vmem:[#allocation7 + $0xe] sm:$0x3]  ;;  %v447_v63 = vrot.slane %v439_v56, %v6885_v7  ;;  %v456_v0 = vcombine.low %v151_v57, %v152_v59  ;;  %v420_v3 = vld [vmem:[%s8483_s7] sm:$0xff]  ;;  %vm4959_vm5 = vcmask 1040384   ;;  %vm5636_vm6 = vcmask 523264  }
  0x50   :  { %6376 = vmatprep.subr.mxu1 %v155_v19  ;;  %v340_v49 = vcombine.low %v332_v44, %v339_v45  ;;  %6394 = vmatprep.subr.mxu0 %v422_v54  ;;  %v421_v62 = vld [vmem:[%s8483_s7 + $0x8] sm:$0xff]  ;;  %v457_v1 = vcombine.low %v153_v60, %v154_v61  ;;  %v454_v2 = vrot.slane %v440_v58, %v6885_v7  ;;  %v6132_v10 = vld [vmem:[%s8480_s4] ss:$0 sm:$0xff]  ;;  %s6733_s7 = smov 120   ;;  %s6735_s4 = smov 104   ;;  %vm6104_vm7 = vcmask 254976  }
  0x51   :  { %6377 = vmatpush3.msra.mxu1 %v155_v19  ;;  %6395 = vmatpush3.msra.mxu0 %v422_v54  ;;  %v464_v5 = vrot.slane %v456_v0, %v6885_v7 }
  0x52   :  { %6381 = vmatprep.subr.mxu1 %v291_v24  ;;  %6379 = vmatmul.mubr.msk.f32.vlgmr.msra.gmra.mxu1 %vm208_vm0, %v207_v38  ;;  %v471_v6 = vrot.slane %v457_v1, %v6885_v7  ;;  %v455_v8 = vcombine.low %v447_v63, %v454_v2 }
  0x53   :  { %6382 = vmatpush3.msra.mxu1 %v291_v24  ;;  %6389 = vmatprep.mubr.msk.f32.mxu1 %vm208_vm0, %v323_v47  ;;  %v6135_v24 = vld [vmem:[%s8482_s6] ss:$0 sm:$0xff] }
  0x54   :  { %6383 = vmatprep.subr.mxu1 %v290_v42  ;;  %6396 = vmatprep.subr.mxu0 %v421_v62  ;;  %v472_v9 = vcombine.low %v464_v5, %v471_v6 }
  0x55   :  { %6384 = vmatpush3.msra.mxu1 %v290_v42  ;;  %6397 = vmatpush3.msra.mxu0 %v421_v62  ;;  %v6138_v42 = vld [vmem:[%s8484_s8] ss:$0 sm:$0xff]  ;;  %s6739_s8 = smov 16  }
  0x56   :  { %6385 = vmatprep.subr.mxu1 %v289_v46  ;;  %6398 = vmatprep.subr.mxu0 %v420_v3 }
  0x57   :  { %6386 = vmatpush3.msra.mxu1 %v289_v46  ;;  %6399 = vmatpush3.msra.mxu0 %v420_v3 }
  0x58   :  { %6387 = vmatprep.subr.mxu1 %v288_v48  ;;  %6400 = vmatprep.mubr.msk.f32.mxu0 %vm208_vm0, %v455_v8 }
  0x59   :  { %6388 = vmatpush3.msra.mxu1 %v288_v48  ;;  %6401 = vmatmul.mubr.msk.f32.vlgmr.msra.gmra.mxu0 %vm208_vm0, %v472_v9 }
  0x5a   :  { %6390 = vmatmul.mubr.msk.f32.vlgmr.msra.gmra.mxu1 %vm208_vm0, %v340_v49  ;;  %6403 = vmatprep.subr.mxu1 %v8497_v40 }
  0x5b   :  { %6413 = vmatprep.subr.mxu0 %v8497_v40  ;;  %6405 = vmatprep.mubr.msk.f32.mxu1 %vm6737_vm1, %v8497_v40 }
  0x5c   :  { %6415 = vmatprep.mubr.msk.f32.mxu0 %vm6737_vm1, %v8497_v40 }
 0x112   :  { %v6380_v11 = vpop.f32.mrf.mxu1 }
 0x113   :  { %v285_v12 = vadd.f32 %v6380_v11, %v6132_v10 }
 0x114   :  { %v279_v15 = vpop.f32.mrf.mxu1 }
 0x115   :  { %v6939_v13 = vrot.slane %v285_v12, %v6885_v7  ;;  %v280_v16 = vadd.f32 %v6132_v10, %v279_v15  ;;  %v571_v17 = vcombine.high %v285_v12, %v285_v12 }
 0x117   :  { %8568 = vst [vmem:[#allocation17_spill] sm:$0xff] %v6939_v13  ;;  %692 = vrot.lane.b32.xlu0 %v6939_v13, %s6733_s7  ;;  %v6945_v14 = vcombine.high %v6939_v13, %v6939_v13  ;;  %v6954_v18 = vrot.slane %v280_v16, %v6885_v7  ;;  %v6961_v19 = vrot.slane %v571_v17, %v6885_v7 }
 0x118   :  { %v554_v22 = vcombine.high %v280_v16, %v280_v16 }
 0x119   :  { %8569 = vst [vmem:[#allocation18_spill] sm:$0xff] %v6945_v14  ;;  %694 = vrot.lane.b32.xlu1 %v6945_v14, %s6733_s7  ;;  %8570 = vst [vmem:[#allocation19_spill] sm:$0xff] %v6954_v18  ;;  %v6967_v20 = vcombine.high %v6954_v18, %v6954_v18  ;;  %v6975_v21 = vcombine.high %v6961_v19, %v6961_v19  ;;  %v6402_v41 = vpop.f32.mrf.mxu0 }
 0x11a   :  { %8571 = vst [vmem:[#allocation20_spill] sm:$0xff] %v6961_v19  ;;  %v6988_v23 = vrot.slane %v554_v22, %v6885_v7  ;;  %v6391_v26 = vpop.f32.mrf.mxu1  ;;  %v549_v47 = vadd.f32 %v6402_v41, %v6138_v42 }
 0x11b   :  { %716 = vrot.lane.b32.xlu0 %v6939_v13, %s6734_s20  ;;  %8572 = vst [vmem:[#allocation21_spill] sm:$0xff] %v6967_v20  ;;  %8573 = vst [vmem:[#allocation22_spill] sm:$0xff] %v6975_v21  ;;  %v417_v27 = vadd.f32 %v6391_v26, %v6135_v24  ;;  %v543_v43 = vpop.f32.mrf.mxu0 }
 0x11c   :  { %8574 = vst [vmem:[#allocation23_spill] sm:$0xff] %v6988_v23  ;;  %v7001_v25 = vcombine.high %v6988_v23, %v6988_v23  ;;  %v411_v30 = vpop.f32.mrf.mxu1  ;;  %v544_v44 = vadd.f32 %v6138_v42, %v543_v43  ;;  %v659_v50 = vcombine.high %v549_v47, %v549_v47  ;;  %v7117_v51 = vrot.slane %v549_v47, %v6885_v7 }
 0x11d   :  { %718 = vrot.lane.b32.xlu1 %v6945_v14, %s6734_s20  ;;  %v7008_v28 = vrot.slane %v417_v27, %v6885_v7  ;;  %v412_v31 = vadd.f32 %v6135_v24, %v411_v30  ;;  %v615_v32 = vcombine.high %v417_v27, %v417_v27 }
 0x11e   :  { %8575 = vst [vmem:[#allocation24_spill] sm:$0xff] %v7001_v25  ;;  %v642_v45 = vcombine.high %v544_v44, %v544_v44  ;;  %v7103_v46 = vrot.slane %v544_v44, %v6885_v7  ;;  %v7128_v53 = vrot.slane %v659_v50, %v6885_v7  ;;  %v7134_v54 = vcombine.high %v7117_v51, %v7117_v51 }
 0x11f   :  { %740 = vrot.lane.b32.xlu0 %v6939_v13, %s6735_s4  ;;  %v7018_v29 = vcombine.high %v7008_v28, %v7008_v28  ;;  %v598_v33 = vcombine.high %v412_v31, %v412_v31  ;;  %v7031_v34 = vrot.slane %v412_v31, %v6885_v7  ;;  %v7036_v35 = vrot.slane %v615_v32, %v6885_v7 }
 0x120   :  { %v7106_v48 = vrot.slane %v642_v45, %v6885_v7  ;;  %v7112_v49 = vcombine.high %v7103_v46, %v7103_v46  ;;  %8580 = vst [vmem:[#allocation29_spill] sm:$0xff] %v7128_v53  ;;  %v7142_v55 = vcombine.high %v7128_v53, %v7128_v53  ;;  %v6738_v31 = vmov 1934713408  }
 0x121   :  { %742 = vrot.lane.b32.xlu1 %v6945_v14, %s6735_s4  ;;  %8576 = vst [vmem:[#allocation25_spill] sm:$0xff] %v7018_v29  ;;  %v7039_v36 = vrot.slane %v598_v33, %v6885_v7  ;;  %v7049_v37 = vcombine.high %v7036_v35, %v7036_v35  ;;  %v7057_v38 = vcombine.high %v7031_v34, %v7031_v34  ;;  %v758_v32 = vunpack.c.l.s4 %v6738_v31 }
 0x122   :  { %v7123_v52 = vcombine.high %v7106_v48, %v7106_v48  ;;  %8581 = vst [vmem:[#allocation30_spill] sm:$0xff] %v7142_v55 }
 0x123   :  { %684 = vrot.lane.b32.xlu0 %v6954_v18, %s6733_s7  ;;  %8577 = vst [vmem:[#allocation26_spill] sm:$0xff] %v7049_v37  ;;  %8578 = vst [vmem:[#allocation27_spill] sm:$0xff] %v7057_v38  ;;  %v7077_v39 = vcombine.high %v7039_v36, %v7039_v36  ;;  %v759_v42 = vunpack.c.0.s8 %v758_v32 }
 0x125   :  { %686 = vrot.lane.b32.xlu1 %v6967_v20, %s6733_s7  ;;  %8579 = vst [vmem:[#allocation28_spill] sm:$0xff] %v7077_v39  ;;  %v7219_v47 = vsub.s32 %v759_v42, %v6876_v4 }
 0x127   :  { %696 = vrot.lane.b32.xlu0 %v6961_v19, %s6733_s7 }
 0x129   :  { %698 = vrot.lane.b32.xlu1 %v6975_v21, %s6733_s7 }
 0x12b   :  { %708 = vrot.lane.b32.xlu0 %v6954_v18, %s6734_s20 }
 0x12d   :  { %710 = vrot.lane.b32.xlu1 %v6967_v20, %s6734_s20 }
 0x12f   :  { %720 = vrot.lane.b32.xlu0 %v6961_v19, %s6734_s20 }
 0x131   :  { %722 = vrot.lane.b32.xlu1 %v6975_v21, %s6734_s20 }
 0x133   :  { %732 = vrot.lane.b32.xlu0 %v6954_v18, %s6735_s4 }
 0x135   :  { %734 = vrot.lane.b32.xlu1 %v6967_v20, %s6735_s4 }
 0x137   :  { %688 = vrot.lane.b32.xlu0 %v6988_v23, %s6733_s7 }
 0x139   :  { %690 = vrot.lane.b32.xlu1 %v7001_v25, %s6733_s7 }
 0x13b   :  { %712 = vrot.lane.b32.xlu0 %v6988_v23, %s6734_s20 }
 0x13d   :  { %714 = vrot.lane.b32.xlu1 %v7001_v25, %s6734_s20 }
 0x13f   :  { %736 = vrot.lane.b32.xlu0 %v6988_v23, %s6735_s4 }
 0x141   :  { %738 = vrot.lane.b32.xlu1 %v7001_v25, %s6735_s4 }
 0x143   :  { %964 = vrot.lane.b32.xlu0 %v7008_v28, %s6733_s7 }
 0x145   :  { %966 = vrot.lane.b32.xlu1 %v7018_v29, %s6733_s7 }
 0x147   :  { %988 = vrot.lane.b32.xlu0 %v7008_v28, %s6734_s20 }
 0x149   :  { %990 = vrot.lane.b32.xlu1 %v7018_v29, %s6734_s20 }
 0x14b   :  { %1012 = vrot.lane.b32.xlu0 %v7008_v28, %s6735_s4 }
 0x14d   :  { %1014 = vrot.lane.b32.xlu1 %v7018_v29, %s6735_s4 }
 0x14f   :  { %956 = vrot.lane.b32.xlu0 %v7031_v34, %s6733_s7 }
 0x151   :  { %960 = vrot.lane.b32.xlu1 %v7039_v36, %s6733_s7 }
 0x153   :  { %968 = vrot.lane.b32.xlu0 %v7036_v35, %s6733_s7 }
 0x155   :  { %970 = vrot.lane.b32.xlu1 %v7049_v37, %s6733_s7 }
 0x157   :  { %980 = vrot.lane.b32.xlu0 %v7031_v34, %s6734_s20 }
 0x159   :  { %982 = vrot.lane.b32.xlu1 %v7057_v38, %s6734_s20 }
 0x15b   :  { %992 = vrot.lane.b32.xlu0 %v7036_v35, %s6734_s20 }
 0x15d   :  { %994 = vrot.lane.b32.xlu1 %v7049_v37, %s6734_s20 }
 0x15f   :  { %1004 = vrot.lane.b32.xlu0 %v7031_v34, %s6735_s4 }
 0x161   :  { %1006 = vrot.lane.b32.xlu1 %v7057_v38, %s6735_s4 }
 0x163   :  { %1016 = vrot.lane.b32.xlu0 %v7036_v35, %s6735_s4 }
 0x165   :  { %1018 = vrot.lane.b32.xlu1 %v7049_v37, %s6735_s4 }
 0x167   :  { %958 = vrot.lane.b32.xlu0 %v7057_v38, %s6733_s7 }
 0x169   :  { %962 = vrot.lane.b32.xlu1 %v7077_v39, %s6733_s7 }
 0x16b   :  { %984 = vrot.lane.b32.xlu0 %v7039_v36, %s6734_s20 }
 0x16d   :  { %986 = vrot.lane.b32.xlu1 %v7077_v39, %s6734_s20 }
 0x16f   :  { %1008 = vrot.lane.b32.xlu0 %v7039_v36, %s6735_s4 }
 0x171   :  { %1010 = vrot.lane.b32.xlu1 %v7077_v39, %s6735_s4 }
 0x173   :  { %744 = vrot.lane.b32.xlu0 %v6961_v19, %s6735_s4 }
 0x175   :  { %746 = vrot.lane.b32.xlu1 %v6975_v21, %s6735_s4 }
 0x177   :  { %1230 = vrot.lane.b32.xlu0 %v7112_v49, %s6733_s7 }
 0x179   :  { %1228 = vrot.lane.b32.xlu1 %v7103_v46, %s6733_s7 }
 0x17b   :  { %1236 = vrot.lane.b32.xlu0 %v7117_v51, %s6733_s7 }
 0x17d   :  { %1232 = vrot.lane.b32.xlu1 %v7106_v48, %s6733_s7 }
 0x17f   :  { %1240 = vrot.lane.b32.xlu0 %v7128_v53, %s6733_s7 }
 0x181   :  { %1234 = vrot.lane.b32.xlu1 %v7123_v52, %s6733_s7 }
 0x183   :  { %1252 = vrot.lane.b32.xlu0 %v7103_v46, %s6734_s20 }
 0x185   :  { %1238 = vrot.lane.b32.xlu1 %v7134_v54, %s6733_s7 }
 0x187   :  { %1256 = vrot.lane.b32.xlu0 %v7106_v48, %s6734_s20 }
 0x189   :  { %v7144_v56 = vpop.permute.xlu0 %692  ;;  %1242 = vrot.lane.b32.xlu1 %v7142_v55, %s6733_s7 }
 0x18a   :  { %8582 = vst [vmem:[#allocation31_spill] sm:$0xff] %v7144_v56  ;;  %v820_v32 = vcombine.low %v6939_v13, %v7144_v56 }
 0x18b   :  { %v7148_v57 = vpop.permute.xlu1 %694 }
 0x18c   :  { %8583 = vst [vmem:[#allocation32_spill] sm:$0xff] %v7148_v57  ;;  %v836_v50 = vcombine.low %v6945_v14, %v7148_v57 }
 0x18d   :  { %v7152_v58 = vpop.permute.xlu0 %716  ;;  %1254 = vrot.lane.b32.xlu1 %v7112_v49, %s6734_s20 }
 0x18e   :  { %8584 = vst [vmem:[#allocation33_spill] sm:$0xff] %v7152_v58 }
 0x18f   :  { %v7156_v59 = vpop.permute.xlu1 %718 }
 0x191   :  { %v7160_v60 = vpop.permute.xlu0 %740  ;;  %1258 = vrot.lane.b32.xlu1 %v7123_v52, %s6734_s20 }
 0x193   :  { %v7162_v61 = vpop.permute.xlu1 %742 }
 0x195   :  { %v7166_v62 = vpop.permute.xlu0 %684 }
 0x196   :  { %8585 = vst [vmem:[#allocation34_spill] sm:$0xff] %v7166_v62  ;;  %v756_v13 = vcombine.low %v6954_v18, %v7166_v62 }
 0x197   :  { %v7168_v63 = vpop.permute.xlu1 %686 }
 0x198   :  { %v772_v14 = vcombine.low %v6967_v20, %v7168_v63 }
 0x199   :  { %v7170_v0 = vpop.permute.xlu0 %696 }
 0x19a   :  { %8586 = vst [vmem:[#allocation35_spill] sm:$0xff] %v7170_v0  ;;  %v852_v31 = vcombine.low %v6961_v19, %v7170_v0  ;;  %v827_v19 = vrot.slane %v820_v32, %v7219_v47 }
 0x19b   :  { %v7172_v1 = vpop.permute.xlu1 %698 }
 0x19c   :  { %8587 = vst [vmem:[#allocation36_spill] sm:$0xff] %v7172_v1  ;;  %v868_v44 = vcombine.low %v6975_v21, %v7172_v1  ;;  %v843_v21 = vrot.slane %v836_v50, %v7219_v47  ;;  %v859_v42 = vrot.slane %v852_v31, %v7219_v47  ;;  %v844_v50 = vcombine.low %v7156_v59, %v7162_v61 }
 0x19d   :  { %v7174_v2 = vpop.permute.xlu0 %708  ;;  %v779_v31 = vrot.slane %v772_v14, %v7219_v47 }
 0x19e   :  { %v875_v55 = vrot.slane %v868_v44, %v7219_v47  ;;  %v902_v44 = vcombine.low %v827_v19, %v843_v21 }
 0x19f   :  { %v7176_v3 = vpop.permute.xlu1 %710 }
 0x1a0   :  { %v911_v0 = vcombine.low %v859_v42, %v875_v55  ;;  %v828_v55 = vcombine.low %v7152_v58, %v7160_v60  ;;  %v763_v42 = vrot.slane %v756_v13, %v7219_v47  ;;  %v909_v21 = vrot.slane %v902_v44, %v7219_v47 }
 0x1a1   :  { %v7178_v5 = vpop.permute.xlu0 %720 }
 0x1a2   :  { %v918_v1 = vrot.slane %v911_v0, %v7219_v47  ;;  %v884_v62 = vcombine.low %v763_v42, %v779_v31 }
 0x1a3   :  { %v7180_v6 = vpop.permute.xlu1 %722 }
 0x1a4   :  { %v1505_v58 = vcombine.low %v909_v21, %v918_v1 }
 0x1a5   :  { %v7182_v8 = vpop.permute.xlu0 %732 }
 0x1a7   :  { %v7184_v9 = vpop.permute.xlu1 %734 }
 0x1a9   :  { %v7186_v10 = vpop.permute.xlu0 %688 }
 0x1aa   :  { %v788_v14 = vcombine.low %v6988_v23, %v7186_v10  ;;  %v7276_v23 = vrot.slane %v828_v55, %v7219_v47 }
 0x1ab   :  { %v7188_v11 = vpop.permute.xlu1 %690 }
 0x1ac   :  { %v804_v20 = vcombine.low %v7001_v25, %v7188_v11  ;;  %v7266_v25 = vrot.slane %v844_v50, %v7219_v47  ;;  %v795_v50 = vrot.slane %v788_v14, %v7219_v47 }
 0x1ad   :  { %v7190_v12 = vpop.permute.xlu0 %712 }
 0x1ae   :  { %8588 = vst [vmem:[#allocation37_spill] sm:$0xff] %v7190_v12 }
 0x1af   :  { %v7192_v15 = vpop.permute.xlu1 %714 }
 0x1b1   :  { %v7194_v16 = vpop.permute.xlu0 %736 }
 0x1b3   :  { %v7196_v17 = vpop.permute.xlu1 %738 }
 0x1b5   :  { %v7198_v22 = vpop.permute.xlu0 %964 }
 0x1b6   :  { %8589 = vst [vmem:[#allocation38_spill] sm:$0xff] %v7198_v22  ;;  %v1092_v44 = vcombine.low %v7008_v28, %v7198_v22 }
 0x1b7   :  { %v7200_v24 = vpop.permute.xlu1 %966 }
 0x1b8   :  { %8590 = vst [vmem:[#allocation39_spill] sm:$0xff] %v7200_v24  ;;  %v1108_v0 = vcombine.low %v7018_v29, %v7200_v24  ;;  %v6144_v24 = vcombine.high %v909_v21, %v918_v1  ;;  %v7292_v1 = vrot.slane %v1505_v58, %v6885_v7  ;;  %v1099_v21 = vrot.slane %v1092_v44, %v7219_v47 }
 0x1b9   :  { %v7202_v26 = vpop.permute.xlu0 %988  ;;  %v780_v58 = vcombine.low %v7176_v3, %v7184_v9 }
 0x1ba   :  { %8591 = vst [vmem:[#allocation40_spill] sm:$0xff] %v7202_v26  ;;  %v1115_v31 = vrot.slane %v1108_v0, %v7219_v47 }
 0x1bb   :  { %v7204_v27 = vpop.permute.xlu1 %990 }
 0x1bc   :  { %8592 = vst [vmem:[#allocation41_spill] sm:$0xff] %v7204_v27  ;;  %v1174_v44 = vcombine.low %v1099_v21, %v1115_v31  ;;  %v812_v31 = vcombine.low %v7192_v15, %v7196_v17 }
 0x1bd   :  { %v7206_v30 = vpop.permute.xlu0 %1012 }
 0x1be   :  { %8593 = vst [vmem:[#allocation42_spill] sm:$0xff] %v7206_v30  ;;  %v1100_v21 = vcombine.low %v7202_v26, %v7206_v30 }
 0x1bf   :  { %v7208_v33 = vpop.permute.xlu1 %1014 }
 0x1c0   :  { %8594 = vst [vmem:[#allocation43_spill] sm:$0xff] %v7208_v33 }
 0x1c1   :  { %v7210_v41 = vpop.permute.xlu0 %956 }
 0x1c2   :  { %8595 = vst [vmem:[#allocation44_spill] sm:$0xff] %v7210_v41  ;;  %v1028_v22 = vcombine.low %v7031_v34, %v7210_v41 }
 0x1c3   :  { %v7212_v43 = vpop.permute.xlu1 %960 }
 0x1c4   :  { %8596 = vst [vmem:[#allocation45_spill] sm:$0xff] %v7212_v43  ;;  %v1060_v14 = vcombine.low %v7039_v36, %v7212_v43 }
 0x1c5   :  { %v7216_v45 = vpop.permute.xlu0 %968 }
 0x1c6   :  { %8597 = vst [vmem:[#allocation46_spill] sm:$0xff] %v7216_v45  ;;  %v1124_v13 = vcombine.low %v7036_v35, %v7216_v45  ;;  %v7286_v45 = vrot.slane %v884_v62, %v7219_v47 }
 0x1c7   :  { %v7225_v40 = vpop.permute.xlu1 %970 }
 0x1c8   :  { %8598 = vst [vmem:[#allocation47_spill] sm:$0xff] %v7225_v40  ;;  %v1140_v19 = vcombine.low %v7049_v37, %v7225_v40  ;;  %v811_v40 = vrot.slane %v804_v20, %v7219_v47  ;;  %v1131_v55 = vrot.slane %v1124_v13, %v7219_v47  ;;  %v7300_v20 = vrot.slane %v6144_v24, %v6885_v7 }
 0x1c9   :  { %v7230_v53 = vpop.permute.xlu0 %980 }
 0x1ca   :  { %8599 = vst [vmem:[#allocation48_spill] sm:$0xff] %v7230_v53  ;;  %v1147_v29 = vrot.slane %v1140_v19, %v7219_v47  ;;  %v893_v19 = vcombine.low %v795_v50, %v811_v40  ;;  %v764_v40 = vcombine.low %v7174_v2, %v7182_v8  ;;  %v1116_v50 = vcombine.low %v7204_v27, %v7208_v33 }
 0x1cb   :  { %v7234_v4 = vpop.permute.xlu1 %982  ;;  %v796_v33 = vcombine.low %v7190_v12, %v7194_v16 }
 0x1cc   :  { %8600 = vst [vmem:[#allocation49_spill] sm:$0xff] %v7234_v4  ;;  %v1183_v62 = vcombine.low %v1131_v55, %v1147_v29  ;;  %v1035_v29 = vrot.slane %v1028_v22, %v7219_v47 }
 0x1cd   :  { %v7239_v57 = vpop.permute.xlu0 %992 }
 0x1ce   :  { %8601 = vst [vmem:[#allocation50_spill] sm:$0xff] %v7239_v57  ;;  %v1190_v22 = vrot.slane %v1183_v62, %v7219_v47  ;;  %v1181_v62 = vrot.slane %v1174_v44, %v7219_v47 }
 0x1cf   :  { %v7243_v56 = vpop.permute.xlu1 %994 }
 0x1d0   :  { %8602 = vst [vmem:[#allocation51_spill] sm:$0xff] %v7243_v56 }
 0x1d1   :  { %v7251_v32 = vpop.permute.xlu0 %1004 }
 0x1d2   :  { %8603 = vst [vmem:[#allocation52_spill] sm:$0xff] %v7251_v32  ;;  %v1036_v30 = vcombine.low %v7230_v53, %v7251_v32 }
 0x1d3   :  { %v7263_v18 = vpop.permute.xlu1 %1006 }
 0x1d4   :  { %8604 = vst [vmem:[#allocation53_spill] sm:$0xff] %v7263_v18  ;;  %v1052_v26 = vcombine.low %v7234_v4, %v7263_v18  ;;  %v1526_v18 = vcombine.low %v1181_v62, %v1190_v22 }
 0x1d5   :  { %v7273_v37 = vpop.permute.xlu0 %1016 }
 0x1d6   :  { %8605 = vst [vmem:[#allocation54_spill] sm:$0xff] %v7273_v37  ;;  %v1132_v24 = vcombine.low %v7239_v57, %v7273_v37 }
 0x1d7   :  { %v7281_v42 = vpop.permute.xlu1 %1018 }
 0x1d8   :  { %8606 = vst [vmem:[#allocation55_spill] sm:$0xff] %v7281_v42  ;;  %v1148_v41 = vcombine.low %v7243_v56, %v7281_v42  ;;  %v1067_v42 = vrot.slane %v1060_v14, %v7219_v47 }
 0x1d9   :  { %v7297_v0 = vpop.permute.xlu0 %958 }
 0x1da   :  { %8607 = vst [vmem:[#allocation56_spill] sm:$0xff] %v7297_v0  ;;  %v1044_v13 = vcombine.low %v7057_v38, %v7297_v0  ;;  %v900_v0 = vrot.slane %v893_v19, %v7219_v47  ;;  %v1155_v57 = vrot.slane %v1148_v41, %v7219_v47  ;;  %v787_v19 = vrot.slane %v780_v58, %v7219_v47 }
 0x1db   :  { %v7312_v43 = vpop.permute.xlu1 %962  ;;  %v1123_v41 = vrot.slane %v1116_v50, %v7219_v47  ;;  %v819_v58 = vrot.slane %v812_v31, %v7219_v47 }
 0x1dc   :  { %8608 = vst [vmem:[#allocation57_spill] sm:$0xff] %v7312_v43  ;;  %v1051_v55 = vrot.slane %v1044_v13, %v7219_v47  ;;  %v1076_v56 = vcombine.low %v7077_v39, %v7312_v43  ;;  %v771_v43 = vrot.slane %v764_v40, %v7219_v47  ;;  %v1504_v40 = vcombine.low %v7286_v45, %v900_v0 }
 0x1dd   :  { %v7326_v27 = vpop.permute.xlu0 %984 }
 0x1de   :  { %v1156_v13 = vcombine.low %v1035_v29, %v1051_v55  ;;  %v1083_v37 = vrot.slane %v1076_v56, %v7219_v47  ;;  %v1139_v29 = vrot.slane %v1132_v24, %v7219_v47  ;;  %v1107_v55 = vrot.slane %v1100_v21, %v7219_v47 }
 0x1df   :  { %v7337_v14 = vpop.permute.xlu1 %986  ;;  %v920_v38 = vcombine.low %v771_v43, %v787_v19  ;;  %v6143_v21 = vcombine.high %v7286_v45, %v900_v0  ;;  %v6146_v19 = vcombine.high %v1181_v62, %v1190_v22 }
 0x1e0   :  { %v1165_v56 = vcombine.low %v1067_v42, %v1083_v37  ;;  %v1219_v39 = vcombine.low %v1139_v29, %v1155_v57  ;;  %v1163_v44 = vrot.slane %v1156_v13, %v7219_v47  ;;  %v803_v37 = vrot.slane %v796_v33, %v7219_v47 }
 0x1e1   :  { %v7347_v4 = vpop.permute.xlu0 %1008  ;;  %v1059_v42 = vrot.slane %v1052_v26, %v7219_v47  ;;  %v1210_v53 = vcombine.low %v1107_v55, %v1123_v41  ;;  %v1512_v57 = vrot.slane %v1504_v40, %v6885_v7  ;;  %v1043_v29 = vrot.slane %v1036_v30, %v7219_v47 }
 0x1e2   :  { %v1172_v50 = vrot.slane %v1165_v56, %v7219_v47  ;;  %v1068_v24 = vcombine.low %v7326_v27, %v7347_v4  ;;  %v929_v13 = vcombine.low %v803_v37, %v819_v58  ;;  %v1540_v26 = vrot.slane %v1526_v18, %v6885_v7 }
 0x1e3   :  { %v7355_v31 = vpop.permute.xlu1 %1010  ;;  %v1226_v56 = vrot.slane %v1219_v39, %v7219_v47  ;;  %v1192_v0 = vcombine.low %v1043_v29, %v1059_v42  ;;  %v1217_v55 = vrot.slane %v1210_v53, %v7219_v47  ;;  %v1629_v22 = vrot.slane %v6143_v21, %v6885_v7 }
 0x1e4   :  { %v1525_v32 = vcombine.low %v1163_v44, %v1172_v50  ;;  %v6145_v12 = vcombine.high %v1163_v44, %v1172_v50  ;;  %v1084_v33 = vcombine.low %v7337_v14, %v7355_v31  ;;  %v1075_v41 = vrot.slane %v1068_v24, %v7219_v47 }
 0x1e5   :  { %v7362_v43 = vpop.permute.xlu0 %744  ;;  %v936_v62 = vrot.slane %v929_v13, %v7219_v47  ;;  %v1657_v37 = vrot.slane %v6146_v19, %v6885_v7  ;;  %v1759_v42 = vcombine.low %v1217_v55, %v1226_v56  ;;  %v6154_v29 = vcombine.high %v1217_v55, %v1226_v56 }
 0x1e6   :  { %v1533_v45 = vrot.slane %v1525_v32, %v6885_v7  ;;  %v1091_v40 = vrot.slane %v1084_v33, %v7219_v47  ;;  %v860_v30 = vcombine.low %v7178_v5, %v7362_v43  ;;  %v1650_v44 = vrot.slane %v6145_v12, %v6885_v7 }
 0x1e7   :  { %v7371_v58 = vpop.permute.xlu1 %746  ;;  %v927_v32 = vrot.slane %v920_v38, %v7219_v47  ;;  %v1199_v12 = vrot.slane %v1192_v0, %v7219_v47  ;;  %v1520_v38 = vcombine.low %v1512_v57, %v7292_v1  ;;  %v8609_v21 = vmov 0.0  }
 0x1e8   :  { %v876_v18 = vcombine.low %v7180_v6, %v7371_v58  ;;  %v1541_v39 = vcombine.low %v1533_v45, %v1540_v26  ;;  %v1201_v50 = vcombine.low %v1075_v41, %v1091_v40  ;;  %v867_v24 = vrot.slane %v860_v30, %v7219_v47 }
 0x1e9   :  { %v8610_v13 = vcombine.low %v7276_v23, %v7266_v25  ;;  %v1658_v45 = vcombine.low %v1650_v44, %v1657_v37  ;;  %v1737_v41 = vcombine.low %v927_v32, %v936_v62  ;;  %v1637_v56 = vcombine.low %v1629_v22, %v7300_v20 }
 0x1ea   :  { %v883_v53 = vrot.slane %v876_v18, %v7219_v47  ;;  %6404 = vmatpush3.xpose.msk.msra.mxu1 %vm1542_vm2, %v1541_v39  ;;  %v1208_v33 = vrot.slane %v1201_v50, %v7219_v47  ;;  %v6151_v55 = vcombine.high %v927_v32, %v936_v62  ;;  %v1773_v1 = vrot.slane %v1759_v42, %v6885_v7  ;;  %v1231_v39 = vpop.permute.xlu0 %1230 }
 0x1eb   :  { %6408 = vmatprep.subr.mxu1 %v8609_v21  ;;  %v945_v26 = vrot.slane %v8610_v13, %v7219_v47  ;;  %v1229_v0 = vpop.permute.xlu1 %1228  ;;  %v6229_v23 = vrot.slane %v7103_v46, 9  ;;  %v1889_v25 = vrot.slane %v6154_v29, %v6885_v7  ;;  %v6237_v42 = vrot.slane %v7106_v48, 9 }
 0x1ec   :  { %v947_v19 = vcombine.low %v867_v24, %v883_v53  ;;  %v1758_v40 = vcombine.low %v1199_v12, %v1208_v33  ;;  %v6153_v30 = vcombine.high %v1199_v12, %v1208_v33  ;;  %v6230_v20 = vrot.slane %v1229_v0, 9 }
 0x1ed   :  { %6406 = vmatmul.mubr.msk.f32.vlgmr.msra.gmra.mxu1 %vm1542_vm2, %v1520_v38  ;;  %v1300_v37 = vcombine.low %v7103_v46, %v1229_v0  ;;  %v1745_v53 = vrot.slane %v1737_v41, %v6885_v7  ;;  %v1861_v12 = vrot.slane %v6151_v55, %v6885_v7 }
 0x1ee   :  { %v954_v57 = vrot.slane %v947_v19, %v7219_v47  ;;  %6409 = vmatpush3.xpose.msk.msra.mxu1 %vm1542_vm2, %v1658_v45  ;;  %6410 = vmatprep.mubr.msk.f32.mxu1 %vm6737_vm1, %v8609_v21  ;;  %v1766_v44 = vrot.slane %v1758_v40, %v6885_v7  ;;  %v1882_v18 = vrot.slane %v6153_v30, %v6885_v7  ;;  %v1237_v45 = vpop.permute.xlu0 %1236  ;;  %v6233_v30 = vrot.slane %v7112_v49, 9 }
 0x1ef   :  { %6418 = vmatprep.subr.mxu1 %v8609_v21  ;;  %v1233_v24 = vpop.permute.xlu1 %1232  ;;  %v3145_v38 = vcombine.low %v6229_v23, %v6230_v20  ;;  %v1316_v19 = vcombine.low %v7112_v49, %v1231_v39  ;;  %v1307_v0 = vrot.slane %v1300_v37, %v7219_v47  ;;  %v6245_v23 = vrot.slane %v7117_v51, 9 }
 0x1f0   :  { %v1738_v32 = vcombine.low %v945_v26, %v954_v57  ;;  %v6152_v22 = vcombine.high %v945_v26, %v954_v57  ;;  %v1774_v62 = vcombine.low %v1766_v44, %v1773_v1  ;;  %v1890_v50 = vcombine.low %v1882_v18, %v1889_v25 }
 0x1f1   :  { %6411 = vmatmul.mubr.msk.f32.vlgmr.msra.gmra.mxu1 %vm1542_vm2, %v1637_v56  ;;  %v1332_v13 = vcombine.low %v7106_v48, %v1233_v24  ;;  %v6238_v26 = vrot.slane %v1233_v24, 9  ;;  %v6241_v56 = vrot.slane %v7123_v52, 9  ;;  %v1323_v1 = vrot.slane %v1316_v19, %v7219_v47  ;;  %v8611_v19 = vld [vmem:[#allocation29_spill] sm:$0xff] }
 0x1f2   :  { %v1752_v29 = vrot.slane %v1738_v32, %v6885_v7  ;;  %v1868_v33 = vrot.slane %v6152_v22, %v6885_v7  ;;  %6420 = vmatprep.mubr.msk.f32.mxu1 %vm6737_vm1, %v8609_v21  ;;  %6414 = vmatpush3.xpose.msk.msra.mxu0 %vm1542_vm2, %v1774_v62  ;;  %v6234_v25 = vrot.slane %v1231_v39, 9  ;;  %v3152_v20 = vrot.slane %v3145_v38, %v7219_v47 }
 0x1f3   :  { %6419 = vmatpush3.xpose.msk.msra.mxu1 %vm1542_vm2, %v1890_v50  ;;  %6423 = vmatprep.subr.mxu0 %v8609_v21  ;;  %v3177_v55 = vcombine.low %v6237_v42, %v6238_v26  ;;  %v1235_v57 = vpop.permute.xlu1 %1234  ;;  %v1339_v32 = vrot.slane %v1332_v13, %v7219_v47  ;;  %v1364_v22 = vcombine.low %v7117_v51, %v1237_v45  ;;  %v6246_v62 = vrot.slane %v1237_v45, 9  ;;  %v1241_v50 = vpop.permute.xlu0 %1240 }
 0x1f4   :  { %v1753_v41 = vcombine.low %v1745_v53, %v1752_v29  ;;  %v1869_v40 = vcombine.low %v1861_v12, %v1868_v33  ;;  %6428 = vmatprep.subr.mxu1 %v8609_v21  ;;  %v1348_v44 = vcombine.low %v7123_v52, %v1235_v57  ;;  %v6242_v18 = vrot.slane %v1235_v57, 9 }
 0x1f5   :  { %v3184_v37 = vrot.slane %v3177_v55, %v7219_v47  ;;  %v3161_v39 = vcombine.low %v6233_v30, %v6234_v25  ;;  %v1428_v53 = vcombine.low %v1307_v0, %v1323_v1  ;;  %v3209_v12 = vcombine.low %v6245_v23, %v6246_v62 }
 0x1f6   :  { %6416 = vmatmul.mubr.msk.f32.vlgmr.msra.gmra.mxu0 %vm1542_vm2, %v1753_v41  ;;  %6421 = vmatmul.mubr.msk.f32.vlgmr.msra.gmra.mxu1 %vm1542_vm2, %v1869_v40  ;;  %v1355_v42 = vrot.slane %v1348_v44, %v7219_v47  ;;  %v3193_v24 = vcombine.low %v6241_v56, %v6242_v18  ;;  %v6249_v29 = vrot.slane %v7134_v54, 9  ;;  %v1396_v45 = vcombine.low %v8611_v19, %v1241_v50 }
 0x1f7   :  { %6425 = vmatprep.mubr.msk.f32.mxu0 %vm6737_vm1, %v8609_v21  ;;  %6430 = vmatprep.mubr.msk.f32.mxu1 %vm6737_vm1, %v8609_v21  ;;  %v1239_v33 = vpop.permute.xlu1 %1238  ;;  %v3168_v38 = vrot.slane %v3161_v39, %v7219_v47  ;;  %v1371_v40 = vrot.slane %v1364_v22, %v7219_v47  ;;  %v3216_v0 = vrot.slane %v3209_v12, %v7219_v47  ;;  %v8612_v39 = vld [vmem:[#allocation30_spill] sm:$0xff] }
 0x1f8   :  { %v3200_v13 = vrot.slane %v3193_v24, %v7219_v47  ;;  %v1380_v26 = vcombine.low %v7134_v54, %v1239_v33  ;;  %v1437_v41 = vcombine.low %v1339_v32, %v1355_v42  ;;  %v6250_v30 = vrot.slane %v1239_v33, 9 }
 0x1f9   :  { %v3273_v55 = vcombine.low %v3152_v20, %v3168_v38  ;;  %v1435_v25 = vrot.slane %v1428_v53, %v7219_v47  ;;  %v1403_v44 = vrot.slane %v1396_v45, %v7219_v47 }
 0x1fa   :  { %v3282_v57 = vcombine.low %v3184_v37, %v3200_v13  ;;  %v1387_v56 = vrot.slane %v1380_v26, %v7219_v47  ;;  %v3225_v1 = vcombine.low %v6249_v29, %v6250_v30  ;;  %v1444_v18 = vrot.slane %v1437_v41, %v7219_v47 }
 0x1fb   :  { %v1243_v23 = vpop.permute.xlu1 %1242  ;;  %v6257_v30 = vrot.slane %v8612_v39, 9 }
 0x1fc   :  { %v1446_v62 = vcombine.low %v1371_v40, %v1387_v56  ;;  %v3232_v32 = vrot.slane %v3225_v1, %v7219_v47  ;;  %v1412_v22 = vcombine.low %v8612_v39, %v1243_v23  ;;  %v2017_v37 = vcombine.low %v1435_v25, %v1444_v18 }
 0x1fd   :  { %v6158_v24 = vcombine.high %v1435_v25, %v1444_v18  ;;  %v6253_v40 = vrot.slane %v8611_v19, 9  ;;  %v6254_v56 = vrot.slane %v1241_v50, 9  ;;  %v3289_v50 = vrot.slane %v3282_v57, %v7219_v47 }
 0x1fe   :  { %v3291_v42 = vcombine.low %v3216_v0, %v3232_v32  ;;  %v1419_v20 = vrot.slane %v1412_v22, %v7219_v47  ;;  %v1453_v12 = vrot.slane %v1446_v62, %v7219_v47  ;;  %v2025_v13 = vrot.slane %v2017_v37, %v6885_v7 }
 0x1ff   :  { %v2120_v26 = vrot.slane %v6158_v24, %v6885_v7  ;;  %v6258_v0 = vrot.slane %v1243_v23, 9 }
 0x200   :  { %v1455_v29 = vcombine.low %v1403_v44, %v1419_v20  ;;  %v3241_v44 = vcombine.low %v6253_v40, %v6254_v56  ;;  %v3280_v20 = vrot.slane %v3273_v55, %v7219_v47  ;;  %v3298_v23 = vrot.slane %v3291_v42, %v7219_v47 }
 0x201   :  { %v3257_v18 = vcombine.low %v6257_v30, %v6258_v0 }
 0x202   :  { %v1462_v33 = vrot.slane %v1455_v29, %v7219_v47  ;;  %v3248_v62 = vrot.slane %v3241_v44, %v7219_v47  ;;  %v3861_v24 = vcombine.low %v3280_v20, %v3289_v50  ;;  %v6278_v29 = vcombine.high %v3280_v20, %v3289_v50 }
 0x203   :  { %v3264_v32 = vrot.slane %v3257_v18, %v7219_v47 }
 0x204   :  { %v2018_v53 = vcombine.low %v1453_v12, %v1462_v33  ;;  %v6159_v38 = vcombine.high %v1453_v12, %v1462_v33 }
 0x205   :  { %v3300_v22 = vcombine.low %v3248_v62, %v3264_v32 }
 0x206   :  { %v2032_v45 = vrot.slane %v2018_v53, %v6885_v7  ;;  %v2127_v41 = vrot.slane %v6159_v38, %v6885_v7  ;;  %v7467_v53 = vrot.slane %v3861_v24, %v6885_v7 }
 0x207   :  { %v3307_v37 = vrot.slane %v3300_v22, %v7219_v47 }
 0x208   :  { %v2033_v1 = vcombine.low %v2025_v13, %v2032_v45  ;;  %v2128_v25 = vcombine.low %v2120_v26, %v2127_v41  ;;  %8613 = vst [vmem:[#allocation29_spill] sm:$0xff] %v7467_v53  ;;  %v7473_v13 = vrot.slane %v6278_v29, %v6885_v7 }
 0x209   :  { %v3862_v12 = vcombine.low %v3298_v23, %v3307_v37  ;;  %v6279_v33 = vcombine.high %v3298_v23, %v3307_v37 }
 0x20a   :  { %6424 = vmatpush3.msra.mxu0 %v2033_v1  ;;  %6429 = vmatpush3.msra.mxu1 %v2128_v25  ;;  %8615 = vst [vmem:[#allocation58_spill] sm:$0xff] %v7473_v13 }
 0x20b   :  { %6433 = vmatprep.subr.mxu0 %v8609_v21  ;;  %6438 = vmatprep.subr.mxu1 %v8609_v21  ;;  %v7470_v38 = vrot.slane %v3862_v12, %v6885_v7  ;;  %v7476_v55 = vrot.slane %v6279_v33, %v6885_v7 }
 0x20d   :  { %8614 = vst [vmem:[#allocation30_spill] sm:$0xff] %v7470_v38  ;;  %8616 = vst [vmem:[#allocation59_spill] sm:$0xff] %v7476_v55 }
 0x2ad   :  { %v1613_v26 = vpop.f32.mrf.mxu1 }
 0x2ae   :  { %v1965_v45 = vmul.f32 0.35355338, %v1613_v26 }
 0x2af   :  { %v6407_v41 = vpop.f32.mrf.mxu1 }
 0x2b0   :  { %v1969_v40 = vsel %vm1542_vm2, %v1965_v45, -inf }
 0x2b1   :  { %1970 = vmax.xlane.f32.xlu0 %v1969_v40  ;;  %v1729_v30 = vpop.f32.mrf.mxu1 }
 0x2b2   :  { %v1966_v56 = vmul.f32 0.35355338, %v1729_v30 }
 0x2b3   :  { %v6412_v0 = vpop.f32.mrf.mxu1 }
 0x2b4   :  { %v1972_v1 = vsel %vm1542_vm2, %v1966_v56, -inf }
 0x2b5   :  { %1973 = vmax.xlane.f32.xlu1 %v1972_v1 }
 0x2b6   :  { %v1845_v25 = vpop.f32.mrf.mxu0  ;;  %v1961_v44 = vpop.f32.mrf.mxu1 }
 0x2b7   :  { %v1967_v18 = vmul.f32 0.35355338, %v1845_v25  ;;  %v1968_v22 = vmul.f32 0.35355338, %v1961_v44 }
 0x2b8   :  { %v6417_v62 = vpop.f32.mrf.mxu0  ;;  %v6422_v32 = vpop.f32.mrf.mxu1 }
 0x2b9   :  { %v1975_v20 = vsel %vm1542_vm2, %v1967_v18, -inf  ;;  %v1978_v50 = vsel %vm1542_vm2, %v1968_v22, -inf }
 0x2ba   :  { %1976 = vmax.xlane.f32.xlu0 %v1975_v20 }
 0x2be   :  { %1979 = vmax.xlane.f32.xlu0 %v1978_v50 }
 0x2c6   :  { %1262 = vrot.lane.b32.xlu1 %v7134_v54, %s6734_s20 }
 0x2ca   :  { %1266 = vrot.lane.b32.xlu1 %v8612_v39, %s6734_s20 }
 0x2ce   :  { %1278 = vrot.lane.b32.xlu1 %v7112_v49, %s6735_s4  ;;  %v7506_v49 = vpop.permute.xlu0 %1252 }
 0x2d2   :  { %1282 = vrot.lane.b32.xlu1 %v7123_v52, %s6735_s4  ;;  %v7508_v52 = vpop.permute.xlu1 %1254  ;;  %v7510_v23 = vpop.permute.xlu0 %1256 }
 0x2d3   :  { %v6235_v50 = vrot.slane %v7508_v52, 9 }
 0x2d4   :  { %1260 = vrot.lane.b32.xlu0 %v7117_v51, %s6734_s20 }
 0x2d6   :  { %1286 = vrot.lane.b32.xlu1 %v7134_v54, %s6735_s4  ;;  %v7512_v37 = vpop.permute.xlu1 %1258 }
 0x2d8   :  { %1264 = vrot.lane.b32.xlu0 %v8611_v19, %s6734_s20 }
 0x2dc   :  { %1276 = vrot.lane.b32.xlu0 %v7103_v46, %s6735_s4 }
 0x2e0   :  { %1280 = vrot.lane.b32.xlu0 %v7106_v48, %s6735_s4 }
 0x2e4   :  { %1284 = vrot.lane.b32.xlu0 %v7117_v51, %s6735_s4 }
 0x33a   :  { %v1971_v54 = vpop.xlane.xlu0 %1970 }
 0x33b   :  { %v1981_v24 = vsub.f32 %v1965_v45, %v1971_v54 }
 0x33d   :  { %v1985_v12 = vmul.f32 1.442695, %v1981_v24  ;;  %v6231_v24 = vrot.slane %v7506_v49, 9 }
 0x33e   :  { %v1974_v29 = vpop.xlane.xlu1 %1973 }
 0x33f   :  { %6547 = vpow2.f32 %v1985_v12  ;;  %v1982_v46 = vsub.f32 %v1966_v56, %v1974_v29 }
 0x341   :  { %v1987_v33 = vmul.f32 1.442695, %v1982_v46 }
 0x342   :  { %v7514_v26 = vpop.permute.xlu1 %1262 }
 0x343   :  { %6549 = vpow2.f32 %v1987_v33  ;;  %v1977_v48 = vpop.xlane.xlu0 %1976  ;;  %v6251_v55 = vrot.slane %v7514_v26, 9 }
 0x344   :  { %v1983_v51 = vsub.f32 %v1967_v18, %v1977_v48  ;;  %v6243_v48 = vrot.slane %v7512_v37, 9 }
 0x346   :  { %v1989_v41 = vmul.f32 1.442695, %v1983_v51  ;;  %v7516_v40 = vpop.permute.xlu1 %1266 }
 0x347   :  { %8617 = vst [vmem:[#allocation60_spill] sm:$0xff] %v7516_v40  ;;  %v1980_v30 = vpop.xlane.xlu0 %1979  ;;  %v8638_v40 = vld [vmem:[#allocation19_spill] sm:$0xff] }
 0x348   :  { %6551 = vpow2.f32 %v1989_v41  ;;  %v1984_v0 = vsub.f32 %v1968_v22, %v1980_v30 }
 0x34a   :  { %v1991_v1 = vmul.f32 1.442695, %v1984_v0  ;;  %v7518_v25 = vpop.permute.xlu1 %1278  ;;  %v6239_v0 = vrot.slane %v7510_v23, 9 }
 0x34b   :  { %v7520_v45 = vpop.permute.xlu0 %1260  ;;  %v6236_v32 = vrot.slane %v7518_v25, 9 }
 0x34c   :  { %v7522_v44 = vpop.eup %6547  ;;  %6553 = vpow2.f32 %v1991_v1 }
 0x34d   :  { %8618 = vst [vmem:[#allocation61_spill] sm:$0xff] %v7522_v44  ;;  %v1993_v56 = vsel %vm1542_vm2, %v7522_v44, 0.0  ;;  %v3169_v12 = vcombine.low %v6235_v50, %v6236_v32 }
 0x34e   :  { %1994 = vadd.xlane.f32.xlu1 %v1993_v56  ;;  %v7531_v20 = vpop.permute.xlu1 %1282 }
 0x34f   :  { %v7526_v62 = vpop.permute.xlu0 %1264  ;;  %v6244_v29 = vrot.slane %v7531_v20, 9  ;;  %v3176_v56 = vrot.slane %v3169_v12, %v7219_v47 }
 0x350   :  { %8619 = vst [vmem:[#allocation62_spill] sm:$0xff] %v7526_v62  ;;  %v7528_v18 = vpop.eup %6549 }
 0x351   :  { %8620 = vst [vmem:[#allocation63_spill] sm:$0xff] %v7528_v18  ;;  %v1996_v22 = vsel %vm1542_vm2, %v7528_v18, 0.0  ;;  %v3201_v32 = vcombine.low %v6243_v48, %v6244_v29  ;;  %v6247_v48 = vrot.slane %v7520_v45, 9  ;;  %v8635_v18 = vld [vmem:[#allocation21_spill] sm:$0xff] }
 0x352   :  { %1997 = vadd.xlane.f32.xlu0 %v1996_v22  ;;  %v7544_v51 = vpop.permute.xlu1 %1286 }
 0x353   :  { %v7536_v54 = vpop.permute.xlu0 %1276  ;;  %v6252_v57 = vrot.slane %v7544_v51, 9  ;;  %v3208_v12 = vrot.slane %v3201_v32, %v7219_v47 }
 0x354   :  { %v6232_v46 = vrot.slane %v7536_v54, 9 }
 0x355   :  { %v7541_v33 = vpop.eup %6551 }
 0x356   :  { %8621 = vst [vmem:[#allocation64_spill] sm:$0xff] %v7541_v33  ;;  %v3153_v41 = vcombine.low %v6231_v24, %v6232_v46  ;;  %v1999_v30 = vsel %vm1542_vm2, %v7541_v33, 0.0 }
 0x357   :  { %2000 = vadd.xlane.f32.xlu1 %v1999_v30  ;;  %v7549_v1 = vpop.permute.xlu0 %1280 }
 0x358   :  { %v3160_v22 = vrot.slane %v3153_v41, %v7219_v47  ;;  %v6240_v50 = vrot.slane %v7549_v1, 9  ;;  %v3233_v41 = vcombine.low %v6251_v55, %v6252_v57  ;;  %v8627_v57 = vld [vmem:[#allocation32_spill] sm:$0xff] }
 0x359   :  { %v7554_v42 = vpop.eup %6553 }
 0x35a   :  { %8622 = vst [vmem:[#allocation65_spill] sm:$0xff] %v7554_v42  ;;  %v3309_v24 = vcombine.low %v3160_v22, %v3176_v56  ;;  %v3185_v46 = vcombine.low %v6239_v0, %v6240_v50  ;;  %v2002_v30 = vsel %vm1542_vm2, %v7554_v42, 0.0  ;;  %v3240_v50 = vrot.slane %v3233_v41, %v7219_v47 }
 0x35b   :  { %v7558_v13 = vpop.permute.xlu0 %1284  ;;  %2003 = vadd.xlane.f32.xlu0 %v2002_v30  ;;  %v6170_v42 = vrot.slane %v7168_v63, 9 }
 0x35c   :  { %v3192_v29 = vrot.slane %v3185_v46, %v7219_v47  ;;  %v6248_v38 = vrot.slane %v7558_v13, 9  ;;  %v7567_v0 = vrot.slane %v3309_v24, %v7219_v47  ;;  %v6186_v24 = vrot.slane %v8627_v57, 9  ;;  %v8631_v46 = vld [vmem:[#allocation31_spill] sm:$0xff] }
 0x35d   :  { %v6182_v55 = vrot.slane %v8631_v46, 9  ;;  %v6184_v57 = vrot.slane %v7160_v60, 9  ;;  %v8636_v46 = vld [vmem:[#allocation33_spill] sm:$0xff] }
 0x35e   :  { %v3318_v53 = vcombine.low %v3192_v29, %v3208_v12  ;;  %v3217_v56 = vcombine.low %v6247_v48, %v6248_v38  ;;  %8623 = vst [vmem:[#allocation66_spill] sm:$0xff] %v7567_v0  ;;  %v8628_v12 = vld [vmem:[#allocation35_spill] sm:$0xff]  ;;  %v8629_v48 = vld [vmem:[#allocation22_spill] sm:$0xff]  ;;  %v6183_v62 = vrot.slane %v8636_v46, 9 }
 0x35f   :  { %v6190_v29 = vrot.slane %v8628_v12, 9  ;;  %v6193_v41 = vrot.slane %v8629_v48, 9  ;;  %v6178_v12 = vrot.slane %v7188_v11, 9 }
 0x360   :  { %v7570_v22 = vrot.slane %v3318_v53, %v7219_v47  ;;  %v3224_v32 = vrot.slane %v3217_v56, %v7219_v47  ;;  %v8626_v53 = vld [vmem:[#allocation36_spill] sm:$0xff]  ;;  %v8630_v56 = vld [vmem:[#allocation18_spill] sm:$0xff]  ;;  %v2625_v11 = vcombine.low %v6183_v62, %v6184_v57 }
 0x361   :  { %v6194_v38 = vrot.slane %v8626_v53, 9  ;;  %v6187_v53 = vrot.slane %v7156_v59, 9  ;;  %v6165_v59 = vrot.slane %v8638_v40, 9 }
 0x362   :  { %8624 = vst [vmem:[#allocation67_spill] sm:$0xff] %v7570_v22  ;;  %v7576_v30 = vcombine.low %v3224_v32, %v3240_v50  ;;  %v6185_v50 = vrot.slane %v8630_v56, 9  ;;  %v6188_v32 = vrot.slane %v7162_v61, 9  ;;  %v6169_v61 = vrot.slane %v8635_v18, 9 }
 0x363   :  { %v2665_v22 = vcombine.low %v6193_v41, %v6194_v38  ;;  %v8637_v38 = vld [vmem:[#allocation24_spill] sm:$0xff]  ;;  %v2632_v57 = vrot.slane %v2625_v11, %v7219_v47  ;;  %v8641_v11 = vld [vmem:[#allocation26_spill] sm:$0xff] }
 0x364   :  { %8625 = vst [vmem:[#allocation68_spill] sm:$0xff] %v7576_v30  ;;  %v2633_v48 = vcombine.low %v6185_v50, %v6186_v24  ;;  %v8634_v30 = vld [vmem:[#allocation34_spill] sm:$0xff]  ;;  %v2641_v63 = vcombine.low %v6187_v53, %v6188_v32  ;;  %v6177_v41 = vrot.slane %v8637_v38, 9  ;;  %v2569_v44 = vcombine.low %v6169_v61, %v6170_v42  ;;  %v8639_v24 = vld [vmem:[#allocation23_spill] sm:$0xff] }
 0x365   :  { %v6166_v56 = vrot.slane %v8634_v30, 9  ;;  %v2672_v60 = vrot.slane %v2665_v22, %v7219_v47  ;;  %v6173_v50 = vrot.slane %v8639_v24, 9  ;;  %v6213_v53 = vrot.slane %v7008_v28, 9 }
 0x366   :  { %v2601_v30 = vcombine.low %v6177_v41, %v6178_v12  ;;  %v2640_v18 = vrot.slane %v2633_v48, %v7219_v47  ;;  %v2648_v32 = vrot.slane %v2641_v63, %v7219_v47  ;;  %v2576_v40 = vrot.slane %v2569_v44, %v7219_v47 }
 0x367   :  { %v6172_v12 = vrot.slane %v7184_v9, 9  ;;  %v6221_v48 = vrot.slane %v7036_v35, 9  ;;  %v6180_v61 = vrot.slane %v7196_v17, 9  ;;  %v6171_v44 = vrot.slane %v7176_v3, 9 }
 0x368   :  { %1290 = vrot.lane.b32.xlu1 %v8612_v39, %s6735_s4  ;;  %v8632_v39 = vld [vmem:[#allocation20_spill] sm:$0xff]  ;;  %v2735_v63 = vcombine.low %v2632_v57, %v2648_v32  ;;  %v6179_v35 = vrot.slane %v7192_v15, 9  ;;  %v6225_v24 = vrot.slane %v8641_v11, 9  ;;  %v8644_v32 = vld [vmem:[#allocation39_spill] sm:$0xff] }
 0x369   :  { %v6189_v33 = vrot.slane %v8632_v39, 9  ;;  %v6174_v39 = vrot.slane %v7186_v10, 9  ;;  %v2577_v17 = vcombine.low %v6171_v44, %v6172_v12  ;;  %v8657_v44 = vld [vmem:[#allocation51_spill] sm:$0xff] }
 0x36a   :  { %v6227_v46 = vrot.slane %v8657_v44, 9 }
 0x36b   :  { %v2649_v21 = vcombine.low %v6189_v33, %v6190_v29  ;;  %v2553_v33 = vcombine.low %v6165_v59, %v6166_v56  ;;  %v2585_v10 = vcombine.low %v6173_v50, %v6174_v39  ;;  %v6168_v39 = vrot.slane %v7182_v8, 9  ;;  %v8642_v8 = vld [vmem:[#allocation37_spill] sm:$0xff] }
 0x36c   :  { %v6167_v59 = vrot.slane %v7174_v2, 9  ;;  %v6175_v50 = vrot.slane %v8642_v8, 9 }
 0x36d   :  { %v2656_v29 = vrot.slane %v2649_v21, %v7219_v47  ;;  %v2608_v21 = vrot.slane %v2601_v30, %v7219_v47  ;;  %v2560_v28 = vrot.slane %v2553_v33, %v7219_v47  ;;  %v2592_v38 = vrot.slane %v2585_v10, %v7219_v47  ;;  %v8645_v10 = vld [vmem:[#allocation28_spill] sm:$0xff] }
 0x36e   :  { %v2609_v30 = vcombine.low %v6179_v35, %v6180_v61  ;;  %v2561_v15 = vcombine.low %v6167_v59, %v6168_v39  ;;  %v6209_v2 = vrot.slane %v8645_v10, 9 }
 0x36f   :  { %v2708_v62 = vcombine.low %v2656_v29, %v2672_v60  ;;  %v2681_v41 = vcombine.low %v2560_v28, %v2576_v40  ;;  %v2690_v60 = vcombine.low %v2592_v38, %v2608_v21  ;;  %v7636_v29 = vrot.slane %v2735_v63, %v7219_v47  ;;  %v8647_v28 = vld [vmem:[#allocation43_spill] sm:$0xff]  ;;  %v8648_v38 = vld [vmem:[#allocation46_spill] sm:$0xff] }
 0x370   :  { %v2584_v21 = vrot.slane %v2577_v17, %v7219_v47  ;;  %v6220_v61 = vrot.slane %v8647_v28, 9  ;;  %v2616_v39 = vrot.slane %v2609_v30, %v7219_v47  ;;  %v2568_v35 = vrot.slane %v2561_v15, %v7219_v47  ;;  %v8650_v17 = vld [vmem:[#allocation41_spill] sm:$0xff] }
 0x371   :  { %1288 = vrot.lane.b32.xlu0 %v8611_v19, %s6735_s4  ;;  %v8633_v19 = vld [vmem:[#allocation17_spill] sm:$0xff]  ;;  %v7624_v9 = vrot.slane %v2708_v62, %v7219_v47  ;;  %v8646_v62 = vld [vmem:[#allocation47_spill] sm:$0xff]  ;;  %v6219_v8 = vrot.slane %v8650_v17, 9 }
 0x372   :  { %v6181_v0 = vrot.slane %v8633_v19, 9  ;;  %v6226_v57 = vrot.slane %v8646_v62, 9  ;;  %v2717_v62 = vcombine.low %v2568_v35, %v2584_v21  ;;  %v8654_v17 = vld [vmem:[#allocation55_spill] sm:$0xff] }
 0x373   :  { %v2937_v28 = vcombine.low %v6219_v8, %v6220_v61 }
 0x374   :  { %v2617_v19 = vcombine.low %v6181_v0, %v6182_v55  ;;  %v8640_v0 = vld [vmem:[#allocation25_spill] sm:$0xff] }
 0x375   :  { %v6217_v55 = vrot.slane %v8640_v0, 9  ;;  %v7641_v0 = vrot.slane %v2681_v41, %v7219_v47  ;;  %v6222_v41 = vrot.slane %v8648_v38, 9  ;;  %v2944_v61 = vrot.slane %v2937_v28, %v7219_v47 }
 0x376   :  { %v2624_v42 = vrot.slane %v2617_v19, %v7219_v47  ;;  %v6176_v19 = vrot.slane %v7194_v16, 9  ;;  %v6218_v16 = vrot.slane %v8644_v32, 9  ;;  %v2961_v32 = vcombine.low %v6225_v24, %v6226_v57  ;;  %v8655_v57 = vld [vmem:[#allocation56_spill] sm:$0xff] }
 0x378   :  { %v2699_v56 = vcombine.low %v2624_v42, %v2640_v18  ;;  %v8643_v18 = vld [vmem:[#allocation27_spill] sm:$0xff]  ;;  %v2593_v40 = vcombine.low %v6175_v50, %v6176_v19  ;;  %v8649_v19 = vld [vmem:[#allocation38_spill] sm:$0xff]  ;;  %v2929_v11 = vcombine.low %v6217_v55, %v6218_v16  ;;  %v8653_v55 = vld [vmem:[#allocation40_spill] sm:$0xff]  ;;  %v2968_v12 = vrot.slane %v2961_v32, %v7219_v47 }
 0x379   :  { %v6201_v33 = vrot.slane %v8643_v18, 9  ;;  %v6214_v59 = vrot.slane %v8649_v19, 9  ;;  %v8651_v50 = vld [vmem:[#allocation42_spill] sm:$0xff]  ;;  %v6215_v16 = vrot.slane %v8653_v55, 9  ;;  %v2945_v19 = vcombine.low %v6221_v48, %v6222_v41  ;;  %v8660_v41 = vld [vmem:[#allocation45_spill] sm:$0xff] }
 0x37a   :  { %v7631_v3 = vrot.slane %v2699_v56, %v7219_v47  ;;  %v7649_v56 = vrot.slane %v2690_v60, %v7219_v47  ;;  %v2600_v60 = vrot.slane %v2593_v40, %v7219_v47  ;;  %v6216_v18 = vrot.slane %v8651_v50, 9  ;;  %v8656_v50 = vld [vmem:[#allocation57_spill] sm:$0xff] }
 0x37b   :  { %v6228_v40 = vrot.slane %v8654_v17, 9  ;;  %v2913_v63 = vcombine.low %v6213_v53, %v6214_v59  ;;  %v2936_v24 = vrot.slane %v2929_v11, %v7219_v47  ;;  %v6210_v21 = vrot.slane %v8656_v50, 9  ;;  %v8661_v53 = vld [vmem:[#allocation53_spill] sm:$0xff]  ;;  %v8663_v17 = vld [vmem:[#allocation50_spill] sm:$0xff] }
 0x37c   :  { %v3350_v42 = vcombine.low %v7631_v3, %v7624_v9  ;;  %v3349_v30 = vcombine.low %v7641_v0, %v7649_v56  ;;  %v6263_v15 = vcombine.high %v7641_v0, %v7649_v56  ;;  %v2726_v38 = vcombine.low %v2600_v60, %v2616_v39  ;;  %v8658_v0 = vld [vmem:[#allocation54_spill] sm:$0xff]  ;;  %v8659_v39 = vld [vmem:[#allocation44_spill] sm:$0xff]  ;;  %v8662_v60 = vld [vmem:[#allocation49_spill] sm:$0xff] }
 0x37d   :  { %v2921_v35 = vcombine.low %v6215_v16, %v6216_v18  ;;  %v6224_v56 = vrot.slane %v8658_v0, 9  ;;  %v6198_v48 = vrot.slane %v8659_v39, 9  ;;  %v6206_v8 = vrot.slane %v8660_v41, 9 }
 0x37e   :  { %v7663_v10 = vrot.slane %v3350_v42, %v6885_v7  ;;  %v6202_v42 = vrot.slane %v8655_v57, 9  ;;  %v6204_v59 = vrot.slane %v8661_v53, 9  ;;  %v2952_v11 = vrot.slane %v2945_v19, %v7219_v47  ;;  %v8664_v57 = vld [vmem:[#allocation52_spill] sm:$0xff] }
 0x37f   :  { %v6203_v55 = vrot.slane %v8662_v60, 9  ;;  %v6223_v18 = vrot.slane %v8663_v17, 9  ;;  %v2969_v16 = vcombine.low %v6227_v46, %v6228_v40  ;;  %v6200_v44 = vrot.slane %v8664_v57, 9  ;;  %v8667_v17 = vld [vmem:[#allocation48_spill] sm:$0xff] }
 0x380   :  { %8652 = vst [vmem:[#allocation36_spill] sm:$0xff] %v7663_v10  ;;  %v2865_v50 = vcombine.low %v6201_v33, %v6202_v42  ;;  %v2897_v0 = vcombine.low %v6209_v2, %v6210_v21  ;;  %v2920_v28 = vrot.slane %v2913_v63, %v7219_v47  ;;  %v2928_v39 = vrot.slane %v2921_v35, %v7219_v47 }
 0x381   :  { %v3004_v41 = vcombine.low %v2952_v11, %v2968_v12  ;;  %v2953_v22 = vcombine.low %v6223_v18, %v6224_v56  ;;  %v8665_v53 = vrot.slane %v7031_v34, 9  ;;  %v8666_v60 = vrot.slane %v7039_v36, 9 }
 0x382   :  { %v6199_v46 = vrot.slane %v8667_v17, 9  ;;  %v2873_v40 = vcombine.low %v6203_v55, %v6204_v59  ;;  %v7693_v57 = vrot.slane %v2717_v62, %v7219_v47  ;;  %v2995_v33 = vcombine.low %v2920_v28, %v2936_v24 }
 0x383   :  { %v2849_v19 = vcombine.low %v8665_v53, %v6198_v48  ;;  %v2881_v10 = vcombine.low %v8666_v60, %v6206_v8  ;;  %v3031_v2 = vcombine.low %v2928_v39, %v2944_v61  ;;  %v2976_v63 = vrot.slane %v2969_v16, %v7219_v47 }
 0x384   :  { %v2857_v21 = vcombine.low %v6199_v46, %v6200_v44  ;;  %v2872_v12 = vrot.slane %v2865_v50, %v7219_v47  ;;  %v2904_v34 = vrot.slane %v2897_v0, %v7219_v47  ;;  %v7699_v36 = vrot.slane %v3004_v41, %v7219_v47  ;;  %v8668_v46 = vld [vmem:[#allocation61_spill] sm:$0xff] }
 0x385   :  { %v2960_v35 = vrot.slane %v2953_v22, %v7219_v47  ;;  %v7703_v56 = vrot.slane %v3349_v30, %v6885_v7  ;;  %v7706_v62 = vrot.slane %v6263_v15, %v6885_v7  ;;  %v7709_v24 = vrot.slane %v2726_v38, %v7219_v47 }
 0x386   :  { %v2856_v61 = vrot.slane %v2849_v19, %v7219_v47  ;;  %v2888_v48 = vrot.slane %v2881_v10, %v7219_v47  ;;  %v2880_v8 = vrot.slane %v2873_v40, %v7219_v47  ;;  %v7715_v59 = vrot.slane %v2995_v33, %v7219_v47 }
 0x387   :  { %v7718_v22 = vrot.slane %v3031_v2, %v7219_v47  ;;  %v3040_v30 = vcombine.low %v2960_v35, %v2976_v63  ;;  %v1340_v15 = vcombine.low %v7510_v23, %v7549_v1  ;;  %v2864_v11 = vrot.slane %v2857_v21, %v7219_v47  ;;  %v8670_v63 = vld [vmem:[#allocation60_spill] sm:$0xff] }
 0x388   :  { %v2977_v38 = vcombine.low %v2856_v61, %v2872_v12  ;;  %v2986_v55 = vcombine.low %v2888_v48, %v2904_v34  ;;  %v6212_v18 = vrot.slane %v7355_v31, 9  ;;  %v3371_v10 = vcombine.low %v7715_v59, %v7699_v36 }
 0x389   :  { %v1356_v44 = vcombine.low %v7512_v37, %v7531_v20  ;;  %v1308_v50 = vcombine.low %v7506_v49, %v7536_v54  ;;  %v7732_v23 = vcombine.low %v2864_v11, %v2880_v8  ;;  %v6207_v1 = vrot.slane %v7326_v27, 9 }
 0x38a   :  { %v6211_v0 = vrot.slane %v7337_v14, 9  ;;  %v6208_v31 = vrot.slane %v7347_v4, 9  ;;  %v7738_v28 = vrot.slane %v3040_v30, %v7219_v47  ;;  %v6196_v39 = vrot.slane %v7371_v58, 9 }
 0x38b   :  { %v1324_v41 = vcombine.low %v7508_v52, %v7518_v25  ;;  %v1347_v37 = vrot.slane %v1340_v15, %v7219_v47  ;;  %v7745_v49 = vrot.slane %v2977_v38, %v7219_v47  ;;  %v7748_v20 = vrot.slane %v2986_v55, %v7219_v47  ;;  %v8674_v55 = vld [vmem:[#allocation63_spill] sm:$0xff] }
 0x38c   :  { %v2905_v27 = vcombine.low %v6211_v0, %v6212_v18  ;;  %v1372_v4 = vcombine.low %v7520_v45, %v7558_v13  ;;  %v6192_v53 = vrot.slane %v7362_v43, 9  ;;  %v1363_v58 = vrot.slane %v1356_v44, %v7219_v47 }
 0x38d   :  { %v1388_v52 = vcombine.low %v7514_v26, %v7544_v51  ;;  %v1315_v25 = vrot.slane %v1308_v50, %v7219_v47  ;;  %v2889_v60 = vcombine.low %v6207_v1, %v6208_v31  ;;  %v8669_v33 = vrot.slane %v7180_v6, 9  ;;  %v8672_v6 = vld [vmem:[#allocation62_spill] sm:$0xff] }
 0x38e   :  { %v1331_v45 = vrot.slane %v1324_v41, %v7219_v47  ;;  %v1473_v2 = vcombine.low %v1347_v37, %v1363_v58  ;;  %v2912_v43 = vrot.slane %v2905_v27, %v7219_v47  ;;  %v1379_v26 = vrot.slane %v1372_v4, %v7219_v47 }
 0x38f   :  { %v2673_v13 = vcombine.low %v8669_v33, %v6196_v39  ;;  %v8671_v12 = vrot.slane %v7178_v5, 9  ;;  %v6255_v35 = vrot.slane %v8672_v6, 9  ;;  %v1395_v61 = vrot.slane %v1388_v52, %v7219_v47 }
 0x390   :  { %v1464_v48 = vcombine.low %v1315_v25, %v1331_v45  ;;  %v8673_v30 = vmov 0.0   ;;  %v2896_v5 = vrot.slane %v2889_v60, %v7219_v47  ;;  %v1480_v50 = vrot.slane %v1473_v2, %v7219_v47  ;;  %v8675_v45 = vld [vmem:[#allocation68_spill] sm:$0xff] }
 0x391   :  { %v2657_v34 = vcombine.low %v8671_v12, %v6192_v53  ;;  %v2680_v44 = vrot.slane %v2673_v13, %v7219_v47  ;;  %v1482_v1 = vcombine.low %v1379_v26, %v1395_v61  ;;  %v6265_v41 = vcombine.high %v7745_v49, %v7748_v20 }
 0x392   :  { %v3022_v37 = vcombine.low %v2896_v5, %v2912_v43  ;;  %v1471_v4 = vrot.slane %v1464_v48, %v7219_v47  ;;  %v3385_v58 = vrot.slane %v3371_v10, %v6885_v7  ;;  %v3603_v10 = vcombine.low %v7718_v22, %v7738_v28 }
 0x393   :  { %v2664_v27 = vrot.slane %v2657_v34, %v7219_v47  ;;  %v1489_v60 = vrot.slane %v1482_v1, %v7219_v47  ;;  %v3494_v13 = vrot.slane %v6265_v41, %v6885_v7 }
 0x394   :  { %v3029_v33 = vrot.slane %v3022_v37, %v7219_v47 }
 0x395   :  { %v2744_v52 = vcombine.low %v2664_v27, %v2680_v44  ;;  %v8680_v44 = vld [vmem:[#allocation65_spill] sm:$0xff] }
 0x3d7   :  { %v1995_v32 = vpop.xlane.xlu1 %1994 }
 0x3d8   :  { %6555 = vrcp.f32 %v1995_v32  ;;  %v6266_v32 = vcombine.high %v7715_v59, %v7699_v36  ;;  %v3334_v36 = vrot.slane %v8675_v45, %v7219_v47 }
 0x3da   :  { %v3501_v25 = vrot.slane %v6266_v32, %v6885_v7 }
 0x3db   :  { %v1998_v42 = vpop.xlane.xlu0 %1997 }
 0x3dc   :  { %6557 = vrcp.f32 %v1998_v42  ;;  %v6259_v42 = vrot.slane %v8670_v63, 9  ;;  %v3502_v48 = vcombine.low %v3494_v13, %v3501_v25  ;;  %v8688_v13 = vld [vmem:[#allocation59_spill] sm:$0xff] }
 0x3e0   :  { %v2001_v16 = vpop.xlane.xlu1 %2000 }
 0x3e1   :  { %6559 = vrcp.f32 %v2001_v16  ;;  %v3370_v16 = vcombine.low %v7745_v49, %v7748_v20  ;;  %v2207_v49 = vcombine.low %v1471_v4, %v1480_v50 }
 0x3e3   :  { %v3378_v20 = vrot.slane %v3370_v16, %v6885_v7  ;;  %v8679_v16 = vld [vmem:[#allocation64_spill] sm:$0xff] }
 0x3e4   :  { %v1291_v14 = vpop.permute.xlu1 %1290  ;;  %v2004_v19 = vpop.xlane.xlu0 %2003 }
 0x3e5   :  { %v6556_v54 = vpop.eup %6555  ;;  %v6260_v17 = vrot.slane %v1291_v14, 9  ;;  %6561 = vrcp.f32 %v2004_v19  ;;  %v1420_v51 = vcombine.low %v8670_v63, %v1291_v14  ;;  %v6162_v19 = vcombine.high %v1471_v4, %v1480_v50 }
 0x3e6   :  { %v2009_v40 = vmul.f32 %v6556_v54, %v8668_v46  ;;  %v6274_v63 = vcombine.high %v7718_v22, %v7738_v28  ;;  %v3386_v26 = vcombine.low %v3378_v20, %v3385_v58  ;;  %v8676_v22 = vld [vmem:[#allocation66_spill] sm:$0xff]  ;;  %v8677_v28 = vld [vmem:[#allocation67_spill] sm:$0xff]  ;;  %v3617_v20 = vrot.slane %v3603_v10, %v6885_v7 }
 0x3e7   :  { %v3265_v15 = vcombine.low %v6259_v42, %v6260_v17  ;;  %v1427_v0 = vrot.slane %v1420_v51, %v7219_v47  ;;  %v2215_v42 = vrot.slane %v2207_v49, %v6885_v7  ;;  %v2310_v12 = vrot.slane %v6162_v19, %v6885_v7 }
 0x3e8   :  { %6426 = vmatmul.mubr.msk.f32.vlgmr.msra.gmra.mxu0 %vm1542_vm2, %v2009_v40  ;;  %v1289_v8 = vpop.permute.xlu0 %1288  ;;  %v3020_v40 = vrot.slane %v7732_v23, %v7219_v47  ;;  %v2751_v23 = vrot.slane %v2744_v52, %v7219_v47  ;;  %v8681_v1 = vcombine.high %v8676_v22, %v8677_v28  ;;  %v8683_v52 = vld [vmem:[#allocation36_spill] sm:$0xff] }
 0x3e9   :  { %v6558_v21 = vpop.eup %6557  ;;  %6435 = vmatprep.mubr.msk.f32.mxu0 %vm6737_vm1, %v8673_v30  ;;  %v1404_v11 = vcombine.low %v8672_v6, %v1289_v8  ;;  %v6256_v38 = vrot.slane %v1289_v8, 9  ;;  %v3272_v14 = vrot.slane %v3265_v15, %v7219_v47  ;;  %v3365_v49 = vcombine.low %v7703_v56, %v8683_v52 }
 0x3ea   :  { %v2010_v18 = vmul.f32 %v6558_v21, %v8674_v55  ;;  %v6273_v61 = vcombine.high %v3020_v40, %v3029_v33  ;;  %v6272_v41 = vcombine.high %v7636_v29, %v2751_v23 }
 0x3eb   :  { %v1411_v31 = vrot.slane %v1404_v11, %v7219_v47  ;;  %v3249_v39 = vcombine.low %v6255_v35, %v6256_v38  ;;  %v3602_v35 = vcombine.low %v3020_v40, %v3029_v33  ;;  %v8678_v38 = vcombine.low %v8676_v22, %v8677_v28  ;;  %v8685_v40 = vld [vmem:[#allocation30_spill] sm:$0xff] }
 0x3ec   :  { %6431 = vmatmul.mubr.msk.f32.vlgmr.msra.gmra.mxu1 %vm1542_vm2, %v2010_v18  ;;  %v3726_v4 = vrot.slane %v6273_v61, %v6885_v7  ;;  %v3712_v25 = vrot.slane %v6272_v41, %v6885_v7  ;;  %v8687_v33 = vld [vmem:[#allocation58_spill] sm:$0xff] }
 0x3ed   :  { %6440 = vmatprep.mubr.msk.f32.mxu1 %vm6737_vm1, %v8673_v30  ;;  %v1491_v54 = vcombine.low %v1411_v31, %v1427_v0  ;;  %v3256_v53 = vrot.slane %v3249_v39, %v7219_v47  ;;  %v7821_v55 = vrot.slane %v8678_v38, %v6885_v7  ;;  %v7832_v0 = vrot.slane %v8681_v1, %v6885_v7 }
 0x3ee   :  { %v6560_v43 = vpop.eup %6559  ;;  %v3582_v39 = vcombine.low %v7636_v29, %v2751_v23  ;;  %v3610_v27 = vrot.slane %v3602_v35, %v6885_v7  ;;  %v6271_v29 = vcombine.high %v7693_v57, %v7709_v24  ;;  %v8689_v45 = vcombine.low %v8687_v33, %v8688_v13 }
 0x3ef   :  { %v1498_v17 = vrot.slane %v1491_v54, %v7219_v47  ;;  %v3336_v46 = vcombine.low %v3256_v53, %v3272_v14  ;;  %v2011_v5 = vmul.f32 %v6560_v43, %v8679_v16  ;;  %v3581_v54 = vcombine.low %v7693_v57, %v7709_v24 }
 0x3f0   :  { %v8682_v53 = vcombine.high %v7631_v3, %v7624_v9  ;;  %v3733_v57 = vrot.slane %v6274_v63, %v6885_v7  ;;  %v3596_v24 = vrot.slane %v3582_v39, %v6885_v7  ;;  %v3618_v3 = vcombine.low %v3610_v27, %v3617_v20 }
 0x3f1   :  { %v2208_v59 = vcombine.low %v1489_v60, %v1498_v17  ;;  %v6163_v32 = vcombine.high %v1489_v60, %v1498_v17  ;;  %v3343_v2 = vrot.slane %v3336_v46, %v7219_v47  ;;  %v3589_v19 = vrot.slane %v3581_v54, %v6885_v7  ;;  %v8684_v46 = vld [vmem:[#allocation29_spill] sm:$0xff] }
 0x3f2   :  { %v6562_v51 = vpop.eup %6561  ;;  %v3480_v58 = vrot.slane %v8682_v53, %v6885_v7  ;;  %v3734_v56 = vcombine.low %v3726_v4, %v3733_v57  ;;  %v3705_v60 = vrot.slane %v6271_v29, %v6885_v7  ;;  %v8686_v10 = vcombine.low %v8684_v46, %v8685_v40 }
 0x3f3   :  { %v2222_v21 = vrot.slane %v2208_v59, %v6885_v7  ;;  %v2317_v34 = vrot.slane %v6163_v32, %v6885_v7  ;;  %v4052_v6 = vcombine.low %v3334_v36, %v3343_v2  ;;  %v6283_v8 = vcombine.high %v3334_v36, %v3343_v2 }
 0x3f4   :  { %v2012_v50 = vmul.f32 %v6562_v51, %v8680_v44  ;;  %v3481_v9 = vcombine.low %v7706_v62, %v3480_v58  ;;  %v3597_v62 = vcombine.low %v3589_v19, %v3596_v24  ;;  %v3713_v17 = vcombine.low %v3705_v60, %v3712_v25 }
 0x3f5   :  { %v2223_v15 = vcombine.low %v2215_v42, %v2222_v21  ;;  %v2318_v11 = vcombine.low %v2310_v12, %v2317_v34  ;;  %v7824_v18 = vrot.slane %v4052_v6, %v6885_v7  ;;  %v7835_v31 = vrot.slane %v6283_v8, %v6885_v7 }
 0x3f7   :  { %6434 = vmatpush3.msra.mxu0 %v2223_v15  ;;  %6439 = vmatpush3.msra.mxu1 %v2318_v11  ;;  %v4067_v37 = vcombine.low %v7821_v55, %v7824_v18  ;;  %v4162_v14 = vcombine.low %v7832_v0, %v7835_v31 }
 0x3f8   :  { %6436 = vmatmul.mubr.msk.f32.vlgmr.msra.gmra.mxu0 %vm1542_vm2, %v2011_v5  ;;  %6441 = vmatmul.mubr.msk.f32.vlgmr.msra.gmra.mxu1 %vm1542_vm2, %v2012_v50 }
 0x3f9   :  { %6443 = vmatprep.subr.mxu0 %v8673_v30  ;;  %6448 = vmatprep.subr.mxu1 %v8673_v30 }
 0x3fa   :  { %6444 = vmatpush3.xpose.msk.msra.mxu0 %vm1542_vm2, %v3386_v26  ;;  %6449 = vmatpush3.xpose.msk.msra.mxu1 %vm1542_vm2, %v3502_v48 }
 0x3fb   :  { %6445 = vmatprep.mubr.msk.f32.mxu0 %vm6737_vm1, %v8673_v30  ;;  %6450 = vmatprep.mubr.msk.f32.mxu1 %vm6737_vm1, %v8673_v30 }
 0x3fc   :  { %6453 = vmatprep.subr.mxu0 %v8673_v30  ;;  %6458 = vmatprep.subr.mxu1 %v8673_v30 }
 0x3fd   :  { %6446 = vmatmul.mubr.msk.f32.vlgmr.msra.gmra.mxu0 %vm1542_vm2, %v3365_v49  ;;  %6451 = vmatmul.mubr.msk.f32.vlgmr.msra.gmra.mxu1 %vm1542_vm2, %v3481_v9 }
 0x3fe   :  { %6454 = vmatpush3.xpose.msk.msra.mxu0 %vm1542_vm2, %v3618_v3  ;;  %6459 = vmatpush3.xpose.msk.msra.mxu1 %vm1542_vm2, %v3734_v56 }
 0x3ff   :  { %6455 = vmatprep.mubr.msk.f32.mxu0 %vm6737_vm1, %v8673_v30  ;;  %6460 = vmatprep.mubr.msk.f32.mxu1 %vm6737_vm1, %v8673_v30 }
 0x400   :  { %6463 = vmatprep.subr.mxu0 %v8673_v30  ;;  %6468 = vmatprep.subr.mxu1 %v8673_v30 }
 0x401   :  { %6456 = vmatmul.mubr.msk.f32.vlgmr.msra.gmra.mxu0 %vm1542_vm2, %v3597_v62  ;;  %6461 = vmatmul.mubr.msk.f32.vlgmr.msra.gmra.mxu1 %vm1542_vm2, %v3713_v17 }
 0x402   :  { %6464 = vmatpush3.msra.mxu0 %v8686_v10  ;;  %6469 = vmatpush3.msra.mxu1 %v8689_v45 }
 0x403   :  { %6465 = vmatprep.mubr.msk.f32.mxu0 %vm6737_vm1, %v8673_v30  ;;  %6470 = vmatprep.mubr.msk.f32.mxu1 %vm6737_vm1, %v8673_v30 }
 0x404   :  { %6473 = vmatprep.subr.mxu0 %v8673_v30  ;;  %6478 = vmatprep.subr.mxu1 %v8673_v30 }
 0x4a8   :  { %v2104_v36 = vpop.f32.mrf.mxu0 }
 0x4aa   :  { %v6427_v59 = vpop.f32.mrf.mxu0 }
 0x4ac   :  { %v2199_v32 = vpop.f32.mrf.mxu1 }
 0x4ae   :  { %v6432_v2 = vpop.f32.mrf.mxu1 }
 0x4b8   :  { %v2294_v43 = vpop.f32.mrf.mxu0  ;;  %v2389_v63 = vpop.f32.mrf.mxu1 }
 0x4b9   :  { %v2393_v23 = vcombine.low %v2104_v36, %v2294_v43  ;;  %v2394_v42 = vcombine.high %v2104_v36, %v2294_v43  ;;  %v2409_v26 = vcombine.low %v2199_v32, %v2389_v63  ;;  %v2410_v51 = vcombine.high %v2199_v32, %v2389_v63 }
 0x4ba   :  { %v6437_v21 = vpop.f32.mrf.mxu0  ;;  %v6442_v12 = vpop.f32.mrf.mxu1 }
 0x4bb   :  { %v2401_v34 = vrot.slane %v2393_v23, %v6885_v7  ;;  %v2408_v6 = vrot.slane %v2394_v42, %v6885_v7  ;;  %v2417_v35 = vrot.slane %v2409_v26, %v6885_v7  ;;  %v2424_v61 = vrot.slane %v2410_v51, %v6885_v7 }
 0x4bd   :  { %v2425_v48 = vcombine.low %v2401_v34, %v2417_v35  ;;  %v2426_v8 = vcombine.high %v2401_v34, %v2417_v35  ;;  %v2441_v15 = vcombine.low %v2408_v6, %v2424_v61  ;;  %v2442_v11 = vcombine.high %v2408_v6, %v2424_v61  ;;  %v3457_v22 = vpop.f32.mrf.mxu0  ;;  %v3573_v28 = vpop.f32.mrf.mxu1 }
 0x4be   :  { %v3809_v38 = vmul.f32 0.35355338, %v3457_v22  ;;  %v3810_v16 = vmul.f32 0.35355338, %v3573_v28 }
 0x4bf   :  { %v6447_v5 = vpop.f32.mrf.mxu0  ;;  %v6452_v44 = vpop.f32.mrf.mxu1  ;;  %v2433_v45 = vrot.slane %v2425_v48, %v7219_v47  ;;  %v2440_v32 = vrot.slane %v2426_v8, %v7219_v47  ;;  %v2449_v43 = vrot.slane %v2441_v15, %v7219_v47  ;;  %v2456_v42 = vrot.slane %v2442_v11, %v7219_v47 }
 0x4c0   :  { %v3816_v50 = vsel %vm1542_vm2, %v3810_v16, -inf  ;;  %v3813_v1 = vsel %vm1542_vm2, %v3809_v38, -inf }
 0x4c1   :  { %3817 = vmax.xlane.f32.xlu1 %v3816_v50  ;;  %v3805_v39 = vpop.f32.mrf.mxu1  ;;  %3814 = vmax.xlane.f32.xlu0 %v3813_v1  ;;  %v3689_v41 = vpop.f32.mrf.mxu0  ;;  %v4325_v2 = vcombine.high %v2433_v45, %v8673_v30  ;;  %v4374_v23 = vcombine.high %v2440_v32, %v8673_v30  ;;  %v4423_v21 = vcombine.high %v2449_v43, %v8673_v30 }
 0x4c2   :  { %v3811_v27 = vmul.f32 0.35355338, %v3689_v41  ;;  %v3812_v29 = vmul.f32 0.35355338, %v3805_v39  ;;  %v4307_v12 = vrot.slane %v2433_v45, %v6885_v7  ;;  %v4472_v61 = vcombine.high %v2456_v42, %v8673_v30 }
 0x4c3   :  { %v6457_v4 = vpop.f32.mrf.mxu0  ;;  %v6462_v54 = vpop.f32.mrf.mxu1  ;;  %v4332_v63 = vrot.slane %v4325_v2, %v6885_v7  ;;  %v4381_v51 = vrot.slane %v4374_v23, %v6885_v7  ;;  %v4430_v35 = vrot.slane %v4423_v21, %v6885_v7  ;;  %v4356_v22 = vrot.slane %v2440_v32, %v6885_v7 }
 0x4c4   :  { %v3819_v53 = vsel %vm1542_vm2, %v3811_v27, -inf  ;;  %v3822_v58 = vsel %vm1542_vm2, %v3812_v29, -inf  ;;  %v7944_v48 = vrot.slane %v4307_v12, %v7219_v47  ;;  %v4479_v11 = vrot.slane %v4472_v61, %v6885_v7 }
 0x4c5   :  { %3820 = vmax.xlane.f32.xlu0 %v3819_v53  ;;  %v7930_v26 = vrot.slane %v4332_v63, %v7219_v47  ;;  %v7938_v6 = vrot.slane %v4381_v51, %v7219_v47  ;;  %v7949_v15 = vrot.slane %v4430_v35, %v7219_v47  ;;  %v7962_v5 = vrot.slane %v4356_v22, %v7219_v47 }
 0x4c6   :  { %v4323_v28 = vcombine.high %v7944_v48, %v8673_v30  ;;  %v4405_v44 = vrot.slane %v2449_v43, %v6885_v7  ;;  %v4333_v50 = vcombine.high %v4332_v63, %v8673_v30 }
 0x4c7   :  { %v4348_v34 = vcombine.high %v7930_v26, %v8673_v30  ;;  %v4397_v8 = vcombine.high %v7938_v6, %v8673_v30  ;;  %v4372_v39 = vcombine.high %v7962_v5, %v8673_v30 }
 0x4c8   :  { %v7973_v41 = vrot.slane %v4405_v44, %v7219_v47  ;;  %v4347_v4 = vrot.slane %v4333_v50, %v7219_v47 }
 0x4c9   :  { %3823 = vmax.xlane.f32.xlu0 %v3822_v58  ;;  %v4431_v58 = vcombine.high %v4430_v35, %v8673_v30 }
 0x4ca   :  { %v4421_v54 = vcombine.high %v7973_v41, %v8673_v30 }
 0x54a   :  { %v3818_v52 = vpop.xlane.xlu1 %3817  ;;  %v3815_v49 = vpop.xlane.xlu0 %3814 }
 0x54b   :  { %v3826_v20 = vsub.f32 %v3810_v16, %v3818_v52  ;;  %v3825_v57 = vsub.f32 %v3809_v38, %v3815_v49  ;;  %v4446_v38 = vcombine.high %v7949_v15, %v8673_v30  ;;  %v7959_v16 = vrot.slane %v4479_v11, %v7219_v47 }
 0x54c   :  { %v4308_v52 = vcombine.high %v4307_v12, %v8673_v30 }
 0x54d   :  { %v3831_v24 = vmul.f32 1.442695, %v3826_v20  ;;  %v3829_v25 = vmul.f32 1.442695, %v3825_v57  ;;  %v4495_v1 = vcombine.high %v7959_v16, %v8673_v30  ;;  %v4480_v57 = vcombine.high %v4479_v11, %v8673_v30 }
 0x54e   :  { %v3821_v9 = vpop.xlane.xlu0 %3820 }
 0x54f   :  { %6563 = vpow2.f32 %v3831_v24  ;;  %v3827_v3 = vsub.f32 %v3811_v27, %v3821_v9  ;;  %v4454_v27 = vrot.slane %v2456_v42, %v6885_v7  ;;  %v4357_v24 = vcombine.high %v4356_v22, %v8673_v30 }
 0x550   :  { %6565 = vpow2.f32 %v3829_v25  ;;  %v4445_v25 = vrot.slane %v4431_v58, %v7219_v47  ;;  %v4322_v9 = vrot.slane %v4308_v52, %v7219_v47 }
 0x551   :  { %v3833_v56 = vmul.f32 1.442695, %v3827_v3  ;;  %v7983_v53 = vrot.slane %v4454_v27, %v7219_v47  ;;  %v4406_v3 = vcombine.high %v4405_v44, %v8673_v30 }
 0x552   :  { %v3824_v19 = vpop.xlane.xlu0 %3823  ;;  %v4447_v45 = vcombine.high %v4445_v25, %v8673_v30 }
 0x553   :  { %6567 = vpow2.f32 %v3833_v56  ;;  %v3828_v60 = vsub.f32 %v3812_v29, %v3824_v19  ;;  %v4382_v29 = vcombine.high %v4381_v51, %v8673_v30  ;;  %v4470_v20 = vcombine.high %v7983_v53, %v8673_v30 }
 0x554   :  { %v8002_v56 = vrot.slane %v4480_v57, %v7219_v47  ;;  %v4371_v19 = vrot.slane %v4357_v24, %v7219_v47 }
 0x555   :  { %v3835_v62 = vmul.f32 1.442695, %v3828_v60  ;;  %v4396_v49 = vrot.slane %v4382_v29, %v7219_v47  ;;  %v4349_v60 = vcombine.high %v4347_v4, %v8673_v30 }
 0x556   :  { %v4373_v32 = vcombine.high %v4371_v19, %v8673_v30 }
 0x557   :  { %6569 = vpow2.f32 %v3835_v62  ;;  %v4455_v62 = vcombine.high %v4454_v27, %v8673_v30 }
 0x55c   :  { %v7906_v17 = vpop.eup %6563 }
 0x55d   :  { %v7908_v46 = vpop.eup %6565  ;;  %v3840_v40 = vsel %vm1542_vm2, %v7906_v17, 0.0 }
 0x55e   :  { %v3837_v10 = vsel %vm1542_vm2, %v7908_v46, 0.0  ;;  %3841 = vadd.xlane.f32.xlu0 %v3840_v40  ;;  %v4420_v40 = vrot.slane %v4406_v3, %v7219_v47 }
 0x55f   :  { %3838 = vadd.xlane.f32.xlu1 %v3837_v10  ;;  %v4398_v10 = vcombine.high %v4396_v49, %v8673_v30 }
 0x560   :  { %v7914_v33 = vpop.eup %6567  ;;  %v4422_v2 = vcombine.high %v4420_v40, %v8673_v30 }
 0x561   :  { %v3843_v13 = vsel %vm1542_vm2, %v7914_v33, 0.0 }
 0x563   :  { %3844 = vadd.xlane.f32.xlu1 %v3843_v13  ;;  %v8015_v13 = vrot.slane %v4455_v62, %v7219_v47 }
 0x564   :  { %v7919_v36 = vpop.eup %6569 }
 0x565   :  { %v3846_v59 = vsel %vm1542_vm2, %v7919_v36, 0.0 }
 0x566   :  { %3847 = vadd.xlane.f32.xlu0 %v3846_v59  ;;  %v4324_v59 = vcombine.high %v4322_v9, %v8673_v30 }
 0x574   :  { %4507 = vrot.lane.b32.xlu1 %v4348_v34, %s6728_s27 }
 0x578   :  { %4511 = vrot.lane.b32.xlu1 %v4397_v8, %s6728_s27 }
 0x57c   :  { %4515 = vrot.lane.b32.xlu1 %v4446_v38, %s6728_s27  ;;  %4505 = vrot.lane.b32.xlu0 %v4323_v28, %s6728_s27 }
 0x580   :  { %4519 = vrot.lane.b32.xlu1 %v4495_v1, %s6728_s27  ;;  %4509 = vrot.lane.b32.xlu0 %v4372_v39, %s6728_s27 }
 0x584   :  { %4539 = vrot.lane.b32.xlu1 %v4347_v4, %s6739_s8  ;;  %4513 = vrot.lane.b32.xlu0 %v4421_v54, %s6728_s27 }
 0x588   :  { %4543 = vrot.lane.b32.xlu1 %v4396_v49, %s6739_s8  ;;  %4517 = vrot.lane.b32.xlu0 %v4470_v20, %s6728_s27 }
 0x58c   :  { %4547 = vrot.lane.b32.xlu1 %v4445_v25, %s6739_s8  ;;  %4537 = vrot.lane.b32.xlu0 %v4322_v9, %s6739_s8 }
 0x590   :  { %4551 = vrot.lane.b32.xlu1 %v8002_v56, %s6739_s8  ;;  %4541 = vrot.lane.b32.xlu0 %v4371_v19, %s6739_s8 }
 0x594   :  { %4571 = vrot.lane.b32.xlu1 %v4349_v60, %s6740_s3  ;;  %4545 = vrot.lane.b32.xlu0 %v4420_v40, %s6739_s8 }
 0x598   :  { %4575 = vrot.lane.b32.xlu1 %v4398_v10, %s6740_s3  ;;  %4549 = vrot.lane.b32.xlu0 %v8015_v13, %s6739_s8 }
 0x59c   :  { %4579 = vrot.lane.b32.xlu1 %v4447_v45, %s6740_s3  ;;  %4569 = vrot.lane.b32.xlu0 %v4324_v59, %s6740_s3 }
 0x5a0   :  { %4573 = vrot.lane.b32.xlu0 %v4373_v32, %s6740_s3 }
 0x5a4   :  { %4577 = vrot.lane.b32.xlu0 %v4422_v2, %s6740_s3 }
 0x5e7   :  { %v3842_v43 = vpop.xlane.xlu0 %3841 }
 0x5e8   :  { %v3839_v63 = vpop.xlane.xlu1 %3838  ;;  %6571 = vrcp.f32 %v3842_v43 }
 0x5e9   :  { %6573 = vrcp.f32 %v3839_v63 }
 0x5ec   :  { %v3845_v23 = vpop.xlane.xlu1 %3844 }
 0x5ed   :  { %6575 = vrcp.f32 %v3845_v23 }
 0x5ef   :  { %v3848_v42 = vpop.xlane.xlu0 %3847 }
 0x5f0   :  { %v4508_v51 = vpop.permute.xlu1 %4507  ;;  %6577 = vrcp.f32 %v3848_v42 }
 0x5f1   :  { %v4594_v31 = vsel %vm1542_vm2, %v7930_v26, %v4508_v51 }
 0x5f4   :  { %v4512_v21 = vpop.permute.xlu1 %4511 }
 0x5f5   :  { %v6572_v12 = vpop.eup %6571 }
 0x5f6   :  { %v6574_v34 = vpop.eup %6573  ;;  %v3854_v35 = vmul.f32 %v6572_v12, %v7906_v17 }
 0x5f7   :  { %v3853_v61 = vmul.f32 %v6574_v34, %v7908_v46 }
 0x5f8   :  { %v4516_v8 = vpop.permute.xlu1 %4515  ;;  %6471 = vmatmul.mubr.msk.f32.vlgmr.msra.gmra.mxu1 %vm1542_vm2, %v3854_v35 }
 0x5f9   :  { %6466 = vmatmul.mubr.msk.f32.vlgmr.msra.gmra.mxu0 %vm1542_vm2, %v3853_v61  ;;  %6479 = vmatpush3.msra.mxu1 %v4162_v14  ;;  %v4598_v28 = vsel %vm1542_vm2, %v7949_v15, %v4516_v8 }
 0x5fa   :  { %v6576_v11 = vpop.eup %6575  ;;  %6474 = vmatpush3.msra.mxu0 %v4067_v37  ;;  %6475 = vmatprep.mubr.msk.f32.mxu0 %vm6737_vm1, %v8673_v30  ;;  %v4596_v37 = vsel %vm1542_vm2, %v7938_v6, %v4512_v21 }
 0x5fb   :  { %v3855_v17 = vmul.f32 %v6576_v11, %v7914_v33  ;;  %6480 = vmatprep.mubr.msk.f32.mxu1 %vm6737_vm1, %v8673_v30 }
 0x5fc   :  { %v4520_v46 = vpop.permute.xlu1 %4519 }
 0x5fd   :  { %v6578_v22 = vpop.eup %6577  ;;  %6476 = vmatmul.mubr.msk.f32.vlgmr.msra.gmra.mxu0 %vm1542_vm2, %v3855_v17  ;;  %v4600_v26 = vsel %vm1542_vm2, %v7959_v16, %v4520_v46 }
 0x5fe   :  { %v3856_v0 = vmul.f32 %v6578_v22, %v7919_v36 }
 0x600   :  { %v4540_v55 = vpop.permute.xlu1 %4539  ;;  %6481 = vmatmul.mubr.msk.f32.vlgmr.msra.gmra.mxu1 %vm1542_vm2, %v3856_v0 }
 0x601   :  { %v8049_v18 = vsel %vm4601_vm3, %v4594_v31, %v4540_v55 }
 0x604   :  { %v4544_v14 = vpop.permute.xlu1 %4543 }
 0x605   :  { %v8054_v33 = vsel %vm4601_vm3, %v4596_v37, %v4544_v14 }
 0x608   :  { %v4548_v36 = vpop.permute.xlu1 %4547 }
 0x609   :  { %v8059_v38 = vsel %vm4601_vm3, %v4598_v28, %v4548_v36 }
 0x60c   :  { %v4552_v44 = vpop.permute.xlu1 %4551 }
 0x60d   :  { %v8064_v50 = vsel %vm4601_vm3, %v4600_v26, %v4552_v44 }
 0x6b8   :  { %v4043_v1 = vpop.f32.mrf.mxu1 }
 0x6b9   :  { %v3948_v6 = vpop.f32.mrf.mxu0 }
 0x6ba   :  { %v6472_v39 = vpop.f32.mrf.mxu1 }
 0x6bb   :  { %v6467_v27 = vpop.f32.mrf.mxu0 }
 0x6bd   :  { %v4138_v4 = vpop.f32.mrf.mxu0 }
 0x6be   :  { %v4237_v54 = vcombine.low %v3948_v6, %v4138_v4  ;;  %v4238_v29 = vcombine.high %v3948_v6, %v4138_v4 }
 0x6bf   :  { %v6477_v58 = vpop.f32.mrf.mxu0 }
 0x6c0   :  { %v4233_v15 = vpop.f32.mrf.mxu1  ;;  %v4245_v57 = vrot.slane %v4237_v54, %v6885_v7  ;;  %v4252_v16 = vrot.slane %v4238_v29, %v6885_v7 }
 0x6c1   :  { %v4253_v52 = vcombine.low %v4043_v1, %v4233_v15  ;;  %v4254_v49 = vcombine.high %v4043_v1, %v4233_v15 }
 0x6c2   :  { %v6482_v20 = vpop.f32.mrf.mxu1 }
 0x6c3   :  { %v4261_v24 = vrot.slane %v4253_v52, %v6885_v7  ;;  %v4268_v25 = vrot.slane %v4254_v49, %v6885_v7 }
 0x6c5   :  { %v4269_v9 = vcombine.low %v4245_v57, %v4261_v24  ;;  %v4270_v3 = vcombine.high %v4245_v57, %v4261_v24  ;;  %v4285_v19 = vcombine.low %v4252_v16, %v4268_v25  ;;  %v4286_v60 = vcombine.high %v4252_v16, %v4268_v25 }
 0x6c7   :  { %v4277_v62 = vrot.slane %v4269_v9, %v7219_v47  ;;  %v4284_v40 = vrot.slane %v4270_v3, %v7219_v47  ;;  %v4293_v10 = vrot.slane %v4285_v19, %v7219_v47  ;;  %v4300_v45 = vrot.slane %v4286_v60, %v7219_v47 }
 0x6c9   :  { %v4692_v59 = vcombine.high %v4284_v40, %v8673_v30  ;;  %v4723_v32 = vrot.slane %v4293_v10, %v6885_v7  ;;  %v4625_v2 = vrot.slane %v4277_v62, %v6885_v7  ;;  %v4772_v43 = vrot.slane %v4300_v45, %v6885_v7 }
 0x6ca   :  { %v4674_v63 = vrot.slane %v4284_v40, %v6885_v7  ;;  %v4741_v51 = vcombine.high %v4293_v10, %v8673_v30  ;;  %v4790_v8 = vcombine.high %v4300_v45, %v8673_v30  ;;  %v4643_v31 = vcombine.high %v4277_v62, %v8673_v30 }
 0x6cb   :  { %v8080_v23 = vrot.slane %v4723_v32, %v7219_v47  ;;  %v8083_v42 = vrot.slane %v4625_v2, %v7219_v47  ;;  %v4699_v21 = vrot.slane %v4692_v59, %v6885_v7  ;;  %v8092_v35 = vrot.slane %v4772_v43, %v7219_v47  ;;  %v4971_v59 = vld [vmem:[#allocation8 + $0x18] sm:$0xff] }
 0x6cc   :  { %v8095_v61 = vrot.slane %v4674_v63, %v7219_v47  ;;  %v4748_v11 = vrot.slane %v4741_v51, %v6885_v7  ;;  %v4626_v0 = vcombine.high %v4625_v2, %v8673_v30  ;;  %v4797_v55 = vrot.slane %v4790_v8, %v6885_v7  ;;  %6483 = vmatprep.subr.mxu0 %v4971_v59  ;;  %v4506_v51 = vpop.permute.xlu0 %4505 }
 0x6cd   :  { %v4739_v12 = vcombine.high %v8080_v23, %v8673_v30  ;;  %v4641_v34 = vcombine.high %v8083_v42, %v8673_v30  ;;  %v4788_v17 = vcombine.high %v8092_v35, %v8673_v30  ;;  %v8106_v22 = vrot.slane %v4699_v21, %v7219_v47  ;;  %6484 = vmatpush3.msra.mxu0 %v4971_v59 }
 0x6ce   :  { %v4690_v46 = vcombine.high %v8095_v61, %v8673_v30  ;;  %v4640_v14 = vrot.slane %v4626_v0, %v7219_v47  ;;  %v8117_v28 = vrot.slane %v4748_v11, %v7219_v47  ;;  %v4675_v36 = vcombine.high %v4674_v63, %v8673_v30  ;;  %v4968_v63 = vld [vmem:[#allocation8] sm:$0xff]  ;;  %v4572_v0 = vpop.permute.xlu1 %4571 }
 0x6cf   :  { %4831 = vrot.lane.b32.xlu0 %v4739_v12, %s6728_s27  ;;  %4823 = vrot.lane.b32.xlu1 %v4641_v34, %s6728_s27  ;;  %v4715_v37 = vcombine.high %v8106_v22, %v8673_v30  ;;  %v4650_v26 = vrot.slane %v4643_v31, %v6885_v7  ;;  %v8127_v6 = vrot.slane %v4797_v55, %v7219_v47 }
 0x6d0   :  { %v4764_v44 = vcombine.high %v8117_v28, %v8673_v30  ;;  %v4689_v1 = vrot.slane %v4675_v36, %v7219_v47  ;;  %v4724_v39 = vcombine.high %v4723_v32, %v8673_v30  ;;  %v4773_v29 = vcombine.high %v4772_v43, %v8673_v30  ;;  %v4970_v32 = vld [vmem:[#allocation8 + $0x10] sm:$0xff]  ;;  %v4969_v43 = vld [vmem:[#allocation8 + $0x8] sm:$0xff] }
 0x6d1   :  { %v4813_v27 = vcombine.high %v8127_v6, %v8673_v30  ;;  %v4651_v54 = vcombine.high %v4650_v26, %v8673_v30  ;;  %v4700_v52 = vcombine.high %v4699_v21, %v8673_v30  ;;  %v8143_v49 = vrot.slane %v4650_v26, %v7219_v47  ;;  %6485 = vmatprep.subr.mxu0 %v4970_v32  ;;  %v4510_v21 = vpop.permute.xlu0 %4509 }
 0x6d2   :  { %v4738_v4 = vrot.slane %v4724_v39, %v7219_v47  ;;  %v4787_v15 = vrot.slane %v4773_v29, %v7219_v47  ;;  %v4749_v16 = vcombine.high %v4748_v11, %v8673_v30  ;;  %v4642_v25 = vcombine.high %v4640_v14, %v8673_v30  ;;  %6486 = vmatpush3.msra.mxu0 %v4970_v32 }
 0x6d3   :  { %4835 = vrot.lane.b32.xlu0 %v4788_v17, %s6728_s27  ;;  %4827 = vrot.lane.b32.xlu1 %v4690_v46, %s6728_s27  ;;  %v4665_v58 = vrot.slane %v4651_v54, %v7219_v47  ;;  %v4714_v20 = vrot.slane %v4700_v52, %v7219_v47  ;;  %v4666_v57 = vcombine.high %v8143_v49, %v8673_v30 }
 0x6d4   :  { %v4763_v24 = vrot.slane %v4749_v16, %v7219_v47  ;;  %v4798_v9 = vcombine.high %v4797_v55, %v8673_v30  ;;  %v4691_v19 = vcombine.high %v4689_v1, %v8673_v30  ;;  %v4740_v62 = vcombine.high %v4738_v4, %v8673_v30  ;;  %6487 = vmatprep.subr.mxu0 %v4969_v43 }
 0x6d5   :  { %v4667_v60 = vcombine.high %v4665_v58, %v8673_v30  ;;  %v4716_v40 = vcombine.high %v4714_v20, %v8673_v30  ;;  %v4789_v10 = vcombine.high %v4787_v15, %v8673_v30  ;;  %v4471_v45 = vcombine.high %v8015_v13, %v8673_v30  ;;  %6488 = vmatpush3.msra.mxu0 %v4969_v43  ;;  %v8180_v12 = vpop.permute.xlu0 %4513 }
 0x6d6   :  { %v4812_v3 = vrot.slane %v4798_v9, %v7219_v47  ;;  %v4765_v47 = vcombine.high %v4763_v24, %v8673_v30  ;;  %v4496_v13 = vcombine.high %v8002_v56, %v8673_v30  ;;  %6489 = vmatprep.subr.mxu0 %v4968_v63  ;;  %v4593_v59 = vsel %vm1542_vm2, %v7944_v48, %v4506_v51 }
 0x6d7   :  { %4829 = vrot.lane.b32.xlu1 %v4715_v37, %s6728_s27  ;;  %4855 = vrot.lane.b32.xlu0 %v4640_v14, %s6739_s8 }
 0x6d8   :  { %v4814_v2 = vcombine.high %v4812_v3, %v8673_v30  ;;  %6490 = vmatpush3.msra.mxu0 %v4968_v63  ;;  %v4576_v30 = vpop.permute.xlu1 %4575  ;;  %v4612_v63 = vsel %vm4610_vm4, %v8049_v18, %v4572_v0 }
 0x6d9   :  { %v8182_v34 = vpop.permute.xlu0 %4517 }
 0x6db   :  { %4833 = vrot.lane.b32.xlu1 %v4764_v44, %s6728_s27  ;;  %4859 = vrot.lane.b32.xlu0 %v4689_v1, %s6739_s8 }
 0x6dc   :  { %v8188_v55 = vpop.permute.xlu1 %4579 }
 0x6dd   :  { %v4538_v8 = vpop.permute.xlu0 %4537 }
 0x6df   :  { %4837 = vrot.lane.b32.xlu1 %v4813_v27, %s6728_s27  ;;  %4863 = vrot.lane.b32.xlu0 %v4738_v4, %s6739_s8 }
 0x6e1   :  { %v4542_v11 = vpop.permute.xlu0 %4541 }
 0x6e3   :  { %4857 = vrot.lane.b32.xlu1 %v4665_v58, %s6739_s8  ;;  %4867 = vrot.lane.b32.xlu0 %v4787_v15, %s6739_s8 }
 0x6e5   :  { %v8184_v17 = vpop.permute.xlu0 %4545 }
 0x6e7   :  { %4861 = vrot.lane.b32.xlu1 %v4714_v20, %s6739_s8  ;;  %4825 = vrot.lane.b32.xlu0 %v4666_v57, %s6728_s27 }
 0x6e9   :  { %v8186_v46 = vpop.permute.xlu0 %4549 }
 0x6eb   :  { %4865 = vrot.lane.b32.xlu1 %v4763_v24, %s6739_s8  ;;  %4887 = vrot.lane.b32.xlu0 %v4642_v25, %s6740_s3 }
 0x6ed   :  { %v4570_v31 = vpop.permute.xlu0 %4569 }
 0x6ef   :  { %4869 = vrot.lane.b32.xlu1 %v4812_v3, %s6739_s8  ;;  %4891 = vrot.lane.b32.xlu0 %v4691_v19, %s6740_s3 }
 0x6f1   :  { %v4574_v56 = vpop.permute.xlu0 %4573 }
 0x6f3   :  { %4889 = vrot.lane.b32.xlu1 %v4667_v60, %s6740_s3  ;;  %4895 = vrot.lane.b32.xlu0 %v4740_v62, %s6740_s3 }
 0x6f5   :  { %v8190_v37 = vpop.permute.xlu0 %4577 }
 0x6f7   :  { %4893 = vrot.lane.b32.xlu1 %v4716_v40, %s6740_s3  ;;  %4899 = vrot.lane.b32.xlu0 %v4789_v10, %s6740_s3 }
 0x6fb   :  { %4897 = vrot.lane.b32.xlu1 %v4765_v47, %s6740_s3  ;;  %4581 = vrot.lane.b32.xlu0 %v4471_v45, %s6740_s3 }
 0x6ff   :  { %4901 = vrot.lane.b32.xlu1 %v4814_v2, %s6740_s3  ;;  %v4602_v2 = vsel %vm4601_vm3, %v4593_v59, %v4538_v8 }
 0x703   :  { %4583 = vrot.lane.b32.xlu1 %v4496_v13, %s6740_s3  ;;  %v4611_v13 = vsel %vm4610_vm4, %v4602_v2, %v4570_v31 }
 0x741   :  { %v4832_v14 = vpop.permute.xlu0 %4831  ;;  %v4824_v36 = vpop.permute.xlu1 %4823 }
 0x742   :  { %v4911_v24 = vsel %vm1542_vm2, %v8083_v42, %v4824_v36 }
 0x745   :  { %v8192_v26 = vpop.permute.xlu0 %4835  ;;  %v4828_v44 = vpop.permute.xlu1 %4827 }
 0x746   :  { %v4913_v62 = vsel %vm1542_vm2, %v8095_v61, %v4828_v44  ;;  %v4915_v61 = vsel %vm1542_vm2, %v8080_v23, %v4832_v14  ;;  %v4595_v23 = vsel %vm1542_vm2, %v7962_v5, %v4510_v21 }
 0x749   :  { %v4830_v1 = vpop.permute.xlu1 %4829  ;;  %v4856_v39 = vpop.permute.xlu0 %4855 }
 0x74a   :  { %v4919_v25 = vsel %vm4601_vm3, %v4911_v24, %v4856_v39  ;;  %v4914_v36 = vsel %vm1542_vm2, %v8106_v22, %v4830_v1  ;;  %v4604_v22 = vsel %vm4601_vm3, %v4595_v23, %v4542_v11  ;;  %v6588_v23 = vld [vmem:[#allocation2 + $0xa] sm:$0x3] }
 0x74d   :  { %v4834_v27 = vpop.permute.xlu1 %4833  ;;  %v4860_v4 = vpop.permute.xlu0 %4859 }
 0x74e   :  { %v4921_v40 = vsel %vm4601_vm3, %v4913_v62, %v4860_v4  ;;  %v4916_v5 = vsel %vm1542_vm2, %v8117_v28, %v4834_v27  ;;  %v4616_v28 = vsel %vm4610_vm4, %v8059_v38, %v8188_v55  ;;  %v4917_v27 = vsel %vm1542_vm2, %v8092_v35, %v8192_v26 }
 0x751   :  { %v4838_v54 = vpop.permute.xlu1 %4837  ;;  %v4864_v29 = vpop.permute.xlu0 %4863 }
 0x752   :  { %v4923_v48 = vsel %vm4601_vm3, %v4915_v61, %v4864_v29  ;;  %v4597_v29 = vsel %vm1542_vm2, %v7973_v41, %v8180_v12 }
 0x755   :  { %v4858_v58 = vpop.permute.xlu1 %4857  ;;  %v4868_v15 = vpop.permute.xlu0 %4867 }
 0x759   :  { %v4862_v52 = vpop.permute.xlu1 %4861  ;;  %v4826_v20 = vpop.permute.xlu0 %4825 }
 0x75a   :  { %v4912_v19 = vsel %vm1542_vm2, %v8143_v49, %v4826_v20  ;;  %v4922_v51 = vsel %vm4601_vm3, %v4914_v36, %v4862_v52  ;;  %v4613_v52 = vsel %vm4610_vm4, %v4604_v22, %v4574_v56  ;;  %v6589_v22 = vld [vmem:[#allocation2 + $0xc] sm:$0x3] }
 0x75b   :  { %v4920_v45 = vsel %vm4601_vm3, %v4912_v19, %v4858_v58  ;;  %v4614_v58 = vsel %vm4610_vm4, %v8054_v33, %v4576_v30  ;;  %v4599_v33 = vsel %vm1542_vm2, %v7983_v53, %v8182_v34  ;;  %v4925_v53 = vsel %vm4601_vm3, %v4917_v27, %v4868_v15 }
 0x75d   :  { %v4866_v57 = vpop.permute.xlu1 %4865  ;;  %v4888_v16 = vpop.permute.xlu0 %4887 }
 0x75e   :  { %v4927_v60 = vsel %vm4610_vm4, %v4919_v25, %v4888_v16  ;;  %v4924_v21 = vsel %vm4601_vm3, %v4916_v5, %v4866_v57  ;;  %v4606_v25 = vsel %vm4601_vm3, %v4597_v29, %v8184_v17  ;;  %v4918_v17 = vsel %vm1542_vm2, %v8127_v6, %v4838_v54  ;;  %v6591_v5 = vld [vmem:[#allocation2] sm:$0x3] }
 0x75f   :  { %v4943_v10 = vrot.slane %v4927_v60, 7  ;;  %v4615_v30 = vsel %vm4610_vm4, %v4606_v25, %v8190_v37  ;;  %v4608_v54 = vsel %vm4601_vm3, %v4599_v33, %v8186_v46  ;;  %v6594_v25 = vld [vmem:[#allocation2 + $0x6] sm:$0x3] }
 0x761   :  { %v4870_v9 = vpop.permute.xlu1 %4869  ;;  %v4892_v3 = vpop.permute.xlu0 %4891  ;;  %v4960_v44 = vsel %vm4959_vm5, %v4611_v13, %v4943_v10 }
 0x762   :  { %v4929_v32 = vsel %vm4610_vm4, %v4921_v40, %v4892_v3  ;;  %v4926_v34 = vsel %vm4601_vm3, %v4918_v17, %v4870_v9 }
 0x763   :  { %v4945_v39 = vrot.slane %v4929_v32, 7 }
 0x765   :  { %v4890_v47 = vpop.permute.xlu1 %4889  ;;  %v4896_v42 = vpop.permute.xlu0 %4895  ;;  %v4962_v20 = vsel %vm4959_vm5, %v4613_v52, %v4945_v39 }
 0x766   :  { %v4928_v49 = vsel %vm4610_vm4, %v4920_v45, %v4890_v47  ;;  %v4931_v18 = vsel %vm4610_vm4, %v4923_v48, %v4896_v42 }
 0x767   :  { %v4944_v43 = vrot.slane %v4928_v49, 7  ;;  %v4947_v16 = vrot.slane %v4931_v18, 7  ;;  %v6285_v49 = vld [vmem:[%s8486_s10] ss:$0 sm:$0xff] }
 0x769   :  { %v4961_v8 = vsel %vm4959_vm5, %v4612_v63, %v4944_v43  ;;  %v4894_v4 = vpop.permute.xlu1 %4893  ;;  %v4900_v1 = vpop.permute.xlu0 %4899  ;;  %v4964_v38 = vsel %vm4959_vm5, %v4615_v30, %v4947_v16 }
 0x76a   :  { %v4987_v14 = vcombine.low %v4960_v44, %v4961_v8  ;;  %v4930_v0 = vsel %vm4610_vm4, %v4922_v51, %v4894_v4  ;;  %v4933_v60 = vsel %vm4610_vm4, %v4925_v53, %v4900_v1  ;;  %v6587_v8 = vld [vmem:[#allocation2 + $0x8] sm:$0x3]  ;;  %v6590_v1 = vld [vmem:[#allocation2 + $0xe] sm:$0x3] }
 0x76b   :  { %v4946_v31 = vrot.slane %v4930_v0, 7  ;;  %v4949_v15 = vrot.slane %v4933_v60, 7  ;;  %v6743_v60 = vmov 1414812756  }
 0x76c   :  { %v4995_v57 = vrot.slane %v4987_v14, %v6885_v7 }
 0x76d   :  { %v4963_v11 = vsel %vm4959_vm5, %v4614_v58, %v4946_v31  ;;  %v4898_v24 = vpop.permute.xlu1 %4897  ;;  %v4582_v37 = vpop.permute.xlu0 %4581 }
 0x76e   :  { %v4988_v41 = vcombine.low %v4962_v20, %v4963_v11  ;;  %v4932_v12 = vsel %vm4610_vm4, %v4924_v21, %v4898_v24  ;;  %v4617_v62 = vsel %vm4610_vm4, %v4608_v54, %v4582_v37  ;;  %v6592_v20 = vld [vmem:[#allocation2 + $0x2] sm:$0x3]  ;;  %v6593_v11 = vld [vmem:[#allocation2 + $0x4] sm:$0x3]  ;;  %v6742_v37 = vmov 842150450  }
 0x76f   :  { %v4948_v56 = vrot.slane %v4932_v12, 7  ;;  %v4966_v47 = vsel %vm4959_vm5, %v4617_v62, %v4949_v15 }
 0x770   :  { %v5002_v3 = vrot.slane %v4988_v41, %v6885_v7 }
 0x771   :  { %v4965_v55 = vsel %vm4959_vm5, %v4616_v28, %v4948_v56  ;;  %v4902_v19 = vpop.permute.xlu1 %4901 }
 0x772   :  { %v5004_v35 = vcombine.low %v4964_v38, %v4965_v55  ;;  %v4934_v26 = vsel %vm4610_vm4, %v4926_v34, %v4902_v19  ;;  %v5003_v6 = vcombine.low %v4995_v57, %v5002_v3  ;;  %v6741_v38 = vmov 269488144  }
 0x773   :  { %v4950_v9 = vrot.slane %v4934_v26, 7  ;;  %v5208_v55 = vunpack.c.l.s4 %v6741_v38  ;;  %v5215_v19 = vunpack.c.l.s4 %v6742_v37  ;;  %v6744_v26 = vmov 1987475062   ;;  %v5626_v38 = vld [vmem:[%s8489_s13 + $0x28] sm:$0xff] }
 0x774   :  { %6491 = vmatprep.mubr.msk.f32.mxu0 %vm208_vm0, %v5003_v6  ;;  %v5012_v59 = vrot.slane %v5004_v35, %v6885_v7  ;;  %v5222_v35 = vunpack.c.l.s4 %v6743_v60  ;;  %v5229_v6 = vunpack.c.l.s4 %v6744_v26 }
 0x775   :  { %v4584_v40 = vpop.permute.xlu1 %4583  ;;  %v5209_v54 = vunpack.c.0.s8 %v5208_v55  ;;  %v5216_v62 = vunpack.c.0.s8 %v5215_v19  ;;  %v5625_v55 = vld [vmem:[%s8489_s13 + $0x20] sm:$0xff] }
 0x776   :  { %v4618_v10 = vsel %vm4610_vm4, %v8064_v50, %v4584_v40  ;;  %v5223_v15 = vunpack.c.0.s8 %v5222_v35  ;;  %v8690_v40 = vld [vmem:[#allocation16_spill] sm:$0xff] }
 0x777   :  { %v4967_v45 = vsel %vm4959_vm5, %v4618_v10, %v4950_v9  ;;  %v5230_v9 = vunpack.c.0.s8 %v5229_v6  ;;  %v8285_v10 = vsub.s32 %v5209_v54, %v8690_v40  ;;  %v6288_v54 = vld [vmem:[%s8491_s15] ss:$0 sm:$0xff] }
 0x778   :  { %v5005_v42 = vcombine.low %v4966_v47, %v4967_v45  ;;  %v8288_v47 = vsub.s32 %v5216_v62, %v8690_v40  ;;  %v8291_v45 = vsub.s32 %v5223_v15, %v8690_v40  ;;  %v6289_v62 = vld [vmem:[%s8492_s16] ss:$0 sm:$0xff]  ;;  %v5423_v15 = vcombine.high %v6288_v54, %v6288_v54 }
 0x77a   :  { %v5019_v32 = vrot.slane %v5005_v42, %v6885_v7  ;;  %v8294_v42 = vsub.s32 %v5230_v9, %v8690_v40  ;;  %v5430_v9 = vrot.slane %v6288_v54, %v6885_v7  ;;  %v5458_v40 = vcombine.high %v6289_v62, %v6289_v62  ;;  %v5621_v54 = vld [vmem:[%s8489_s13] sm:$0xff] }
 0x77c   :  { %v5020_v46 = vcombine.low %v5012_v59, %v5019_v32 }
 0x77e   :  { %6492 = vmatmul.mubr.msk.f32.vlgmr.msra.gmra.mxu0 %vm208_vm0, %v5020_v46 }
 0x83e   :  { %v6493_v2 = vpop.f32.mrf.mxu0 }
 0x83f   :  { %v5097_v61 = vadd.f32 %v6493_v2, %v6285_v49 }
 0x840   :  { %v5091_v43 = vpop.f32.mrf.mxu0 }
 0x841   :  { %v5119_v50 = vcombine.high %v5097_v61, %v5097_v61  ;;  %v5126_v63 = vrot.slane %v5097_v61, %v6885_v7  ;;  %v5092_v13 = vadd.f32 %v6285_v49, %v5091_v43 }
 0x843   :  { %v5133_v36 = vrot.slane %v5119_v50, %v6885_v7  ;;  %v5134_v48 = vcombine.high %v5126_v63, %v5126_v63  ;;  %v5102_v51 = vcombine.high %v5092_v13, %v5092_v13  ;;  %v5109_v44 = vrot.slane %v5092_v13, %v6885_v7 }
 0x844   :  { %v5148_v4 = vadd.f32 %v6587_v8, %v5126_v63 }
 0x845   :  { %v5135_v39 = vcombine.high %v5133_v36, %v5133_v36  ;;  %v5149_v14 = vadd.f32 %v6588_v23, %v5134_v48  ;;  %v5116_v18 = vrot.slane %v5102_v51, %v6885_v7  ;;  %v5117_v0 = vcombine.high %v5109_v44, %v5109_v44 }
 0x846   :  { %v5150_v31 = vadd.f32 %v6589_v22, %v5133_v36  ;;  %v5144_v21 = vadd.f32 %v6591_v5, %v5109_v44 }
 0x847   :  { %v5151_v29 = vadd.f32 %v6590_v1, %v5135_v39  ;;  %v5177_v58 = vcombine.low %v5148_v4, %v5149_v14  ;;  %v5118_v52 = vcombine.high %v5116_v18, %v5116_v18  ;;  %v5145_v16 = vadd.f32 %v6592_v20, %v5117_v0 }
 0x848   :  { %v5146_v24 = vadd.f32 %v6593_v11, %v5116_v18 }
 0x849   :  { %v5147_v41 = vadd.f32 %v6594_v25, %v5118_v52  ;;  %v5178_v12 = vcombine.low %v5150_v31, %v5151_v29  ;;  %v5160_v33 = vcombine.low %v5144_v21, %v5145_v16  ;;  %v5185_v28 = vrot.slane %v5177_v58, %v6885_v7 }
 0x84b   :  { %v5192_v30 = vrot.slane %v5178_v12, %v6885_v7  ;;  %v5161_v56 = vcombine.low %v5146_v24, %v5147_v41  ;;  %v5168_v17 = vrot.slane %v5160_v33, %v6885_v7 }
 0x84d   :  { %v5193_v27 = vcombine.low %v5185_v28, %v5192_v30  ;;  %v5175_v57 = vrot.slane %v5161_v56, %v6885_v7 }
 0x84f   :  { %v5199_v3 = vsel %vm208_vm0, %v5193_v27, 0.0  ;;  %v5176_v53 = vcombine.low %v5168_v17, %v5175_v57  ;;  %v5490_v27 = vld [vmem:[#allocation10 + $0x18] sm:$0xff]  ;;  %v5489_v17 = vld [vmem:[#allocation10 + $0x10] sm:$0xff]  ;;  %v5488_v57 = vld [vmem:[#allocation10 + $0x8] sm:$0xff] }
 0x850   :  { %5200 = vadd.xlane.f32.xlu1 %v5199_v3  ;;  %6494 = vmatprep.subr.mxu1 %v5490_v27  ;;  %v5487_v3 = vld [vmem:[#allocation10] sm:$0xff] }
 0x851   :  { %v5196_v34 = vsel %vm208_vm0, %v5176_v53, 0.0  ;;  %6495 = vmatpush3.msra.mxu1 %v5490_v27  ;;  %v5628_v53 = vld [vmem:[%s8489_s13 + $0x38] sm:$0xff] }
 0x852   :  { %5197 = vadd.xlane.f32.xlu0 %v5196_v34  ;;  %6496 = vmatprep.subr.mxu1 %v5489_v17  ;;  %v5627_v34 = vld [vmem:[%s8489_s13 + $0x30] sm:$0xff] }
 0x853   :  { %6497 = vmatpush3.msra.mxu1 %v5489_v17  ;;  %6505 = vmatprep.subr.mxu0 %v5628_v53 }
 0x854   :  { %6498 = vmatprep.subr.mxu1 %v5488_v57  ;;  %6506 = vmatpush3.msra.mxu0 %v5628_v53 }
 0x855   :  { %6499 = vmatpush3.msra.mxu1 %v5488_v57  ;;  %6507 = vmatprep.subr.mxu0 %v5627_v34 }
 0x856   :  { %6500 = vmatprep.subr.mxu1 %v5487_v3  ;;  %6508 = vmatpush3.msra.mxu0 %v5627_v34 }
 0x857   :  { %6501 = vmatpush3.msra.mxu1 %v5487_v3  ;;  %6509 = vmatprep.subr.mxu0 %v5626_v38 }
 0x858   :  { %6510 = vmatpush3.msra.mxu0 %v5626_v38 }
 0x859   :  { %6511 = vmatprep.subr.mxu0 %v5625_v55 }
 0x85a   :  { %6512 = vmatpush3.msra.mxu0 %v5625_v55 }
 0x8d9   :  { %v5201_v59 = vpop.xlane.xlu1 %5200 }
 0x8da   :  { %v5204_v32 = vmul.f32 0.03125, %v5201_v59  ;;  %v5437_v59 = vrot.slane %v5423_v15, %v6885_v7 }
 0x8db   :  { %v5198_v46 = vpop.xlane.xlu0 %5197 }
 0x8dc   :  { %v5241_v49 = vrot.slane %v5204_v32, %v8285_v10  ;;  %v5248_v2 = vrot.slane %v5204_v32, %v8288_v47  ;;  %v5255_v61 = vrot.slane %v5204_v32, %v8291_v45  ;;  %v5262_v43 = vrot.slane %v5204_v32, %v8294_v42 }
 0x8dd   :  { %v5203_v50 = vmul.f32 0.03125, %v5198_v46  ;;  %v5465_v32 = vrot.slane %v6289_v62, %v6885_v7  ;;  %v6290_v62 = vld [vmem:[%s8488_s12] ss:$0 sm:$0xff] }
 0x8de   :  { %v8300_v63 = vsub.f32 %v5148_v4, %v5241_v49  ;;  %v8302_v13 = vsub.f32 %v5149_v14, %v5248_v2  ;;  %v8304_v36 = vsub.f32 %v5150_v31, %v5255_v61  ;;  %v8306_v48 = vsub.f32 %v5151_v29, %v5262_v43 }
 0x8df   :  { %v5213_v51 = vrot.slane %v5203_v50, %v8285_v10  ;;  %v5220_v44 = vrot.slane %v5203_v50, %v8288_v47  ;;  %v5227_v39 = vrot.slane %v5203_v50, %v8291_v45  ;;  %v5234_v8 = vrot.slane %v5203_v50, %v8294_v42 }
 0x8e0   :  { %v5283_v23 = vmul.f32 %v8300_v63, %v8300_v63  ;;  %v5284_v4 = vmul.f32 %v8302_v13, %v8302_v13  ;;  %v5285_v14 = vmul.f32 %v8304_v36, %v8304_v36  ;;  %v5286_v18 = vmul.f32 %v8306_v48, %v8306_v48 }
 0x8e1   :  { %v8320_v0 = vsub.f32 %v5144_v21, %v5213_v51  ;;  %v8322_v22 = vsub.f32 %v5145_v16, %v5220_v44  ;;  %v8324_v31 = vsub.f32 %v5146_v24, %v5227_v39  ;;  %v8326_v1 = vsub.f32 %v5147_v41, %v5234_v8 }
 0x8e2   :  { %v5312_v29 = vcombine.low %v5283_v23, %v5284_v4  ;;  %v5313_v58 = vcombine.low %v5285_v14, %v5286_v18  ;;  %v5438_v49 = vcombine.high %v5430_v9, %v5430_v9  ;;  %v5472_v2 = vrot.slane %v5458_v40, %v6885_v7 }
 0x8e3   :  { %v5279_v52 = vmul.f32 %v8320_v0, %v8320_v0  ;;  %v5280_v5 = vmul.f32 %v8322_v22, %v8322_v22  ;;  %v5281_v20 = vmul.f32 %v8324_v31, %v8324_v31  ;;  %v5282_v21 = vmul.f32 %v8326_v1, %v8326_v1 }
 0x8e4   :  { %v5320_v41 = vrot.slane %v5312_v29, %v6885_v7  ;;  %v5327_v12 = vrot.slane %v5313_v58, %v6885_v7  ;;  %v5439_v44 = vcombine.high %v5437_v59, %v5437_v59  ;;  %v5473_v39 = vcombine.high %v5465_v32, %v5465_v32 }
 0x8e5   :  { %v5295_v16 = vcombine.low %v5279_v52, %v5280_v5  ;;  %v5296_v11 = vcombine.low %v5281_v20, %v5282_v21  ;;  %v5474_v29 = vcombine.high %v5472_v2, %v5472_v2 }
 0x8e6   :  { %v5328_v30 = vcombine.low %v5320_v41, %v5327_v12 }
 0x8e7   :  { %v5303_v24 = vrot.slane %v5295_v16, %v6885_v7  ;;  %v5310_v25 = vrot.slane %v5296_v11, %v6885_v7 }
 0x8e8   :  { %v5334_v56 = vsel %vm208_vm0, %v5328_v30, 0.0 }
 0x8e9   :  { %v5311_v33 = vcombine.low %v5303_v24, %v5310_v25 }
 0x8eb   :  { %v5331_v28 = vsel %vm208_vm0, %v5311_v33, 0.0 }
 0x8ec   :  { %5332 = vadd.xlane.f32.xlu0 %v5331_v28 }
 0x8f0   :  { %5335 = vadd.xlane.f32.xlu0 %v5334_v56 }
 0x975   :  { %v5333_v37 = vpop.xlane.xlu0 %5332 }
 0x976   :  { %v5337_v19 = vmul.f32 0.03125, %v5333_v37 }
 0x978   :  { %v5339_v60 = vadd.f32 1e-05, %v5337_v19 }
 0x979   :  { %v5336_v35 = vpop.xlane.xlu0 %5335 }
 0x97a   :  { %6579 = vrsqrt.f32 %v5339_v60  ;;  %v5338_v26 = vmul.f32 0.03125, %v5336_v35  ;;  %v5624_v35 = vld [vmem:[%s8489_s13 + $0x18] sm:$0xff] }
 0x97b   :  { %6513 = vmatprep.subr.mxu0 %v5624_v35 }
 0x97c   :  { %v5340_v6 = vadd.f32 1e-05, %v5338_v26  ;;  %6514 = vmatpush3.msra.mxu0 %v5624_v35  ;;  %v5623_v26 = vld [vmem:[%s8489_s13 + $0x10] sm:$0xff] }
 0x97d   :  { %6515 = vmatprep.subr.mxu0 %v5623_v26 }
 0x97e   :  { %6581 = vrsqrt.f32 %v5340_v6  ;;  %v5622_v6 = vld [vmem:[%s8489_s13 + $0x8] sm:$0xff]  ;;  %6516 = vmatpush3.msra.mxu0 %v5623_v26 }
 0x97f   :  { %6517 = vmatprep.subr.mxu0 %v5622_v6 }
 0x980   :  { %6518 = vmatpush3.msra.mxu0 %v5622_v6 }
 0x981   :  { %6519 = vmatprep.subr.mxu0 %v5621_v54 }
 0x982   :  { %6520 = vmatpush3.msra.mxu0 %v5621_v54 }
 0x987   :  { %v6580_v46 = vpop.eup %6579 }
 0x988   :  { %v5351_v61 = vrot.slane %v6580_v46, %v8285_v10  ;;  %v5358_v43 = vrot.slane %v6580_v46, %v8288_v47  ;;  %v5365_v50 = vrot.slane %v6580_v46, %v8291_v45  ;;  %v5372_v51 = vrot.slane %v6580_v46, %v8294_v42 }
 0x98a   :  { %v5409_v8 = vmul.f32 %v5351_v61, %v8320_v0  ;;  %v5410_v23 = vmul.f32 %v5358_v43, %v8322_v22  ;;  %v5411_v4 = vmul.f32 %v5365_v50, %v8324_v31  ;;  %v5412_v14 = vmul.f32 %v5372_v51, %v8326_v1 }
 0x98b   :  { %v6582_v18 = vpop.eup %6581 }
 0x98c   :  { %v5386_v58 = vrot.slane %v6582_v18, %v8288_v47  ;;  %v5400_v52 = vrot.slane %v6582_v18, %v8294_v42  ;;  %v5444_v5 = vmul.f32 %v5430_v9, %v5409_v8  ;;  %v5445_v20 = vmul.f32 %v5438_v49, %v5410_v23 }
 0x98d   :  { %v5446_v21 = vmul.f32 %v5437_v59, %v5411_v4  ;;  %v5447_v16 = vmul.f32 %v5439_v44, %v5412_v14  ;;  %v5379_v11 = vrot.slane %v6582_v18, %v8285_v10  ;;  %v5393_v0 = vrot.slane %v6582_v18, %v8291_v45 }
 0x98e   :  { %v5414_v22 = vmul.f32 %v5386_v58, %v8302_v13  ;;  %v5416_v31 = vmul.f32 %v5400_v52, %v8306_v48  ;;  %v8378_v24 = vadd.f32 %v5465_v32, %v5444_v5  ;;  %v8380_v1 = vadd.f32 %v5473_v39, %v5445_v20 }
 0x98f   :  { %v8382_v25 = vadd.f32 %v5472_v2, %v5446_v21  ;;  %v8384_v41 = vadd.f32 %v5474_v29, %v5447_v16  ;;  %v5413_v12 = vmul.f32 %v5379_v11, %v8300_v63  ;;  %v5415_v33 = vmul.f32 %v5393_v0, %v8304_v36 }
 0x990   :  { %v5449_v28 = vmul.f32 %v5438_v49, %v5414_v22  ;;  %v5451_v30 = vmul.f32 %v5439_v44, %v5416_v31  ;;  %v5506_v56 = vcombine.low %v8378_v24, %v8380_v1  ;;  %v6293_v49 = vld [vmem:[%s8490_s14] ss:$0 sm:$0xff] }
 0x991   :  { %v5507_v13 = vcombine.low %v8382_v25, %v8384_v41  ;;  %v5448_v48 = vmul.f32 %v5430_v9, %v5413_v12  ;;  %v5450_v27 = vmul.f32 %v5437_v59, %v5415_v33 }
 0x992   :  { %v5484_v17 = vadd.f32 %v5473_v39, %v5449_v28  ;;  %v5486_v57 = vadd.f32 %v5474_v29, %v5451_v30  ;;  %v5514_v3 = vrot.slane %v5506_v56, %v6885_v7 }
 0x993   :  { %v5521_v53 = vrot.slane %v5507_v13, %v6885_v7  ;;  %v5483_v34 = vadd.f32 %v5465_v32, %v5448_v48  ;;  %v5485_v63 = vadd.f32 %v5472_v2, %v5450_v27 }
 0x995   :  { %v5522_v38 = vcombine.low %v5514_v3, %v5521_v53  ;;  %v5523_v36 = vcombine.low %v5483_v34, %v5484_v17  ;;  %v5524_v55 = vcombine.low %v5485_v63, %v5486_v57 }
 0x997   :  { %6502 = vmatprep.mubr.msk.f32.mxu1 %vm208_vm0, %v5522_v38  ;;  %v5531_v37 = vrot.slane %v5523_v36, %v6885_v7  ;;  %v5538_v19 = vrot.slane %v5524_v55, %v6885_v7 }
 0x999   :  { %v5539_v60 = vcombine.low %v5531_v37, %v5538_v19 }
 0x99b   :  { %6503 = vmatmul.mubr.msk.f32.vlgmr.msra.gmra.mxu1 %vm208_vm0, %v5539_v60 }
 0xa5b   :  { %v6504_v15 = vpop.f32.mrf.mxu1 }
 0xa5c   :  { %v5616_v9 = vadd.f32 %v6504_v15, %v6290_v62 }
 0xa5d   :  { %v5610_v40 = vpop.f32.mrf.mxu1 }
 0xa5e   :  { %v5611_v59 = vadd.f32 %v6290_v62, %v5610_v40  ;;  %v5620_v46 = vmax.f32 %v5616_v9, 0.0 }
 0xa60   :  { %v5619_v32 = vmax.f32 %v5611_v59, 0.0 }
 0xa62   :  { %6521 = vmatprep.mubr.msk.f32.mxu0 %vm5636_vm6, %v5619_v32 }
 0xa63   :  { %6522 = vmatmul.mubr.msk.f32.vlgmr.msra.gmra.mxu0 %vm5636_vm6, %v5620_v46 }
 0xb23   :  { %v6523_v2 = vpop.f32.mrf.mxu0 }
 0xb24   :  { %v5715_v61 = vadd.f32 %v6523_v2, %v6293_v49 }
 0xb25   :  { %v5709_v43 = vpop.f32.mrf.mxu0 }
 0xb26   :  { %v5737_v50 = vcombine.high %v5715_v61, %v5715_v61  ;;  %v5744_v51 = vrot.slane %v5715_v61, %v6885_v7  ;;  %v5710_v44 = vadd.f32 %v6293_v49, %v5709_v43 }
 0xb28   :  { %v5751_v39 = vrot.slane %v5737_v50, %v6885_v7  ;;  %v5752_v8 = vcombine.high %v5744_v51, %v5744_v51  ;;  %v5720_v23 = vcombine.high %v5710_v44, %v5710_v44  ;;  %v5727_v4 = vrot.slane %v5710_v44, %v6885_v7 }
 0xb29   :  { %v5766_v18 = vadd.f32 %v5744_v51, %v5483_v34 }
 0xb2a   :  { %v5753_v14 = vcombine.high %v5751_v39, %v5751_v39  ;;  %v5767_v29 = vadd.f32 %v5752_v8, %v5484_v17  ;;  %v5734_v58 = vrot.slane %v5720_v23, %v6885_v7  ;;  %v5735_v52 = vcombine.high %v5727_v4, %v5727_v4 }
 0xb2b   :  { %v5768_v5 = vadd.f32 %v5751_v39, %v5485_v63  ;;  %v5762_v11 = vadd.f32 %v5727_v4, %v8378_v24 }
 0xb2c   :  { %v5769_v20 = vadd.f32 %v5753_v14, %v5486_v57  ;;  %v5795_v21 = vcombine.low %v5766_v18, %v5767_v29  ;;  %v5736_v16 = vcombine.high %v5734_v58, %v5734_v58  ;;  %v5763_v0 = vadd.f32 %v5735_v52, %v8380_v1 }
 0xb2d   :  { %v5764_v22 = vadd.f32 %v5734_v58, %v8382_v25 }
 0xb2e   :  { %v5765_v31 = vadd.f32 %v5736_v16, %v8384_v41  ;;  %v5796_v12 = vcombine.low %v5768_v5, %v5769_v20  ;;  %v5778_v33 = vcombine.low %v5762_v11, %v5763_v0  ;;  %v5803_v28 = vrot.slane %v5795_v21, %v6885_v7 }
 0xb30   :  { %v5810_v30 = vrot.slane %v5796_v12, %v6885_v7  ;;  %v5779_v56 = vcombine.low %v5764_v22, %v5765_v31  ;;  %v5786_v48 = vrot.slane %v5778_v33, %v6885_v7 }
 0xb32   :  { %v5811_v13 = vcombine.low %v5803_v28, %v5810_v30  ;;  %v5793_v27 = vrot.slane %v5779_v56, %v6885_v7 }
 0xb34   :  { %v5817_v24 = vsel %vm208_vm0, %v5811_v13, 0.0  ;;  %v5794_v17 = vcombine.low %v5786_v48, %v5793_v27 }
 0xb35   :  { %5818 = vadd.xlane.f32.xlu0 %v5817_v24 }
 0xb36   :  { %v5814_v1 = vsel %vm208_vm0, %v5794_v17, 0.0 }
 0xb37   :  { %5815 = vadd.xlane.f32.xlu1 %v5814_v1 }
 0xbbe   :  { %v5819_v25 = vpop.xlane.xlu0 %5818 }
 0xbbf   :  { %v5821_v41 = vmul.f32 0.03125, %v5819_v25 }
 0xbc0   :  { %v5816_v57 = vpop.xlane.xlu1 %5815 }
 0xbc1   :  { %v5858_v3 = vrot.slane %v5821_v41, %v8285_v10  ;;  %v5865_v53 = vrot.slane %v5821_v41, %v8288_v47  ;;  %v5872_v34 = vrot.slane %v5821_v41, %v8291_v45  ;;  %v5879_v63 = vrot.slane %v5821_v41, %v8294_v42 }
 0xbc2   :  { %v5820_v38 = vmul.f32 0.03125, %v5816_v57 }
 0xbc3   :  { %v5892_v36 = vsub.f32 %v5766_v18, %v5858_v3  ;;  %v5893_v55 = vsub.f32 %v5767_v29, %v5865_v53  ;;  %v5894_v37 = vsub.f32 %v5768_v5, %v5872_v34  ;;  %v5895_v19 = vsub.f32 %v5769_v20, %v5879_v63 }
 0xbc4   :  { %v5830_v60 = vrot.slane %v5820_v38, %v8285_v10  ;;  %v5837_v35 = vrot.slane %v5820_v38, %v8288_v47  ;;  %v5844_v26 = vrot.slane %v5820_v38, %v8291_v45  ;;  %v5851_v6 = vrot.slane %v5820_v38, %v8294_v42 }
 0xbc5   :  { %v5900_v54 = vmul.f32 %v5892_v36, %v5892_v36  ;;  %v5901_v62 = vmul.f32 %v5893_v55, %v5893_v55  ;;  %v5902_v15 = vmul.f32 %v5894_v37, %v5894_v37  ;;  %v5903_v9 = vmul.f32 %v5895_v19, %v5895_v19 }
 0xbc6   :  { %v5888_v40 = vsub.f32 %v5762_v11, %v5830_v60  ;;  %v5889_v59 = vsub.f32 %v5763_v0, %v5837_v35  ;;  %v5890_v32 = vsub.f32 %v5764_v22, %v5844_v26  ;;  %v5891_v46 = vsub.f32 %v5765_v31, %v5851_v6  ;;  %v6296_v22 = vld [vmem:[%s8493_s17] ss:$0 sm:$0xff]  ;;  %s6745_s17 = smov [#allocation11]  }
 0xbc7   :  { %v5929_v49 = vcombine.low %v5900_v54, %v5901_v62  ;;  %v5930_v2 = vcombine.low %v5902_v15, %v5903_v9  ;;  %v6297_v31 = vld [vmem:[%s8494_s18] ss:$0 sm:$0xff]  ;;  %v6040_v12 = vcombine.high %v6296_v22, %v6296_v22  ;;  %v6047_v28 = vrot.slane %v6296_v22, %v6885_v7  ;;  %s6118_s18 = sshll.u32 %s6745_s17, 4  ;;  %s6119_s18 = int_to_ptr.vmem [resolvable:$true] %s6118_s18 }
 0xbc8   :  { %v5896_v61 = vmul.f32 %v5888_v40, %v5888_v40  ;;  %v5897_v43 = vmul.f32 %v5889_v59, %v5889_v59  ;;  %v5898_v50 = vmul.f32 %v5890_v32, %v5890_v32  ;;  %v5899_v51 = vmul.f32 %v5891_v46, %v5891_v46  ;;  %s6695_s11 = scalar_lea.vmem %s6119_s18, 256  ;;  %p6700_p12 = scmp.lt.s32.totalorder %s6119_s18, %s6119_s18 }
 0xbc9   :  { %v5937_v44 = vrot.slane %v5929_v49, %v6885_v7  ;;  %v5944_v39 = vrot.slane %v5930_v2, %v6885_v7  ;;  %v6075_v33 = vcombine.high %v6297_v31, %v6297_v31  ;;  %v6054_v30 = vrot.slane %v6040_v12, %v6885_v7  ;;  %p6696_p11 = scmp.ne.s32.totalorder %s6119_s18, %s6695_s11  ;;  %p6701_p13 = scmp.lt.s32.totalorder %s6695_s11, %s6695_s11 }
 0xbca   :  { %v5912_v8 = vcombine.low %v5896_v61, %v5897_v43  ;;  %v5913_v23 = vcombine.low %v5898_v50, %v5899_v51  ;;  %v6082_v56 = vrot.slane %v6297_v31, %v6885_v7  ;;  %v6055_v27 = vcombine.high %v6047_v28, %v6047_v28 }
 0xbcb   :  { %v5945_v4 = vcombine.low %v5937_v44, %v5944_v39  ;;  %v6089_v13 = vrot.slane %v6075_v33, %v6885_v7  ;;  %v6056_v24 = vcombine.high %v6054_v30, %v6054_v30  ;;  %p6702_p0 = por %p6701_p13, %p6700_p12 }
 0xbcc   :  { %v5920_v14 = vrot.slane %v5912_v8, %v6885_v7  ;;  %v5927_v18 = vrot.slane %v5913_v23, %v6885_v7  ;;  %v6090_v57 = vcombine.high %v6082_v56, %v6082_v56 }
 0xbcd   :  { %v5951_v29 = vsel %vm208_vm0, %v5945_v4, 0.0  ;;  %v6091_v3 = vcombine.high %v6089_v13, %v6089_v13  ;;  %p6703_p1 = pnand %p6702_p0, %p6696_p11 }
 0xbce   :  { %5952 = vadd.xlane.f32.xlu0 %v5951_v29  ;;  %v5928_v58 = vcombine.low %v5920_v14, %v5927_v18 }
 0xbd0   :  { %v5948_v52 = vsel %vm208_vm0, %v5928_v58, 0.0 }
 0xbd1   :  { %5949 = vadd.xlane.f32.xlu1 %v5948_v52 }
 0xc57   :  { %v5953_v5 = vpop.xlane.xlu0 %5952 }
 0xc58   :  { %v5955_v20 = vmul.f32 0.03125, %v5953_v5 }
 0xc5a   :  { %v5957_v21 = vadd.f32 1e-05, %v5955_v20  ;;  %v5950_v16 = vpop.xlane.xlu1 %5949 }
 0xc5b   :  { %v5954_v11 = vmul.f32 0.03125, %v5950_v16 }
 0xc5c   :  { %6583 = vrsqrt.f32 %v5957_v21 }
 0xc5d   :  { %v5956_v0 = vadd.f32 1e-05, %v5954_v11 }
 0xc5f   :  { %6585 = vrsqrt.f32 %v5956_v0 }
 0xc69   :  { %v6584_v48 = vpop.eup %6583 }
 0xc6a   :  { %v5996_v17 = vrot.slane %v6584_v48, %v8285_v10  ;;  %v6003_v1 = vrot.slane %v6584_v48, %v8288_v47  ;;  %v6010_v25 = vrot.slane %v6584_v48, %v8291_v45  ;;  %v6017_v41 = vrot.slane %v6584_v48, %v8294_v42 }
 0xc6c   :  { %v6586_v53 = vpop.eup %6585  ;;  %v6030_v34 = vmul.f32 %v5996_v17, %v5892_v36  ;;  %v6031_v63 = vmul.f32 %v6003_v1, %v5893_v55  ;;  %v6032_v38 = vmul.f32 %v6010_v25, %v5894_v37  ;;  %v6033_v60 = vmul.f32 %v6017_v41, %v5895_v19 }
 0xc6d   :  { %v5968_v7 = vrot.slane %v6586_v53, %v8285_v10  ;;  %v5975_v35 = vrot.slane %v6586_v53, %v8288_v47  ;;  %v5982_v26 = vrot.slane %v6586_v53, %v8291_v45  ;;  %v5989_v6 = vrot.slane %v6586_v53, %v8294_v42 }
 0xc6e   :  { %v6065_v54 = vmul.f32 %v6047_v28, %v6030_v34  ;;  %v6066_v62 = vmul.f32 %v6055_v27, %v6031_v63  ;;  %v6067_v15 = vmul.f32 %v6054_v30, %v6032_v38  ;;  %v6068_v9 = vmul.f32 %v6056_v24, %v6033_v60 }
 0xc6f   :  { %v6026_v49 = vmul.f32 %v5968_v7, %v5888_v40  ;;  %v6027_v2 = vmul.f32 %v5975_v35, %v5889_v59  ;;  %v6028_v61 = vmul.f32 %v5982_v26, %v5890_v32  ;;  %v6029_v43 = vmul.f32 %v5989_v6, %v5891_v46 }
 0xc70   :  { %v6100_v36 = vadd.f32 %v6082_v56, %v6065_v54  ;;  %v6101_v55 = vadd.f32 %v6090_v57, %v6066_v62  ;;  %v6102_v37 = vadd.f32 %v6089_v13, %v6067_v15  ;;  %v6103_v19 = vadd.f32 %v6091_v3, %v6068_v9 }
 0xc71   :  { %v6061_v10 = vmul.f32 %v6047_v28, %v6026_v49  ;;  %v6062_v47 = vmul.f32 %v6055_v27, %v6027_v2  ;;  %v6063_v50 = vmul.f32 %v6054_v30, %v6028_v61  ;;  %v6064_v45 = vmul.f32 %v6056_v24, %v6029_v43 }
 0xc72   :  { %6109 = vst.msk [vmem:[#allocation11 + $0x8] sm:$0x3] %vm6104_vm7, %v6100_v36  ;;  %6110 = vst.msk [vmem:[#allocation11 + $0xa] sm:$0x3] %vm6104_vm7, %v6101_v55 }
 0xc73   :  { %6111 = vst.msk [vmem:[#allocation11 + $0xc] sm:$0x3] %vm6104_vm7, %v6102_v37  ;;  %6112 = vst.msk [vmem:[#allocation11 + $0xe] sm:$0x3] %vm6104_vm7, %v6103_v19  ;;  %v6096_v42 = vadd.f32 %v6082_v56, %v6061_v10  ;;  %v6097_v40 = vadd.f32 %v6090_v57, %v6062_v47  ;;  %v6098_v59 = vadd.f32 %v6089_v13, %v6063_v50 }
 0xc74   :  { %v6099_v32 = vadd.f32 %v6091_v3, %v6064_v45 }
 0xc75   :  { %6105 = vst.msk [vmem:[#allocation11] sm:$0x3] %vm6104_vm7, %v6096_v42  ;;  %6106 = vst.msk [vmem:[#allocation11 + $0x2] sm:$0x3] %vm6104_vm7, %v6097_v40 }
 0xc76   :  { %6107 = vst.msk [vmem:[#allocation11 + $0x4] sm:$0x3] %vm6104_vm7, %v6098_v59  ;;  %6108 = vst.msk [vmem:[#allocation11 + $0x6] sm:$0x3] %vm6104_vm7, %v6099_v32 }
 0xc77   :  { %6706 = shalt.err (!%p6703_p1)
}
 0xc78   :  { %6124 = dma.vmem_to_hbm [thread:$0]  %s6119_s18, 256, %s8495_s19, [#allocation4], %s6725_s22, %s6725_s22, %s6726_s2  }
 0xc79   :  { %6721 = dma.done.wait [#allocation4], 256  }
 0xc7a   :  { %6722 = vsyncadd [#allocation4], 4294967040 }
 0xc7b   :  { %6128 = vsyncpa [#allocation3], 1 }
 0xc7c   :  { %6129 = vsyncpa [#allocation6], 1 }
 0xc7d   :  { %6130 = vsyncpa [#allocation9], 1 }
 0xc7e   :  { %6131 = vsyncpa [#allocation4], 1 }

</bundles_post_ra>
